<compile_context>
chip_gen: v7x
topology: tpu7x:2x2x1
jax: 0.10.0
libtpu: 0.0.40
codegen_flags: <defaults>
</compile_context>

<pallas_src>
import functools
import math

import jax
import jax.numpy as jnp
from jax import lax
from jax.experimental import pallas as pl
from jax.experimental.pallas import tpu as pltpu


def mha_ff_kernel(x_ref, feats_ref,
                  wq_ref, bq_ref, wk_ref, bk_ref, wv_ref, bv_ref,
                  wo_ref, bo_ref, gamma_ref, beta_ref,
                  out_ref, ctx_ref, *, bt, lq, lk, h, d_k, eps):
    """One grid step = `bt` batch elements, fully fused:
    LayerNorm -> Q / K / V projections -> per-head attention (ctx into VMEM
    scratch) -> single output projection (K = D) -> residual add."""
    D = h * d_k
    cdt = wq_ref.dtype                                     # bf16 compute dtype

    # ---- LayerNorm over the flattened (bt*lq, D) slab; f32 statistics -------
    # (annotated-transformer LayerNorm: unbiased std, eps added to std)
    # exact reciprocal on the activation path (approx only for softmax denom).
    x = x_ref[...].astype(jnp.float32)                     # (bt*lq, D) transient
    mean = jnp.mean(x, axis=-1, keepdims=True)
    var = jnp.sum((x - mean) ** 2, axis=-1, keepdims=True) * (1.0 / (D - 1))
    xn = gamma_ref[...] * ((x - mean) / (jnp.sqrt(var) + eps)) + beta_ref[...]
    xn = xn.astype(cdt)

    # ---- Projections: bf16 MXU operands, f32 accumulation --------------------
    # 1/sqrt(d_k) is folded into wq/bq host-side; feats arrives already in bf16.
    q = (jnp.dot(xn, wq_ref[...],
                 preferred_element_type=jnp.float32) + bq_ref[...]).astype(cdt)
    f = feats_ref[...]                                     # (bt*lk, D) bf16
    k = (jnp.dot(f, wk_ref[...],
                 preferred_element_type=jnp.float32) + bk_ref[...]).astype(cdt)
    v = (jnp.dot(f, wv_ref[...],
                 preferred_element_type=jnp.float32) + bv_ref[...]).astype(cdt)

    # ---- Per-sequence, per-head attention (bt, h static -> unrolled) --------
    # TODO(synk): at production bt*h move the b loop into the grid / fori_loop,
    # tile lk with an online-softmax recurrence, and use a head-padded lane
    # layout when d_k < 128 to avoid the masked sub-128-lane slices below.
    for b in range(bt):
        q_b = q[b * lq:(b + 1) * lq, :]
        k_b = k[b * lk:(b + 1) * lk, :]
        v_b = v[b * lk:(b + 1) * lk, :]
        for i in range(h):
            sl = slice(i * d_k, (i + 1) * d_k)
            # scores = q_h @ k_h^T (contract last dims; no transposed copy)
            s = lax.dot_general(q_b[:, sl], k_b[:, sl],
                                (((1,), (1,)), ((), ())),
                                preferred_element_type=jnp.float32)   # (lq, lk)
            s = s - jnp.max(s, axis=-1, keepdims=True)
            p = jnp.exp(s)
            p = p * pl.reciprocal(jnp.sum(p, axis=-1, keepdims=True), approx=True)
            ctx = jnp.dot(p.astype(cdt), v_b[:, sl],
                          preferred_element_type=jnp.float32)         # (lq, d_k)
            ctx_ref[b * lq:(b + 1) * lq, sl] = ctx.astype(cdt)

    # ---- Output projection: ONE matmul contracting K = D, then residual -----
    o = jnp.dot(ctx_ref[...], wo_ref[...],
                preferred_element_type=jnp.float32)                   # (rows, D)
    out_ref[...] = (x_ref[...].astype(jnp.float32) + o + bo_ref[...]
                    ).astype(out_ref.dtype)


def _num_tensorcores():
    """Grid steps are sharded across TensorCores only on v7x (2 TC/chip)."""
    try:
        kind = jax.devices()[0].device_kind.lower()
        return 2 if ("v7" in kind or "7x" in kind) else 1
    except Exception:
        return 1


def _vmem_limit_bytes():
    """~3/4 of physical VMEM: ~48 MiB on v7x (64 MiB), ~96 MiB on v5e/v6e."""
    try:
        cap = pltpu.get_tpu_info().vmem_capacity_bytes
        return min(int(cap * 3 // 4), 112 * 1024 * 1024)
    except Exception:
        return 48 * 1024 * 1024          # safe on every chip, incl. v7x


def _pick_block_b(B, Lq, Lk, n_tc):
    """Batch sequences per grid step: big blocks (up to ~1024 rows) to amortize
    per-step overhead; 1-TC chips take the single largest block, v7x keeps an
    even step count so both TensorCores get equal work."""
    max_rows = 1024

    def ok(c):
        if B % c:
            return False
        if c * max(Lq, Lk) > max_rows:
            return False
        rq, rk = c * Lq, c * Lk
        if rq % 8 and rq != B * Lq:
            return False
        if rk % 8 and rk != B * Lk:
            return False
        return True

    cands = [c for c in range(1, B + 1) if ok(c)] or [1]
    if n_tc > 1:
        balanced = [c for c in cands if (B // c) % n_tc == 0]
        if balanced:
            return max(balanced)
    return max(cands)                    # 1 TC: fewest, biggest grid steps


def mha_ff(x, feats, params, *, h, block_b=None, compute_dtype=jnp.bfloat16):
    B, Lq, D = x.shape
    Bf, Lk, Df = feats.shape
    assert Bf == B and Df == D and D % h == 0
    d_k = D // h
    wq, bq, wk, bk, wv, bv, wo, bo, gamma, beta = params

    n_tc = _num_tensorcores()
    if block_b is None:
        block_b = _pick_block_b(B, Lq, Lk, n_tc)
    assert B % block_b == 0, "block_b must divide the batch size"
    rows_q, rows_k = block_b * Lq, block_b * Lk

    # ---- host-side (free) weight prep: pre-transpose to (in,out), fold the
    #      1/sqrt(d_k) scale into Wq/bq, bf16 matmul operands, f32 bias/LN ----
    scale = 1.0 / math.sqrt(d_k)
    wq_t = (wq.T * scale).astype(compute_dtype)                    # (D, D)
    wk_t = wk.T.astype(compute_dtype)                              # (D, D)
    wv_t = wv.T.astype(compute_dtype)                              # (D, D)
    wo_t = wo.T.astype(compute_dtype)                              # (D, D)
    bq_ = (bq.reshape(1, D) * scale).astype(jnp.float32)
    bk_ = bk.reshape(1, D).astype(jnp.float32)
    bv_ = bv.reshape(1, D).astype(jnp.float32)
    bo_ = bo.reshape(1, D).astype(jnp.float32)
    gamma_ = gamma.reshape(1, D).astype(jnp.float32)
    beta_ = beta.reshape(1, D).astype(jnp.float32)

    # flatten (B, L, D) -> (B*L, D): lane-dense 2-D slabs for every block.
    # x stays f32 (LayerNorm stats + residual); feats is cast to bf16 here so
    # its DMA is half the bytes.
    x2 = x.reshape(B * Lq, D)
    f2 = feats.reshape(B * Lk, D).astype(compute_dtype)

    kernel = functools.partial(mha_ff_kernel, bt=block_b, lq=Lq, lk=Lk,
                               h=h, d_k=d_k, eps=1e-6)
    vmem_limit = _vmem_limit_bytes()

    def build(single_buffer_weights):
        if single_buffer_weights:
            # grid-invariant operands: single-buffered (no pointless double-buf)
            inv = lambda shape: pl.BlockSpec(shape, lambda b: (0, 0),
                                             pipeline_mode=pl.Buffered(1))
        else:
            inv = lambda shape: pl.BlockSpec(shape, lambda b: (0, 0))
        return pl.pallas_call(
            kernel,
            out_shape=jax.ShapeDtypeStruct((B * Lq, D), x.dtype),
            grid=(B // block_b,),
            in_specs=[
                pl.BlockSpec((rows_q, D), lambda b: (b, 0)),       # x slab
                pl.BlockSpec((rows_k, D), lambda b: (b, 0)),       # feats slab
                inv((D, D)), inv((1, D)),                          # WqT*s, bq*s
                inv((D, D)), inv((1, D)),                          # WkT, bk
                inv((D, D)), inv((1, D)),                          # WvT, bv
                inv((D, D)), inv((1, D)),                          # WoT, bo
                inv((1, D)), inv((1, D)),                          # gamma, beta
            ],
            out_specs=pl.BlockSpec((rows_q, D), lambda b: (b, 0)),
            scratch_shapes=[pltpu.VMEM((rows_q, D), compute_dtype)],   # ctx
            compiler_params=pltpu.CompilerParams(
                dimension_semantics=("parallel",),
                vmem_limit_bytes=vmem_limit),
        )

    args = (x2, f2, wq_t, bq_, wk_t, bk_, wv_t, bv_, wo_t, bo_, gamma_, beta_)
    try:
        out2 = build(True)(*args)
    except Exception:
        # pipeline_mode=pl.Buffered(1) unsupported on this jax build: retry
        # with default (double-buffered) specs -- numerically identical.
        out2 = build(False)(*args)
    return out2.reshape(B, Lq, D)


# ----------------------------- references -----------------------------------
def _layernorm(x, gamma, beta, eps=1e-6):
    D = x.shape[-1]
    mean = jnp.mean(x, axis=-1, keepdims=True)
    var = jnp.sum((x - mean) ** 2, axis=-1, keepdims=True) / (D - 1)
    return gamma * (x - mean) / (jnp.sqrt(var) + eps) + beta


def reference_f32(x, feats, params, *, h):
    # Pure-JAX f32 reference mirroring the PyTorch forward (eval mode).
    wq, bq, wk, bk, wv, bv, wo, bo, gamma, beta = params
    B, Lq, D = x.shape
    Lk = feats.shape[1]
    d_k = D // h
    xn = _layernorm(x, gamma, beta)
    q = xn @ wq.T + bq
    k = feats @ wk.T + bk
    v = feats @ wv.T + bv
    qh = q.reshape(B, Lq, h, d_k)
    kh = k.reshape(B, Lk, h, d_k)
    vh = v.reshape(B, Lk, h, d_k)
    s = jnp.einsum('bqhd,bkhd->bhqk', qh, kh) / math.sqrt(d_k)
    p = jax.nn.softmax(s, axis=-1)
    ctx = jnp.einsum('bhqk,bkhd->bqhd', p, vh).reshape(B, Lq, D)
    return x + (ctx @ wo.T + bo)


def reference_mixed(x, feats, params, *, h):
    # Mirrors the kernel's numerics (bf16 MXU operands, f32 accumulation/stats,
    # 1/sqrt(d_k) folded into Wq/bq before the bf16 cast).
    wq, bq, wk, bk, wv, bv, wo, bo, gamma, beta = params
    B, Lq, D = x.shape
    Lk = feats.shape[1]
    d_k = D // h
    bf = jnp.bfloat16
    scale = 1.0 / math.sqrt(d_k)
    mm = lambda a, b: jnp.dot(a.astype(bf), b.astype(bf),
                              preferred_element_type=jnp.float32)
    xn = _layernorm(x, gamma, beta)
    q = (mm(xn, wq.T * scale) + bq * scale).astype(bf)
    k = (mm(feats, wk.T) + bk).astype(bf)
    v = (mm(feats, wv.T) + bv).astype(bf)
    qh = q.reshape(B, Lq, h, d_k)
    kh = k.reshape(B, Lk, h, d_k)
    vh = v.reshape(B, Lk, h, d_k)
    s = jnp.einsum('bqhd,bkhd->bhqk', qh, kh, preferred_element_type=jnp.float32)
    s = s - s.max(-1, keepdims=True)
    p = jnp.exp(s)
    p = p / p.sum(-1, keepdims=True)
    ctx = jnp.einsum('bhqk,bkhd->bqhd', p.astype(bf), vh,
                     preferred_element_type=jnp.float32)
    ctx = ctx.reshape(B, Lq, D).astype(bf)
    return x + mm(ctx, wo.T) + bo


if __name__ == "__main__":
    B, Lq, Lk, d_model, h = 4, 8, 16, 32, 4

    key = jax.random.PRNGKey(0)
    keys = jax.random.split(key, 12)
    x = jax.random.normal(keys[0], (B, Lq, d_model), jnp.float32)
    feats = jax.random.normal(keys[1], (B, Lk, d_model), jnp.float32)

    def lin(kw, kb):
        w = jax.random.normal(kw, (d_model, d_model), jnp.float32) * 0.1
        b = jax.random.normal(kb, (1, d_model), jnp.float32) * 0.1
        return w, b

    wq, bq = lin(keys[2], keys[3])
    wk, bk = lin(keys[4], keys[5])
    wv, bv = lin(keys[6], keys[7])
    wo, bo = lin(keys[8], keys[9])
    gamma = 1.0 + 0.1 * jax.random.normal(keys[10], (1, d_model), jnp.float32)
    beta = 0.1 * jax.random.normal(keys[11], (1, d_model), jnp.float32)
    params = (wq, bq, wk, bk, wv, bv, wo, bo, gamma, beta)

    out = jax.block_until_ready(mha_ff(x, feats, params, h=h))
    assert out.shape == (B, Lq, d_model)

    # Tight check vs. a reference that mirrors the kernel's mixed precision
    # (slack only for the approx softmax reciprocal), and a looser sanity
    # check vs. the full-f32 PyTorch-equivalent forward (bf16 quantization).
    ref_mx = reference_mixed(x, feats, params, h=h)
    ref_fp = reference_f32(x, feats, params, h=h)
    assert jnp.allclose(out, ref_mx, rtol=1e-2, atol=1e-2), "mismatch vs bf16-mirroring reference"
    assert jnp.allclose(out, ref_fp, rtol=5e-2, atol=5e-2), "mismatch vs f32 reference"

    print("KERNEL_OK")
</pallas_src>

<mosaic_0001>
module attributes {stable_mosaic.version = 11 : i64} {
  func.func @mha_ff_kernel(%arg0: i32, %arg1: memref<32x32xf32, #tpu.memory_space<vmem>>, %arg2: memref<64x32xbf16, #tpu.memory_space<vmem>>, %arg3: memref<32x32xbf16, #tpu.memory_space<vmem>>, %arg4: memref<1x32xf32, #tpu.memory_space<vmem>>, %arg5: memref<32x32xbf16, #tpu.memory_space<vmem>>, %arg6: memref<1x32xf32, #tpu.memory_space<vmem>>, %arg7: memref<32x32xbf16, #tpu.memory_space<vmem>>, %arg8: memref<1x32xf32, #tpu.memory_space<vmem>>, %arg9: memref<32x32xbf16, #tpu.memory_space<vmem>>, %arg10: memref<1x32xf32, #tpu.memory_space<vmem>>, %arg11: memref<1x32xf32, #tpu.memory_space<vmem>>, %arg12: memref<1x32xf32, #tpu.memory_space<vmem>>, %arg13: memref<32x32xf32, #tpu.memory_space<vmem>>, %arg14: memref<32x32xbf16, #tpu.memory_space<vmem>>) attributes {dimension_semantics = [#tpu.dimension_semantics<parallel>], iteration_bounds = array<i64: 1>, scalar_prefetch = 0 : i64, scratch_operands = 1 : i64, tpu.core_type = #tpu.core_type<tc>, window_params = [{transform_indices = @transform_0, window_bounds = array<i64: 32, 32>}, {transform_indices = @transform_1, window_bounds = array<i64: 64, 32>}, {pipeline_mode = #tpu.pipeline_mode<synchronous>, transform_indices = @transform_2, window_bounds = array<i64: 32, 32>}, {pipeline_mode = #tpu.pipeline_mode<synchronous>, transform_indices = @transform_3, window_bounds = array<i64: 1, 32>}, {pipeline_mode = #tpu.pipeline_mode<synchronous>, transform_indices = @transform_4, window_bounds = array<i64: 32, 32>}, {pipeline_mode = #tpu.pipeline_mode<synchronous>, transform_indices = @transform_5, window_bounds = array<i64: 1, 32>}, {pipeline_mode = #tpu.pipeline_mode<synchronous>, transform_indices = @transform_6, window_bounds = array<i64: 32, 32>}, {pipeline_mode = #tpu.pipeline_mode<synchronous>, transform_indices = @transform_7, window_bounds = array<i64: 1, 32>}, {pipeline_mode = #tpu.pipeline_mode<synchronous>, transform_indices = @transform_8, window_bounds = array<i64: 32, 32>}, {pipeline_mode = #tpu.pipeline_mode<synchronous>, transform_indices = @transform_9, window_bounds = array<i64: 1, 32>}, {pipeline_mode = #tpu.pipeline_mode<synchronous>, transform_indices = @transform_10, window_bounds = array<i64: 1, 32>}, {pipeline_mode = #tpu.pipeline_mode<synchronous>, transform_indices = @transform_11, window_bounds = array<i64: 1, 32>}, {transform_indices = @transform_12, window_bounds = array<i64: 32, 32>}]} {
    %c0 = arith.constant 0 : index
    %c0_0 = arith.constant 0 : index
    %0 = vector.load %arg1[%c0, %c0_0] : memref<32x32xf32, #tpu.memory_space<vmem>>, vector<32x32xf32>
    %cst = arith.constant dense<0.000000e+00> : vector<32xf32>
    %1 = vector.multi_reduction <add>, %0, %cst [1] : vector<32x32xf32> to vector<32xf32>
    %2 = vector.shape_cast %1 : vector<32xf32> to vector<32x1xf32>
    %cst_1 = arith.constant 3.200000e+01 : f32
    %3 = vector.broadcast %cst_1 : f32 to vector<32x1xf32>
    %4 = arith.divf %2, %3 : vector<32x1xf32>
    %5 = vector.broadcast %4 : vector<32x1xf32> to vector<32x32xf32>
    %6 = arith.subf %0, %5 : vector<32x32xf32>
    %7 = arith.mulf %6, %6 : vector<32x32xf32>
    %cst_2 = arith.constant dense<0.000000e+00> : vector<32xf32>
    %8 = vector.multi_reduction <add>, %7, %cst_2 [1] : vector<32x32xf32> to vector<32xf32>
    %9 = vector.shape_cast %8 : vector<32xf32> to vector<32x1xf32>
    %cst_3 = arith.constant 0.0322580636 : f32
    %10 = vector.broadcast %cst_3 : f32 to vector<32x1xf32>
    %11 = arith.mulf %9, %10 : vector<32x1xf32>
    %c0_4 = arith.constant 0 : index
    %c0_5 = arith.constant 0 : index
    %12 = vector.load %arg11[%c0_4, %c0_5] : memref<1x32xf32, #tpu.memory_space<vmem>>, vector<1x32xf32>
    %13 = vector.broadcast %4 : vector<32x1xf32> to vector<32x32xf32>
    %14 = arith.subf %0, %13 : vector<32x32xf32>
    %15 = math.sqrt %11 : vector<32x1xf32>
    %cst_6 = arith.constant 9.99999997E-7 : f32
    %16 = vector.broadcast %cst_6 : f32 to vector<32x1xf32>
    %17 = arith.addf %15, %16 : vector<32x1xf32>
    %18 = vector.broadcast %17 : vector<32x1xf32> to vector<32x32xf32>
    %19 = arith.divf %14, %18 : vector<32x32xf32>
    %20 = vector.broadcast %12 : vector<1x32xf32> to vector<32x32xf32>
    %21 = arith.mulf %20, %19 : vector<32x32xf32>
    %c0_7 = arith.constant 0 : index
    %c0_8 = arith.constant 0 : index
    %22 = vector.load %arg12[%c0_7, %c0_8] : memref<1x32xf32, #tpu.memory_space<vmem>>, vector<1x32xf32>
    %23 = vector.broadcast %22 : vector<1x32xf32> to vector<32x32xf32>
    %24 = arith.addf %21, %23 : vector<32x32xf32>
    %25 = arith.truncf %24 : vector<32x32xf32> to vector<32x32xbf16>
    %c0_9 = arith.constant 0 : index
    %c0_10 = arith.constant 0 : index
    %26 = vector.load %arg3[%c0_9, %c0_10] : memref<32x32xbf16, #tpu.memory_space<vmem>>, vector<32x32xbf16>
    %cst_11 = arith.constant dense<0.000000e+00> : vector<32x32xf32>
    %27 = tpu.matmul %25, %26, %cst_11 {dimension_numbers = #tpu.dot_dimension_numbers<[1], [0], [0], [1], [0, 0, 1, 1], [], []>} : vector<32x32xbf16>, vector<32x32xbf16>, vector<32x32xf32> -> vector<32x32xf32>
    %c0_12 = arith.constant 0 : index
    %c0_13 = arith.constant 0 : index
    %28 = vector.load %arg4[%c0_12, %c0_13] : memref<1x32xf32, #tpu.memory_space<vmem>>, vector<1x32xf32>
    %29 = vector.broadcast %28 : vector<1x32xf32> to vector<32x32xf32>
    %30 = arith.addf %27, %29 : vector<32x32xf32>
    %31 = arith.truncf %30 : vector<32x32xf32> to vector<32x32xbf16>
    %c0_14 = arith.constant 0 : index
    %c0_15 = arith.constant 0 : index
    %32 = vector.load %arg2[%c0_14, %c0_15] : memref<64x32xbf16, #tpu.memory_space<vmem>>, vector<64x32xbf16>
    %c0_16 = arith.constant 0 : index
    %c0_17 = arith.constant 0 : index
    %33 = vector.load %arg5[%c0_16, %c0_17] : memref<32x32xbf16, #tpu.memory_space<vmem>>, vector<32x32xbf16>
    %cst_18 = arith.constant dense<0.000000e+00> : vector<64x32xf32>
    %34 = tpu.matmul %32, %33, %cst_18 {dimension_numbers = #tpu.dot_dimension_numbers<[1], [0], [0], [1], [0, 0, 1, 1], [], []>} : vector<64x32xbf16>, vector<32x32xbf16>, vector<64x32xf32> -> vector<64x32xf32>
    %c0_19 = arith.constant 0 : index
    %c0_20 = arith.constant 0 : index
    %35 = vector.load %arg6[%c0_19, %c0_20] : memref<1x32xf32, #tpu.memory_space<vmem>>, vector<1x32xf32>
    %36 = vector.broadcast %35 : vector<1x32xf32> to vector<64x32xf32>
    %37 = arith.addf %34, %36 : vector<64x32xf32>
    %38 = arith.truncf %37 : vector<64x32xf32> to vector<64x32xbf16>
    %c0_21 = arith.constant 0 : index
    %c0_22 = arith.constant 0 : index
    %39 = vector.load %arg7[%c0_21, %c0_22] : memref<32x32xbf16, #tpu.memory_space<vmem>>, vector<32x32xbf16>
    %cst_23 = arith.constant dense<0.000000e+00> : vector<64x32xf32>
    %40 = tpu.matmul %32, %39, %cst_23 {dimension_numbers = #tpu.dot_dimension_numbers<[1], [0], [0], [1], [0, 0, 1, 1], [], []>} : vector<64x32xbf16>, vector<32x32xbf16>, vector<64x32xf32> -> vector<64x32xf32>
    %c0_24 = arith.constant 0 : index
    %c0_25 = arith.constant 0 : index
    %41 = vector.load %arg8[%c0_24, %c0_25] : memref<1x32xf32, #tpu.memory_space<vmem>>, vector<1x32xf32>
    %42 = vector.broadcast %41 : vector<1x32xf32> to vector<64x32xf32>
    %43 = arith.addf %40, %42 : vector<64x32xf32>
    %44 = arith.truncf %43 : vector<64x32xf32> to vector<64x32xbf16>
    %45 = vector.extract_strided_slice %31 {offsets = [0, 0], sizes = [8, 32], strides = [1, 1]} : vector<32x32xbf16> to vector<8x32xbf16>
    %46 = vector.extract_strided_slice %38 {offsets = [0, 0], sizes = [16, 32], strides = [1, 1]} : vector<64x32xbf16> to vector<16x32xbf16>
    %47 = vector.extract_strided_slice %44 {offsets = [0, 0], sizes = [16, 32], strides = [1, 1]} : vector<64x32xbf16> to vector<16x32xbf16>
    %48 = vector.extract_strided_slice %45 {offsets = [0, 0], sizes = [8, 8], strides = [1, 1]} : vector<8x32xbf16> to vector<8x8xbf16>
    %49 = vector.extract_strided_slice %46 {offsets = [0, 0], sizes = [16, 8], strides = [1, 1]} : vector<16x32xbf16> to vector<16x8xbf16>
    %cst_26 = arith.constant dense<0.000000e+00> : vector<8x16xf32>
    %50 = tpu.matmul %48, %49, %cst_26 {dimension_numbers = #tpu.dot_dimension_numbers<[1], [1], [0], [0], [0, 0, 1, 0], [], []>} : vector<8x8xbf16>, vector<16x8xbf16>, vector<8x16xf32> -> vector<8x16xf32>
    %cst_27 = arith.constant dense<0xFF800000> : vector<8xf32>
    %51 = vector.multi_reduction <maximumf>, %50, %cst_27 [1] : vector<8x16xf32> to vector<8xf32>
    %52 = vector.shape_cast %51 : vector<8xf32> to vector<8x1xf32>
    %53 = vector.broadcast %52 : vector<8x1xf32> to vector<8x16xf32>
    %54 = arith.subf %50, %53 : vector<8x16xf32>
    %55 = math.exp %54 : vector<8x16xf32>
    %cst_28 = arith.constant dense<0.000000e+00> : vector<8xf32>
    %56 = vector.multi_reduction <add>, %55, %cst_28 [1] : vector<8x16xf32> to vector<8xf32>
    %57 = vector.shape_cast %56 : vector<8xf32> to vector<8x1xf32>
    %58 = tpu.reciprocal %57 {approx = true} : vector<8x1xf32> -> vector<8x1xf32>
    %59 = vector.broadcast %58 : vector<8x1xf32> to vector<8x16xf32>
    %60 = arith.mulf %55, %59 : vector<8x16xf32>
    %61 = arith.truncf %60 : vector<8x16xf32> to vector<8x16xbf16>
    %62 = vector.extract_strided_slice %47 {offsets = [0, 0], sizes = [16, 8], strides = [1, 1]} : vector<16x32xbf16> to vector<16x8xbf16>
    %cst_29 = arith.constant dense<0.000000e+00> : vector<8x8xf32>
    %63 = tpu.matmul %61, %62, %cst_29 {dimension_numbers = #tpu.dot_dimension_numbers<[1], [0], [0], [1], [0, 0, 1, 1], [], []>} : vector<8x16xbf16>, vector<16x8xbf16>, vector<8x8xf32> -> vector<8x8xf32>
    %64 = arith.truncf %63 : vector<8x8xf32> to vector<8x8xbf16>
    %c0_30 = arith.constant 0 : index
    %c0_31 = arith.constant 0 : index
    %65 = vector.load %arg14[%c0_30, %c0_31] : memref<32x32xbf16, #tpu.memory_space<vmem>>, vector<8x8xbf16>
    tpu.vector_store %arg14[%c0_30, %c0_31], %64 {strides = array<i32>} : memref<32x32xbf16, #tpu.memory_space<vmem>>, vector<8x8xbf16>,
    %66 = vector.extract_strided_slice %45 {offsets = [0, 8], sizes = [8, 8], strides = [1, 1]} : vector<8x32xbf16> to vector<8x8xbf16>
    %67 = vector.extract_strided_slice %46 {offsets = [0, 8], sizes = [16, 8], strides = [1, 1]} : vector<16x32xbf16> to vector<16x8xbf16>
    %cst_32 = arith.constant dense<0.000000e+00> : vector<8x16xf32>
    %68 = tpu.matmul %66, %67, %cst_32 {dimension_numbers = #tpu.dot_dimension_numbers<[1], [1], [0], [0], [0, 0, 1, 0], [], []>} : vector<8x8xbf16>, vector<16x8xbf16>, vector<8x16xf32> -> vector<8x16xf32>
    %cst_33 = arith.constant dense<0xFF800000> : vector<8xf32>
    %69 = vector.multi_reduction <maximumf>, %68, %cst_33 [1] : vector<8x16xf32> to vector<8xf32>
    %70 = vector.shape_cast %69 : vector<8xf32> to vector<8x1xf32>
    %71 = vector.broadcast %70 : vector<8x1xf32> to vector<8x16xf32>
    %72 = arith.subf %68, %71 : vector<8x16xf32>
    %73 = math.exp %72 : vector<8x16xf32>
    %cst_34 = arith.constant dense<0.000000e+00> : vector<8xf32>
    %74 = vector.multi_reduction <add>, %73, %cst_34 [1] : vector<8x16xf32> to vector<8xf32>
    %75 = vector.shape_cast %74 : vector<8xf32> to vector<8x1xf32>
    %76 = tpu.reciprocal %75 {approx = true} : vector<8x1xf32> -> vector<8x1xf32>
    %77 = vector.broadcast %76 : vector<8x1xf32> to vector<8x16xf32>
    %78 = arith.mulf %73, %77 : vector<8x16xf32>
    %79 = arith.truncf %78 : vector<8x16xf32> to vector<8x16xbf16>
    %80 = vector.extract_strided_slice %47 {offsets = [0, 8], sizes = [16, 8], strides = [1, 1]} : vector<16x32xbf16> to vector<16x8xbf16>
    %cst_35 = arith.constant dense<0.000000e+00> : vector<8x8xf32>
    %81 = tpu.matmul %79, %80, %cst_35 {dimension_numbers = #tpu.dot_dimension_numbers<[1], [0], [0], [1], [0, 0, 1, 1], [], []>} : vector<8x16xbf16>, vector<16x8xbf16>, vector<8x8xf32> -> vector<8x8xf32>
    %82 = arith.truncf %81 : vector<8x8xf32> to vector<8x8xbf16>
    %c0_36 = arith.constant 0 : index
    %c8 = arith.constant 8 : index
    %83 = vector.load %arg14[%c0_36, %c8] : memref<32x32xbf16, #tpu.memory_space<vmem>>, vector<8x8xbf16>
    tpu.vector_store %arg14[%c0_36, %c8], %82 {strides = array<i32>} : memref<32x32xbf16, #tpu.memory_space<vmem>>, vector<8x8xbf16>,
    %84 = vector.extract_strided_slice %45 {offsets = [0, 16], sizes = [8, 8], strides = [1, 1]} : vector<8x32xbf16> to vector<8x8xbf16>
    %85 = vector.extract_strided_slice %46 {offsets = [0, 16], sizes = [16, 8], strides = [1, 1]} : vector<16x32xbf16> to vector<16x8xbf16>
    %cst_37 = arith.constant dense<0.000000e+00> : vector<8x16xf32>
    %86 = tpu.matmul %84, %85, %cst_37 {dimension_numbers = #tpu.dot_dimension_numbers<[1], [1], [0], [0], [0, 0, 1, 0], [], []>} : vector<8x8xbf16>, vector<16x8xbf16>, vector<8x16xf32> -> vector<8x16xf32>
    %cst_38 = arith.constant dense<0xFF800000> : vector<8xf32>
    %87 = vector.multi_reduction <maximumf>, %86, %cst_38 [1] : vector<8x16xf32> to vector<8xf32>
    %88 = vector.shape_cast %87 : vector<8xf32> to vector<8x1xf32>
    %89 = vector.broadcast %88 : vector<8x1xf32> to vector<8x16xf32>
    %90 = arith.subf %86, %89 : vector<8x16xf32>
    %91 = math.exp %90 : vector<8x16xf32>
    %cst_39 = arith.constant dense<0.000000e+00> : vector<8xf32>
    %92 = vector.multi_reduction <add>, %91, %cst_39 [1] : vector<8x16xf32> to vector<8xf32>
    %93 = vector.shape_cast %92 : vector<8xf32> to vector<8x1xf32>
    %94 = tpu.reciprocal %93 {approx = true} : vector<8x1xf32> -> vector<8x1xf32>
    %95 = vector.broadcast %94 : vector<8x1xf32> to vector<8x16xf32>
    %96 = arith.mulf %91, %95 : vector<8x16xf32>
    %97 = arith.truncf %96 : vector<8x16xf32> to vector<8x16xbf16>
    %98 = vector.extract_strided_slice %47 {offsets = [0, 16], sizes = [16, 8], strides = [1, 1]} : vector<16x32xbf16> to vector<16x8xbf16>
    %cst_40 = arith.constant dense<0.000000e+00> : vector<8x8xf32>
    %99 = tpu.matmul %97, %98, %cst_40 {dimension_numbers = #tpu.dot_dimension_numbers<[1], [0], [0], [1], [0, 0, 1, 1], [], []>} : vector<8x16xbf16>, vector<16x8xbf16>, vector<8x8xf32> -> vector<8x8xf32>
    %100 = arith.truncf %99 : vector<8x8xf32> to vector<8x8xbf16>
    %c0_41 = arith.constant 0 : index
    %c16 = arith.constant 16 : index
    %101 = vector.load %arg14[%c0_41, %c16] : memref<32x32xbf16, #tpu.memory_space<vmem>>, vector<8x8xbf16>
    tpu.vector_store %arg14[%c0_41, %c16], %100 {strides = array<i32>} : memref<32x32xbf16, #tpu.memory_space<vmem>>, vector<8x8xbf16>,
    %102 = vector.extract_strided_slice %45 {offsets = [0, 24], sizes = [8, 8], strides = [1, 1]} : vector<8x32xbf16> to vector<8x8xbf16>
    %103 = vector.extract_strided_slice %46 {offsets = [0, 24], sizes = [16, 8], strides = [1, 1]} : vector<16x32xbf16> to vector<16x8xbf16>
    %cst_42 = arith.constant dense<0.000000e+00> : vector<8x16xf32>
    %104 = tpu.matmul %102, %103, %cst_42 {dimension_numbers = #tpu.dot_dimension_numbers<[1], [1], [0], [0], [0, 0, 1, 0], [], []>} : vector<8x8xbf16>, vector<16x8xbf16>, vector<8x16xf32> -> vector<8x16xf32>
    %cst_43 = arith.constant dense<0xFF800000> : vector<8xf32>
    %105 = vector.multi_reduction <maximumf>, %104, %cst_43 [1] : vector<8x16xf32> to vector<8xf32>
    %106 = vector.shape_cast %105 : vector<8xf32> to vector<8x1xf32>
    %107 = vector.broadcast %106 : vector<8x1xf32> to vector<8x16xf32>
    %108 = arith.subf %104, %107 : vector<8x16xf32>
    %109 = math.exp %108 : vector<8x16xf32>
    %cst_44 = arith.constant dense<0.000000e+00> : vector<8xf32>
    %110 = vector.multi_reduction <add>, %109, %cst_44 [1] : vector<8x16xf32> to vector<8xf32>
    %111 = vector.shape_cast %110 : vector<8xf32> to vector<8x1xf32>
    %112 = tpu.reciprocal %111 {approx = true} : vector<8x1xf32> -> vector<8x1xf32>
    %113 = vector.broadcast %112 : vector<8x1xf32> to vector<8x16xf32>
    %114 = arith.mulf %109, %113 : vector<8x16xf32>
    %115 = arith.truncf %114 : vector<8x16xf32> to vector<8x16xbf16>
    %116 = vector.extract_strided_slice %47 {offsets = [0, 24], sizes = [16, 8], strides = [1, 1]} : vector<16x32xbf16> to vector<16x8xbf16>
    %cst_45 = arith.constant dense<0.000000e+00> : vector<8x8xf32>
    %117 = tpu.matmul %115, %116, %cst_45 {dimension_numbers = #tpu.dot_dimension_numbers<[1], [0], [0], [1], [0, 0, 1, 1], [], []>} : vector<8x16xbf16>, vector<16x8xbf16>, vector<8x8xf32> -> vector<8x8xf32>
    %118 = arith.truncf %117 : vector<8x8xf32> to vector<8x8xbf16>
    %c0_46 = arith.constant 0 : index
    %c24 = arith.constant 24 : index
    %119 = vector.load %arg14[%c0_46, %c24] : memref<32x32xbf16, #tpu.memory_space<vmem>>, vector<8x8xbf16>
    tpu.vector_store %arg14[%c0_46, %c24], %118 {strides = array<i32>} : memref<32x32xbf16, #tpu.memory_space<vmem>>, vector<8x8xbf16>,
    %120 = vector.extract_strided_slice %31 {offsets = [8, 0], sizes = [8, 32], strides = [1, 1]} : vector<32x32xbf16> to vector<8x32xbf16>
    %121 = vector.extract_strided_slice %38 {offsets = [16, 0], sizes = [16, 32], strides = [1, 1]} : vector<64x32xbf16> to vector<16x32xbf16>
    %122 = vector.extract_strided_slice %44 {offsets = [16, 0], sizes = [16, 32], strides = [1, 1]} : vector<64x32xbf16> to vector<16x32xbf16>
    %123 = vector.extract_strided_slice %120 {offsets = [0, 0], sizes = [8, 8], strides = [1, 1]} : vector<8x32xbf16> to vector<8x8xbf16>
    %124 = vector.extract_strided_slice %121 {offsets = [0, 0], sizes = [16, 8], strides = [1, 1]} : vector<16x32xbf16> to vector<16x8xbf16>
    %cst_47 = arith.constant dense<0.000000e+00> : vector<8x16xf32>
    %125 = tpu.matmul %123, %124, %cst_47 {dimension_numbers = #tpu.dot_dimension_numbers<[1], [1], [0], [0], [0, 0, 1, 0], [], []>} : vector<8x8xbf16>, vector<16x8xbf16>, vector<8x16xf32> -> vector<8x16xf32>
    %cst_48 = arith.constant dense<0xFF800000> : vector<8xf32>
    %126 = vector.multi_reduction <maximumf>, %125, %cst_48 [1] : vector<8x16xf32> to vector<8xf32>
    %127 = vector.shape_cast %126 : vector<8xf32> to vector<8x1xf32>
    %128 = vector.broadcast %127 : vector<8x1xf32> to vector<8x16xf32>
    %129 = arith.subf %125, %128 : vector<8x16xf32>
    %130 = math.exp %129 : vector<8x16xf32>
    %cst_49 = arith.constant dense<0.000000e+00> : vector<8xf32>
    %131 = vector.multi_reduction <add>, %130, %cst_49 [1] : vector<8x16xf32> to vector<8xf32>
    %132 = vector.shape_cast %131 : vector<8xf32> to vector<8x1xf32>
    %133 = tpu.reciprocal %132 {approx = true} : vector<8x1xf32> -> vector<8x1xf32>
    %134 = vector.broadcast %133 : vector<8x1xf32> to vector<8x16xf32>
    %135 = arith.mulf %130, %134 : vector<8x16xf32>
    %136 = arith.truncf %135 : vector<8x16xf32> to vector<8x16xbf16>
    %137 = vector.extract_strided_slice %122 {offsets = [0, 0], sizes = [16, 8], strides = [1, 1]} : vector<16x32xbf16> to vector<16x8xbf16>
    %cst_50 = arith.constant dense<0.000000e+00> : vector<8x8xf32>
    %138 = tpu.matmul %136, %137, %cst_50 {dimension_numbers = #tpu.dot_dimension_numbers<[1], [0], [0], [1], [0, 0, 1, 1], [], []>} : vector<8x16xbf16>, vector<16x8xbf16>, vector<8x8xf32> -> vector<8x8xf32>
    %139 = arith.truncf %138 : vector<8x8xf32> to vector<8x8xbf16>
    %c8_51 = arith.constant 8 : index
    %c0_52 = arith.constant 0 : index
    %140 = vector.load %arg14[%c8_51, %c0_52] : memref<32x32xbf16, #tpu.memory_space<vmem>>, vector<8x8xbf16>
    tpu.vector_store %arg14[%c8_51, %c0_52], %139 {strides = array<i32>} : memref<32x32xbf16, #tpu.memory_space<vmem>>, vector<8x8xbf16>,
    %141 = vector.extract_strided_slice %120 {offsets = [0, 8], sizes = [8, 8], strides = [1, 1]} : vector<8x32xbf16> to vector<8x8xbf16>
    %142 = vector.extract_strided_slice %121 {offsets = [0, 8], sizes = [16, 8], strides = [1, 1]} : vector<16x32xbf16> to vector<16x8xbf16>
    %cst_53 = arith.constant dense<0.000000e+00> : vector<8x16xf32>
    %143 = tpu.matmul %141, %142, %cst_53 {dimension_numbers = #tpu.dot_dimension_numbers<[1], [1], [0], [0], [0, 0, 1, 0], [], []>} : vector<8x8xbf16>, vector<16x8xbf16>, vector<8x16xf32> -> vector<8x16xf32>
    %cst_54 = arith.constant dense<0xFF800000> : vector<8xf32>
    %144 = vector.multi_reduction <maximumf>, %143, %cst_54 [1] : vector<8x16xf32> to vector<8xf32>
    %145 = vector.shape_cast %144 : vector<8xf32> to vector<8x1xf32>
    %146 = vector.broadcast %145 : vector<8x1xf32> to vector<8x16xf32>
    %147 = arith.subf %143, %146 : vector<8x16xf32>
    %148 = math.exp %147 : vector<8x16xf32>
    %cst_55 = arith.constant dense<0.000000e+00> : vector<8xf32>
    %149 = vector.multi_reduction <add>, %148, %cst_55 [1] : vector<8x16xf32> to vector<8xf32>
    %150 = vector.shape_cast %149 : vector<8xf32> to vector<8x1xf32>
    %151 = tpu.reciprocal %150 {approx = true} : vector<8x1xf32> -> vector<8x1xf32>
    %152 = vector.broadcast %151 : vector<8x1xf32> to vector<8x16xf32>
    %153 = arith.mulf %148, %152 : vector<8x16xf32>
    %154 = arith.truncf %153 : vector<8x16xf32> to vector<8x16xbf16>
    %155 = vector.extract_strided_slice %122 {offsets = [0, 8], sizes = [16, 8], strides = [1, 1]} : vector<16x32xbf16> to vector<16x8xbf16>
    %cst_56 = arith.constant dense<0.000000e+00> : vector<8x8xf32>
    %156 = tpu.matmul %154, %155, %cst_56 {dimension_numbers = #tpu.dot_dimension_numbers<[1], [0], [0], [1], [0, 0, 1, 1], [], []>} : vector<8x16xbf16>, vector<16x8xbf16>, vector<8x8xf32> -> vector<8x8xf32>
    %157 = arith.truncf %156 : vector<8x8xf32> to vector<8x8xbf16>
    %c8_57 = arith.constant 8 : index
    %c8_58 = arith.constant 8 : index
    %158 = vector.load %arg14[%c8_57, %c8_58] : memref<32x32xbf16, #tpu.memory_space<vmem>>, vector<8x8xbf16>
    tpu.vector_store %arg14[%c8_57, %c8_58], %157 {strides = array<i32>} : memref<32x32xbf16, #tpu.memory_space<vmem>>, vector<8x8xbf16>,
    %159 = vector.extract_strided_slice %120 {offsets = [0, 16], sizes = [8, 8], strides = [1, 1]} : vector<8x32xbf16> to vector<8x8xbf16>
    %160 = vector.extract_strided_slice %121 {offsets = [0, 16], sizes = [16, 8], strides = [1, 1]} : vector<16x32xbf16> to vector<16x8xbf16>
    %cst_59 = arith.constant dense<0.000000e+00> : vector<8x16xf32>
    %161 = tpu.matmul %159, %160, %cst_59 {dimension_numbers = #tpu.dot_dimension_numbers<[1], [1], [0], [0], [0, 0, 1, 0], [], []>} : vector<8x8xbf16>, vector<16x8xbf16>, vector<8x16xf32> -> vector<8x16xf32>
    %cst_60 = arith.constant dense<0xFF800000> : vector<8xf32>
    %162 = vector.multi_reduction <maximumf>, %161, %cst_60 [1] : vector<8x16xf32> to vector<8xf32>
    %163 = vector.shape_cast %162 : vector<8xf32> to vector<8x1xf32>
    %164 = vector.broadcast %163 : vector<8x1xf32> to vector<8x16xf32>
    %165 = arith.subf %161, %164 : vector<8x16xf32>
    %166 = math.exp %165 : vector<8x16xf32>
    %cst_61 = arith.constant dense<0.000000e+00> : vector<8xf32>
    %167 = vector.multi_reduction <add>, %166, %cst_61 [1] : vector<8x16xf32> to vector<8xf32>
    %168 = vector.shape_cast %167 : vector<8xf32> to vector<8x1xf32>
    %169 = tpu.reciprocal %168 {approx = true} : vector<8x1xf32> -> vector<8x1xf32>
    %170 = vector.broadcast %169 : vector<8x1xf32> to vector<8x16xf32>
    %171 = arith.mulf %166, %170 : vector<8x16xf32>
    %172 = arith.truncf %171 : vector<8x16xf32> to vector<8x16xbf16>
    %173 = vector.extract_strided_slice %122 {offsets = [0, 16], sizes = [16, 8], strides = [1, 1]} : vector<16x32xbf16> to vector<16x8xbf16>
    %cst_62 = arith.constant dense<0.000000e+00> : vector<8x8xf32>
    %174 = tpu.matmul %172, %173, %cst_62 {dimension_numbers = #tpu.dot_dimension_numbers<[1], [0], [0], [1], [0, 0, 1, 1], [], []>} : vector<8x16xbf16>, vector<16x8xbf16>, vector<8x8xf32> -> vector<8x8xf32>
    %175 = arith.truncf %174 : vector<8x8xf32> to vector<8x8xbf16>
    %c8_63 = arith.constant 8 : index
    %c16_64 = arith.constant 16 : index
    %176 = vector.load %arg14[%c8_63, %c16_64] : memref<32x32xbf16, #tpu.memory_space<vmem>>, vector<8x8xbf16>
    tpu.vector_store %arg14[%c8_63, %c16_64], %175 {strides = array<i32>} : memref<32x32xbf16, #tpu.memory_space<vmem>>, vector<8x8xbf16>,
    %177 = vector.extract_strided_slice %120 {offsets = [0, 24], sizes = [8, 8], strides = [1, 1]} : vector<8x32xbf16> to vector<8x8xbf16>
    %178 = vector.extract_strided_slice %121 {offsets = [0, 24], sizes = [16, 8], strides = [1, 1]} : vector<16x32xbf16> to vector<16x8xbf16>
    %cst_65 = arith.constant dense<0.000000e+00> : vector<8x16xf32>
    %179 = tpu.matmul %177, %178, %cst_65 {dimension_numbers = #tpu.dot_dimension_numbers<[1], [1], [0], [0], [0, 0, 1, 0], [], []>} : vector<8x8xbf16>, vector<16x8xbf16>, vector<8x16xf32> -> vector<8x16xf32>
    %cst_66 = arith.constant dense<0xFF800000> : vector<8xf32>
    %180 = vector.multi_reduction <maximumf>, %179, %cst_66 [1] : vector<8x16xf32> to vector<8xf32>
    %181 = vector.shape_cast %180 : vector<8xf32> to vector<8x1xf32>
    %182 = vector.broadcast %181 : vector<8x1xf32> to vector<8x16xf32>
    %183 = arith.subf %179, %182 : vector<8x16xf32>
    %184 = math.exp %183 : vector<8x16xf32>
    %cst_67 = arith.constant dense<0.000000e+00> : vector<8xf32>
    %185 = vector.multi_reduction <add>, %184, %cst_67 [1] : vector<8x16xf32> to vector<8xf32>
    %186 = vector.shape_cast %185 : vector<8xf32> to vector<8x1xf32>
    %187 = tpu.reciprocal %186 {approx = true} : vector<8x1xf32> -> vector<8x1xf32>
    %188 = vector.broadcast %187 : vector<8x1xf32> to vector<8x16xf32>
    %189 = arith.mulf %184, %188 : vector<8x16xf32>
    %190 = arith.truncf %189 : vector<8x16xf32> to vector<8x16xbf16>
    %191 = vector.extract_strided_slice %122 {offsets = [0, 24], sizes = [16, 8], strides = [1, 1]} : vector<16x32xbf16> to vector<16x8xbf16>
    %cst_68 = arith.constant dense<0.000000e+00> : vector<8x8xf32>
    %192 = tpu.matmul %190, %191, %cst_68 {dimension_numbers = #tpu.dot_dimension_numbers<[1], [0], [0], [1], [0, 0, 1, 1], [], []>} : vector<8x16xbf16>, vector<16x8xbf16>, vector<8x8xf32> -> vector<8x8xf32>
    %193 = arith.truncf %192 : vector<8x8xf32> to vector<8x8xbf16>
    %c8_69 = arith.constant 8 : index
    %c24_70 = arith.constant 24 : index
    %194 = vector.load %arg14[%c8_69, %c24_70] : memref<32x32xbf16, #tpu.memory_space<vmem>>, vector<8x8xbf16>
    tpu.vector_store %arg14[%c8_69, %c24_70], %193 {strides = array<i32>} : memref<32x32xbf16, #tpu.memory_space<vmem>>, vector<8x8xbf16>,
    %195 = vector.extract_strided_slice %31 {offsets = [16, 0], sizes = [8, 32], strides = [1, 1]} : vector<32x32xbf16> to vector<8x32xbf16>
    %196 = vector.extract_strided_slice %38 {offsets = [32, 0], sizes = [16, 32], strides = [1, 1]} : vector<64x32xbf16> to vector<16x32xbf16>
    %197 = vector.extract_strided_slice %44 {offsets = [32, 0], sizes = [16, 32], strides = [1, 1]} : vector<64x32xbf16> to vector<16x32xbf16>
    %198 = vector.extract_strided_slice %195 {offsets = [0, 0], sizes = [8, 8], strides = [1, 1]} : vector<8x32xbf16> to vector<8x8xbf16>
    %199 = vector.extract_strided_slice %196 {offsets = [0, 0], sizes = [16, 8], strides = [1, 1]} : vector<16x32xbf16> to vector<16x8xbf16>
    %cst_71 = arith.constant dense<0.000000e+00> : vector<8x16xf32>
    %200 = tpu.matmul %198, %199, %cst_71 {dimension_numbers = #tpu.dot_dimension_numbers<[1], [1], [0], [0], [0, 0, 1, 0], [], []>} : vector<8x8xbf16>, vector<16x8xbf16>, vector<8x16xf32> -> vector<8x16xf32>
    %cst_72 = arith.constant dense<0xFF800000> : vector<8xf32>
    %201 = vector.multi_reduction <maximumf>, %200, %cst_72 [1] : vector<8x16xf32> to vector<8xf32>
    %202 = vector.shape_cast %201 : vector<8xf32> to vector<8x1xf32>
    %203 = vector.broadcast %202 : vector<8x1xf32> to vector<8x16xf32>
    %204 = arith.subf %200, %203 : vector<8x16xf32>
    %205 = math.exp %204 : vector<8x16xf32>
    %cst_73 = arith.constant dense<0.000000e+00> : vector<8xf32>
    %206 = vector.multi_reduction <add>, %205, %cst_73 [1] : vector<8x16xf32> to vector<8xf32>
    %207 = vector.shape_cast %206 : vector<8xf32> to vector<8x1xf32>
    %208 = tpu.reciprocal %207 {approx = true} : vector<8x1xf32> -> vector<8x1xf32>
    %209 = vector.broadcast %208 : vector<8x1xf32> to vector<8x16xf32>
    %210 = arith.mulf %205, %209 : vector<8x16xf32>
    %211 = arith.truncf %210 : vector<8x16xf32> to vector<8x16xbf16>
    %212 = vector.extract_strided_slice %197 {offsets = [0, 0], sizes = [16, 8], strides = [1, 1]} : vector<16x32xbf16> to vector<16x8xbf16>
    %cst_74 = arith.constant dense<0.000000e+00> : vector<8x8xf32>
    %213 = tpu.matmul %211, %212, %cst_74 {dimension_numbers = #tpu.dot_dimension_numbers<[1], [0], [0], [1], [0, 0, 1, 1], [], []>} : vector<8x16xbf16>, vector<16x8xbf16>, vector<8x8xf32> -> vector<8x8xf32>
    %214 = arith.truncf %213 : vector<8x8xf32> to vector<8x8xbf16>
    %c16_75 = arith.constant 16 : index
    %c0_76 = arith.constant 0 : index
    %215 = vector.load %arg14[%c16_75, %c0_76] : memref<32x32xbf16, #tpu.memory_space<vmem>>, vector<8x8xbf16>
    tpu.vector_store %arg14[%c16_75, %c0_76], %214 {strides = array<i32>} : memref<32x32xbf16, #tpu.memory_space<vmem>>, vector<8x8xbf16>,
    %216 = vector.extract_strided_slice %195 {offsets = [0, 8], sizes = [8, 8], strides = [1, 1]} : vector<8x32xbf16> to vector<8x8xbf16>
    %217 = vector.extract_strided_slice %196 {offsets = [0, 8], sizes = [16, 8], strides = [1, 1]} : vector<16x32xbf16> to vector<16x8xbf16>
    %cst_77 = arith.constant dense<0.000000e+00> : vector<8x16xf32>
    %218 = tpu.matmul %216, %217, %cst_77 {dimension_numbers = #tpu.dot_dimension_numbers<[1], [1], [0], [0], [0, 0, 1, 0], [], []>} : vector<8x8xbf16>, vector<16x8xbf16>, vector<8x16xf32> -> vector<8x16xf32>
    %cst_78 = arith.constant dense<0xFF800000> : vector<8xf32>
    %219 = vector.multi_reduction <maximumf>, %218, %cst_78 [1] : vector<8x16xf32> to vector<8xf32>
    %220 = vector.shape_cast %219 : vector<8xf32> to vector<8x1xf32>
    %221 = vector.broadcast %220 : vector<8x1xf32> to vector<8x16xf32>
    %222 = arith.subf %218, %221 : vector<8x16xf32>
    %223 = math.exp %222 : vector<8x16xf32>
    %cst_79 = arith.constant dense<0.000000e+00> : vector<8xf32>
    %224 = vector.multi_reduction <add>, %223, %cst_79 [1] : vector<8x16xf32> to vector<8xf32>
    %225 = vector.shape_cast %224 : vector<8xf32> to vector<8x1xf32>
    %226 = tpu.reciprocal %225 {approx = true} : vector<8x1xf32> -> vector<8x1xf32>
    %227 = vector.broadcast %226 : vector<8x1xf32> to vector<8x16xf32>
    %228 = arith.mulf %223, %227 : vector<8x16xf32>
    %229 = arith.truncf %228 : vector<8x16xf32> to vector<8x16xbf16>
    %230 = vector.extract_strided_slice %197 {offsets = [0, 8], sizes = [16, 8], strides = [1, 1]} : vector<16x32xbf16> to vector<16x8xbf16>
    %cst_80 = arith.constant dense<0.000000e+00> : vector<8x8xf32>
    %231 = tpu.matmul %229, %230, %cst_80 {dimension_numbers = #tpu.dot_dimension_numbers<[1], [0], [0], [1], [0, 0, 1, 1], [], []>} : vector<8x16xbf16>, vector<16x8xbf16>, vector<8x8xf32> -> vector<8x8xf32>
    %232 = arith.truncf %231 : vector<8x8xf32> to vector<8x8xbf16>
    %c16_81 = arith.constant 16 : index
    %c8_82 = arith.constant 8 : index
    %233 = vector.load %arg14[%c16_81, %c8_82] : memref<32x32xbf16, #tpu.memory_space<vmem>>, vector<8x8xbf16>
    tpu.vector_store %arg14[%c16_81, %c8_82], %232 {strides = array<i32>} : memref<32x32xbf16, #tpu.memory_space<vmem>>, vector<8x8xbf16>,
    %234 = vector.extract_strided_slice %195 {offsets = [0, 16], sizes = [8, 8], strides = [1, 1]} : vector<8x32xbf16> to vector<8x8xbf16>
    %235 = vector.extract_strided_slice %196 {offsets = [0, 16], sizes = [16, 8], strides = [1, 1]} : vector<16x32xbf16> to vector<16x8xbf16>
    %cst_83 = arith.constant dense<0.000000e+00> : vector<8x16xf32>
    %236 = tpu.matmul %234, %235, %cst_83 {dimension_numbers = #tpu.dot_dimension_numbers<[1], [1], [0], [0], [0, 0, 1, 0], [], []>} : vector<8x8xbf16>, vector<16x8xbf16>, vector<8x16xf32> -> vector<8x16xf32>
    %cst_84 = arith.constant dense<0xFF800000> : vector<8xf32>
    %237 = vector.multi_reduction <maximumf>, %236, %cst_84 [1] : vector<8x16xf32> to vector<8xf32>
    %238 = vector.shape_cast %237 : vector<8xf32> to vector<8x1xf32>
    %239 = vector.broadcast %238 : vector<8x1xf32> to vector<8x16xf32>
    %240 = arith.subf %236, %239 : vector<8x16xf32>
    %241 = math.exp %240 : vector<8x16xf32>
    %cst_85 = arith.constant dense<0.000000e+00> : vector<8xf32>
    %242 = vector.multi_reduction <add>, %241, %cst_85 [1] : vector<8x16xf32> to vector<8xf32>
    %243 = vector.shape_cast %242 : vector<8xf32> to vector<8x1xf32>
    %244 = tpu.reciprocal %243 {approx = true} : vector<8x1xf32> -> vector<8x1xf32>
    %245 = vector.broadcast %244 : vector<8x1xf32> to vector<8x16xf32>
    %246 = arith.mulf %241, %245 : vector<8x16xf32>
    %247 = arith.truncf %246 : vector<8x16xf32> to vector<8x16xbf16>
    %248 = vector.extract_strided_slice %197 {offsets = [0, 16], sizes = [16, 8], strides = [1, 1]} : vector<16x32xbf16> to vector<16x8xbf16>
    %cst_86 = arith.constant dense<0.000000e+00> : vector<8x8xf32>
    %249 = tpu.matmul %247, %248, %cst_86 {dimension_numbers = #tpu.dot_dimension_numbers<[1], [0], [0], [1], [0, 0, 1, 1], [], []>} : vector<8x16xbf16>, vector<16x8xbf16>, vector<8x8xf32> -> vector<8x8xf32>
    %250 = arith.truncf %249 : vector<8x8xf32> to vector<8x8xbf16>
    %c16_87 = arith.constant 16 : index
    %c16_88 = arith.constant 16 : index
    %251 = vector.load %arg14[%c16_87, %c16_88] : memref<32x32xbf16, #tpu.memory_space<vmem>>, vector<8x8xbf16>
    tpu.vector_store %arg14[%c16_87, %c16_88], %250 {strides = array<i32>} : memref<32x32xbf16, #tpu.memory_space<vmem>>, vector<8x8xbf16>,
    %252 = vector.extract_strided_slice %195 {offsets = [0, 24], sizes = [8, 8], strides = [1, 1]} : vector<8x32xbf16> to vector<8x8xbf16>
    %253 = vector.extract_strided_slice %196 {offsets = [0, 24], sizes = [16, 8], strides = [1, 1]} : vector<16x32xbf16> to vector<16x8xbf16>
    %cst_89 = arith.constant dense<0.000000e+00> : vector<8x16xf32>
    %254 = tpu.matmul %252, %253, %cst_89 {dimension_numbers = #tpu.dot_dimension_numbers<[1], [1], [0], [0], [0, 0, 1, 0], [], []>} : vector<8x8xbf16>, vector<16x8xbf16>, vector<8x16xf32> -> vector<8x16xf32>
    %cst_90 = arith.constant dense<0xFF800000> : vector<8xf32>
    %255 = vector.multi_reduction <maximumf>, %254, %cst_90 [1] : vector<8x16xf32> to vector<8xf32>
    %256 = vector.shape_cast %255 : vector<8xf32> to vector<8x1xf32>
    %257 = vector.broadcast %256 : vector<8x1xf32> to vector<8x16xf32>
    %258 = arith.subf %254, %257 : vector<8x16xf32>
    %259 = math.exp %258 : vector<8x16xf32>
    %cst_91 = arith.constant dense<0.000000e+00> : vector<8xf32>
    %260 = vector.multi_reduction <add>, %259, %cst_91 [1] : vector<8x16xf32> to vector<8xf32>
    %261 = vector.shape_cast %260 : vector<8xf32> to vector<8x1xf32>
    %262 = tpu.reciprocal %261 {approx = true} : vector<8x1xf32> -> vector<8x1xf32>
    %263 = vector.broadcast %262 : vector<8x1xf32> to vector<8x16xf32>
    %264 = arith.mulf %259, %263 : vector<8x16xf32>
    %265 = arith.truncf %264 : vector<8x16xf32> to vector<8x16xbf16>
    %266 = vector.extract_strided_slice %197 {offsets = [0, 24], sizes = [16, 8], strides = [1, 1]} : vector<16x32xbf16> to vector<16x8xbf16>
    %cst_92 = arith.constant dense<0.000000e+00> : vector<8x8xf32>
    %267 = tpu.matmul %265, %266, %cst_92 {dimension_numbers = #tpu.dot_dimension_numbers<[1], [0], [0], [1], [0, 0, 1, 1], [], []>} : vector<8x16xbf16>, vector<16x8xbf16>, vector<8x8xf32> -> vector<8x8xf32>
    %268 = arith.truncf %267 : vector<8x8xf32> to vector<8x8xbf16>
    %c16_93 = arith.constant 16 : index
    %c24_94 = arith.constant 24 : index
    %269 = vector.load %arg14[%c16_93, %c24_94] : memref<32x32xbf16, #tpu.memory_space<vmem>>, vector<8x8xbf16>
    tpu.vector_store %arg14[%c16_93, %c24_94], %268 {strides = array<i32>} : memref<32x32xbf16, #tpu.memory_space<vmem>>, vector<8x8xbf16>,
    %270 = vector.extract_strided_slice %31 {offsets = [24, 0], sizes = [8, 32], strides = [1, 1]} : vector<32x32xbf16> to vector<8x32xbf16>
    %271 = vector.extract_strided_slice %38 {offsets = [48, 0], sizes = [16, 32], strides = [1, 1]} : vector<64x32xbf16> to vector<16x32xbf16>
    %272 = vector.extract_strided_slice %44 {offsets = [48, 0], sizes = [16, 32], strides = [1, 1]} : vector<64x32xbf16> to vector<16x32xbf16>
    %273 = vector.extract_strided_slice %270 {offsets = [0, 0], sizes = [8, 8], strides = [1, 1]} : vector<8x32xbf16> to vector<8x8xbf16>
    %274 = vector.extract_strided_slice %271 {offsets = [0, 0], sizes = [16, 8], strides = [1, 1]} : vector<16x32xbf16> to vector<16x8xbf16>
    %cst_95 = arith.constant dense<0.000000e+00> : vector<8x16xf32>
    %275 = tpu.matmul %273, %274, %cst_95 {dimension_numbers = #tpu.dot_dimension_numbers<[1], [1], [0], [0], [0, 0, 1, 0], [], []>} : vector<8x8xbf16>, vector<16x8xbf16>, vector<8x16xf32> -> vector<8x16xf32>
    %cst_96 = arith.constant dense<0xFF800000> : vector<8xf32>
    %276 = vector.multi_reduction <maximumf>, %275, %cst_96 [1] : vector<8x16xf32> to vector<8xf32>
    %277 = vector.shape_cast %276 : vector<8xf32> to vector<8x1xf32>
    %278 = vector.broadcast %277 : vector<8x1xf32> to vector<8x16xf32>
    %279 = arith.subf %275, %278 : vector<8x16xf32>
    %280 = math.exp %279 : vector<8x16xf32>
    %cst_97 = arith.constant dense<0.000000e+00> : vector<8xf32>
    %281 = vector.multi_reduction <add>, %280, %cst_97 [1] : vector<8x16xf32> to vector<8xf32>
    %282 = vector.shape_cast %281 : vector<8xf32> to vector<8x1xf32>
    %283 = tpu.reciprocal %282 {approx = true} : vector<8x1xf32> -> vector<8x1xf32>
    %284 = vector.broadcast %283 : vector<8x1xf32> to vector<8x16xf32>
    %285 = arith.mulf %280, %284 : vector<8x16xf32>
    %286 = arith.truncf %285 : vector<8x16xf32> to vector<8x16xbf16>
    %287 = vector.extract_strided_slice %272 {offsets = [0, 0], sizes = [16, 8], strides = [1, 1]} : vector<16x32xbf16> to vector<16x8xbf16>
    %cst_98 = arith.constant dense<0.000000e+00> : vector<8x8xf32>
    %288 = tpu.matmul %286, %287, %cst_98 {dimension_numbers = #tpu.dot_dimension_numbers<[1], [0], [0], [1], [0, 0, 1, 1], [], []>} : vector<8x16xbf16>, vector<16x8xbf16>, vector<8x8xf32> -> vector<8x8xf32>
    %289 = arith.truncf %288 : vector<8x8xf32> to vector<8x8xbf16>
    %c24_99 = arith.constant 24 : index
    %c0_100 = arith.constant 0 : index
    %290 = vector.load %arg14[%c24_99, %c0_100] : memref<32x32xbf16, #tpu.memory_space<vmem>>, vector<8x8xbf16>
    tpu.vector_store %arg14[%c24_99, %c0_100], %289 {strides = array<i32>} : memref<32x32xbf16, #tpu.memory_space<vmem>>, vector<8x8xbf16>,
    %291 = vector.extract_strided_slice %270 {offsets = [0, 8], sizes = [8, 8], strides = [1, 1]} : vector<8x32xbf16> to vector<8x8xbf16>
    %292 = vector.extract_strided_slice %271 {offsets = [0, 8], sizes = [16, 8], strides = [1, 1]} : vector<16x32xbf16> to vector<16x8xbf16>
    %cst_101 = arith.constant dense<0.000000e+00> : vector<8x16xf32>
    %293 = tpu.matmul %291, %292, %cst_101 {dimension_numbers = #tpu.dot_dimension_numbers<[1], [1], [0], [0], [0, 0, 1, 0], [], []>} : vector<8x8xbf16>, vector<16x8xbf16>, vector<8x16xf32> -> vector<8x16xf32>
    %cst_102 = arith.constant dense<0xFF800000> : vector<8xf32>
    %294 = vector.multi_reduction <maximumf>, %293, %cst_102 [1] : vector<8x16xf32> to vector<8xf32>
    %295 = vector.shape_cast %294 : vector<8xf32> to vector<8x1xf32>
    %296 = vector.broadcast %295 : vector<8x1xf32> to vector<8x16xf32>
    %297 = arith.subf %293, %296 : vector<8x16xf32>
    %298 = math.exp %297 : vector<8x16xf32>
    %cst_103 = arith.constant dense<0.000000e+00> : vector<8xf32>
    %299 = vector.multi_reduction <add>, %298, %cst_103 [1] : vector<8x16xf32> to vector<8xf32>
    %300 = vector.shape_cast %299 : vector<8xf32> to vector<8x1xf32>
    %301 = tpu.reciprocal %300 {approx = true} : vector<8x1xf32> -> vector<8x1xf32>
    %302 = vector.broadcast %301 : vector<8x1xf32> to vector<8x16xf32>
    %303 = arith.mulf %298, %302 : vector<8x16xf32>
    %304 = arith.truncf %303 : vector<8x16xf32> to vector<8x16xbf16>
    %305 = vector.extract_strided_slice %272 {offsets = [0, 8], sizes = [16, 8], strides = [1, 1]} : vector<16x32xbf16> to vector<16x8xbf16>
    %cst_104 = arith.constant dense<0.000000e+00> : vector<8x8xf32>
    %306 = tpu.matmul %304, %305, %cst_104 {dimension_numbers = #tpu.dot_dimension_numbers<[1], [0], [0], [1], [0, 0, 1, 1], [], []>} : vector<8x16xbf16>, vector<16x8xbf16>, vector<8x8xf32> -> vector<8x8xf32>
    %307 = arith.truncf %306 : vector<8x8xf32> to vector<8x8xbf16>
    %c24_105 = arith.constant 24 : index
    %c8_106 = arith.constant 8 : index
    %308 = vector.load %arg14[%c24_105, %c8_106] : memref<32x32xbf16, #tpu.memory_space<vmem>>, vector<8x8xbf16>
    tpu.vector_store %arg14[%c24_105, %c8_106], %307 {strides = array<i32>} : memref<32x32xbf16, #tpu.memory_space<vmem>>, vector<8x8xbf16>,
    %309 = vector.extract_strided_slice %270 {offsets = [0, 16], sizes = [8, 8], strides = [1, 1]} : vector<8x32xbf16> to vector<8x8xbf16>
    %310 = vector.extract_strided_slice %271 {offsets = [0, 16], sizes = [16, 8], strides = [1, 1]} : vector<16x32xbf16> to vector<16x8xbf16>
    %cst_107 = arith.constant dense<0.000000e+00> : vector<8x16xf32>
    %311 = tpu.matmul %309, %310, %cst_107 {dimension_numbers = #tpu.dot_dimension_numbers<[1], [1], [0], [0], [0, 0, 1, 0], [], []>} : vector<8x8xbf16>, vector<16x8xbf16>, vector<8x16xf32> -> vector<8x16xf32>
    %cst_108 = arith.constant dense<0xFF800000> : vector<8xf32>
    %312 = vector.multi_reduction <maximumf>, %311, %cst_108 [1] : vector<8x16xf32> to vector<8xf32>
    %313 = vector.shape_cast %312 : vector<8xf32> to vector<8x1xf32>
    %314 = vector.broadcast %313 : vector<8x1xf32> to vector<8x16xf32>
    %315 = arith.subf %311, %314 : vector<8x16xf32>
    %316 = math.exp %315 : vector<8x16xf32>
    %cst_109 = arith.constant dense<0.000000e+00> : vector<8xf32>
    %317 = vector.multi_reduction <add>, %316, %cst_109 [1] : vector<8x16xf32> to vector<8xf32>
    %318 = vector.shape_cast %317 : vector<8xf32> to vector<8x1xf32>
    %319 = tpu.reciprocal %318 {approx = true} : vector<8x1xf32> -> vector<8x1xf32>
    %320 = vector.broadcast %319 : vector<8x1xf32> to vector<8x16xf32>
    %321 = arith.mulf %316, %320 : vector<8x16xf32>
    %322 = arith.truncf %321 : vector<8x16xf32> to vector<8x16xbf16>
    %323 = vector.extract_strided_slice %272 {offsets = [0, 16], sizes = [16, 8], strides = [1, 1]} : vector<16x32xbf16> to vector<16x8xbf16>
    %cst_110 = arith.constant dense<0.000000e+00> : vector<8x8xf32>
    %324 = tpu.matmul %322, %323, %cst_110 {dimension_numbers = #tpu.dot_dimension_numbers<[1], [0], [0], [1], [0, 0, 1, 1], [], []>} : vector<8x16xbf16>, vector<16x8xbf16>, vector<8x8xf32> -> vector<8x8xf32>
    %325 = arith.truncf %324 : vector<8x8xf32> to vector<8x8xbf16>
    %c24_111 = arith.constant 24 : index
    %c16_112 = arith.constant 16 : index
    %326 = vector.load %arg14[%c24_111, %c16_112] : memref<32x32xbf16, #tpu.memory_space<vmem>>, vector<8x8xbf16>
    tpu.vector_store %arg14[%c24_111, %c16_112], %325 {strides = array<i32>} : memref<32x32xbf16, #tpu.memory_space<vmem>>, vector<8x8xbf16>,
    %327 = vector.extract_strided_slice %270 {offsets = [0, 24], sizes = [8, 8], strides = [1, 1]} : vector<8x32xbf16> to vector<8x8xbf16>
    %328 = vector.extract_strided_slice %271 {offsets = [0, 24], sizes = [16, 8], strides = [1, 1]} : vector<16x32xbf16> to vector<16x8xbf16>
    %cst_113 = arith.constant dense<0.000000e+00> : vector<8x16xf32>
    %329 = tpu.matmul %327, %328, %cst_113 {dimension_numbers = #tpu.dot_dimension_numbers<[1], [1], [0], [0], [0, 0, 1, 0], [], []>} : vector<8x8xbf16>, vector<16x8xbf16>, vector<8x16xf32> -> vector<8x16xf32>
    %cst_114 = arith.constant dense<0xFF800000> : vector<8xf32>
    %330 = vector.multi_reduction <maximumf>, %329, %cst_114 [1] : vector<8x16xf32> to vector<8xf32>
    %331 = vector.shape_cast %330 : vector<8xf32> to vector<8x1xf32>
    %332 = vector.broadcast %331 : vector<8x1xf32> to vector<8x16xf32>
    %333 = arith.subf %329, %332 : vector<8x16xf32>
    %334 = math.exp %333 : vector<8x16xf32>
    %cst_115 = arith.constant dense<0.000000e+00> : vector<8xf32>
    %335 = vector.multi_reduction <add>, %334, %cst_115 [1] : vector<8x16xf32> to vector<8xf32>
    %336 = vector.shape_cast %335 : vector<8xf32> to vector<8x1xf32>
    %337 = tpu.reciprocal %336 {approx = true} : vector<8x1xf32> -> vector<8x1xf32>
    %338 = vector.broadcast %337 : vector<8x1xf32> to vector<8x16xf32>
    %339 = arith.mulf %334, %338 : vector<8x16xf32>
    %340 = arith.truncf %339 : vector<8x16xf32> to vector<8x16xbf16>
    %341 = vector.extract_strided_slice %272 {offsets = [0, 24], sizes = [16, 8], strides = [1, 1]} : vector<16x32xbf16> to vector<16x8xbf16>
    %cst_116 = arith.constant dense<0.000000e+00> : vector<8x8xf32>
    %342 = tpu.matmul %340, %341, %cst_116 {dimension_numbers = #tpu.dot_dimension_numbers<[1], [0], [0], [1], [0, 0, 1, 1], [], []>} : vector<8x16xbf16>, vector<16x8xbf16>, vector<8x8xf32> -> vector<8x8xf32>
    %343 = arith.truncf %342 : vector<8x8xf32> to vector<8x8xbf16>
    %c24_117 = arith.constant 24 : index
    %c24_118 = arith.constant 24 : index
    %344 = vector.load %arg14[%c24_117, %c24_118] : memref<32x32xbf16, #tpu.memory_space<vmem>>, vector<8x8xbf16>
    tpu.vector_store %arg14[%c24_117, %c24_118], %343 {strides = array<i32>} : memref<32x32xbf16, #tpu.memory_space<vmem>>, vector<8x8xbf16>,
    %c0_119 = arith.constant 0 : index
    %c0_120 = arith.constant 0 : index
    %345 = vector.load %arg14[%c0_119, %c0_120] : memref<32x32xbf16, #tpu.memory_space<vmem>>, vector<32x32xbf16>
    %c0_121 = arith.constant 0 : index
    %c0_122 = arith.constant 0 : index
    %346 = vector.load %arg9[%c0_121, %c0_122] : memref<32x32xbf16, #tpu.memory_space<vmem>>, vector<32x32xbf16>
    %cst_123 = arith.constant dense<0.000000e+00> : vector<32x32xf32>
    %347 = tpu.matmul %345, %346, %cst_123 {dimension_numbers = #tpu.dot_dimension_numbers<[1], [0], [0], [1], [0, 0, 1, 1], [], []>} : vector<32x32xbf16>, vector<32x32xbf16>, vector<32x32xf32> -> vector<32x32xf32>
    %c0_124 = arith.constant 0 : index
    %c0_125 = arith.constant 0 : index
    %348 = vector.load %arg1[%c0_124, %c0_125] : memref<32x32xf32, #tpu.memory_space<vmem>>, vector<32x32xf32>
    %349 = arith.addf %348, %347 : vector<32x32xf32>
    %c0_126 = arith.constant 0 : index
    %c0_127 = arith.constant 0 : index
    %350 = vector.load %arg10[%c0_126, %c0_127] : memref<1x32xf32, #tpu.memory_space<vmem>>, vector<1x32xf32>
    %351 = vector.broadcast %350 : vector<1x32xf32> to vector<32x32xf32>
    %352 = arith.addf %349, %351 : vector<32x32xf32>
    %c0_128 = arith.constant 0 : index
    %c0_129 = arith.constant 0 : index
    %353 = vector.load %arg13[%c0_128, %c0_129] : memref<32x32xf32, #tpu.memory_space<vmem>>, vector<32x32xf32>
    tpu.vector_store %arg13[%c0_128, %c0_129], %352 {strides = array<i32>} : memref<32x32xf32, #tpu.memory_space<vmem>>, vector<32x32xf32>,
    return
  }
  func.func @transform_0(%arg0: i32) -> (i32, i32) {
    %c0_i32 = arith.constant 0 : i32
    %c0_i32_0 = arith.constant 0 : i32
    return %arg0, %c0_i32 : i32, i32
  }
  func.func @transform_1(%arg0: i32) -> (i32, i32) {
    %c0_i32 = arith.constant 0 : i32
    %c0_i32_0 = arith.constant 0 : i32
    return %arg0, %c0_i32 : i32, i32
  }
  func.func @transform_2(%arg0: i32) -> (i32, i32) {
    %c0_i32 = arith.constant 0 : i32
    %c0_i32_0 = arith.constant 0 : i32
    %c0_i32_1 = arith.constant 0 : i32
    return %c0_i32, %c0_i32_0 : i32, i32
  }
  func.func @transform_3(%arg0: i32) -> (i32, i32) {
    %c0_i32 = arith.constant 0 : i32
    %c0_i32_0 = arith.constant 0 : i32
    %c0_i32_1 = arith.constant 0 : i32
    return %c0_i32, %c0_i32_0 : i32, i32
  }
  func.func @transform_4(%arg0: i32) -> (i32, i32) {
    %c0_i32 = arith.constant 0 : i32
    %c0_i32_0 = arith.constant 0 : i32
    %c0_i32_1 = arith.constant 0 : i32
    return %c0_i32, %c0_i32_0 : i32, i32
  }
  func.func @transform_5(%arg0: i32) -> (i32, i32) {
    %c0_i32 = arith.constant 0 : i32
    %c0_i32_0 = arith.constant 0 : i32
    %c0_i32_1 = arith.constant 0 : i32
    return %c0_i32, %c0_i32_0 : i32, i32
  }
  func.func @transform_6(%arg0: i32) -> (i32, i32) {
    %c0_i32 = arith.constant 0 : i32
    %c0_i32_0 = arith.constant 0 : i32
    %c0_i32_1 = arith.constant 0 : i32
    return %c0_i32, %c0_i32_0 : i32, i32
  }
  func.func @transform_7(%arg0: i32) -> (i32, i32) {
    %c0_i32 = arith.constant 0 : i32
    %c0_i32_0 = arith.constant 0 : i32
    %c0_i32_1 = arith.constant 0 : i32
    return %c0_i32, %c0_i32_0 : i32, i32
  }
  func.func @transform_8(%arg0: i32) -> (i32, i32) {
    %c0_i32 = arith.constant 0 : i32
    %c0_i32_0 = arith.constant 0 : i32
    %c0_i32_1 = arith.constant 0 : i32
    return %c0_i32, %c0_i32_0 : i32, i32
  }
  func.func @transform_9(%arg0: i32) -> (i32, i32) {
    %c0_i32 = arith.constant 0 : i32
    %c0_i32_0 = arith.constant 0 : i32
    %c0_i32_1 = arith.constant 0 : i32
    return %c0_i32, %c0_i32_0 : i32, i32
  }
  func.func @transform_10(%arg0: i32) -> (i32, i32) {
    %c0_i32 = arith.constant 0 : i32
    %c0_i32_0 = arith.constant 0 : i32
    %c0_i32_1 = arith.constant 0 : i32
    return %c0_i32, %c0_i32_0 : i32, i32
  }
  func.func @transform_11(%arg0: i32) -> (i32, i32) {
    %c0_i32 = arith.constant 0 : i32
    %c0_i32_0 = arith.constant 0 : i32
    %c0_i32_1 = arith.constant 0 : i32
    return %c0_i32, %c0_i32_0 : i32, i32
  }
  func.func @transform_12(%arg0: i32) -> (i32, i32) {
    %c0_i32 = arith.constant 0 : i32
    %c0_i32_0 = arith.constant 0 : i32
    return %arg0, %c0_i32 : i32, i32
  }
}

module attributes {stable_mosaic.version = 11 : i64} {
  func.func @mha_ff_kernel(%arg0: i32, %arg1: memref<32x32xf32, #tpu.memory_space<vmem>>, %arg2: memref<64x32xbf16, #tpu.memory_space<vmem>>, %arg3: memref<32x32xbf16, #tpu.memory_space<vmem>>, %arg4: memref<1x32xf32, #tpu.memory_space<vmem>>, %arg5: memref<32x32xbf16, #tpu.memory_space<vmem>>, %arg6: memref<1x32xf32, #tpu.memory_space<vmem>>, %arg7: memref<32x32xbf16, #tpu.memory_space<vmem>>, %arg8: memref<1x32xf32, #tpu.memory_space<vmem>>, %arg9: memref<32x32xbf16, #tpu.memory_space<vmem>>, %arg10: memref<1x32xf32, #tpu.memory_space<vmem>>, %arg11: memref<1x32xf32, #tpu.memory_space<vmem>>, %arg12: memref<1x32xf32, #tpu.memory_space<vmem>>, %arg13: memref<32x32xf32, #tpu.memory_space<vmem>>, %arg14: memref<32x32xbf16, #tpu.memory_space<vmem>>) attributes {dimension_semantics = [#tpu.dimension_semantics<parallel>], iteration_bounds = array<i64: 1>, scalar_prefetch = 0 : i64, scratch_operands = 1 : i64, tpu.core_type = #tpu.core_type<tc>, window_params = [{transform_indices = @transform_0, window_bounds = array<i64: 32, 32>}, {transform_indices = @transform_1, window_bounds = array<i64: 64, 32>}, {pipeline_mode = #tpu.pipeline_mode<synchronous>, transform_indices = @transform_2, window_bounds = array<i64: 32, 32>}, {pipeline_mode = #tpu.pipeline_mode<synchronous>, transform_indices = @transform_3, window_bounds = array<i64: 1, 32>}, {pipeline_mode = #tpu.pipeline_mode<synchronous>, transform_indices = @transform_4, window_bounds = array<i64: 32, 32>}, {pipeline_mode = #tpu.pipeline_mode<synchronous>, transform_indices = @transform_5, window_bounds = array<i64: 1, 32>}, {pipeline_mode = #tpu.pipeline_mode<synchronous>, transform_indices = @transform_6, window_bounds = array<i64: 32, 32>}, {pipeline_mode = #tpu.pipeline_mode<synchronous>, transform_indices = @transform_7, window_bounds = array<i64: 1, 32>}, {pipeline_mode = #tpu.pipeline_mode<synchronous>, transform_indices = @transform_8, window_bounds = array<i64: 32, 32>}, {pipeline_mode = #tpu.pipeline_mode<synchronous>, transform_indices = @transform_9, window_bounds = array<i64: 1, 32>}, {pipeline_mode = #tpu.pipeline_mode<synchronous>, transform_indices = @transform_10, window_bounds = array<i64: 1, 32>}, {pipeline_mode = #tpu.pipeline_mode<synchronous>, transform_indices = @transform_11, window_bounds = array<i64: 1, 32>}, {transform_indices = @transform_12, window_bounds = array<i64: 32, 32>}]} {
    %c0 = arith.constant 0 : index
    %c0_0 = arith.constant 0 : index
    %0 = vector.load %arg1[%c0, %c0_0] : memref<32x32xf32, #tpu.memory_space<vmem>>, vector<32x32xf32>
    %cst = arith.constant dense<0.000000e+00> : vector<32xf32>
    %1 = vector.multi_reduction <add>, %0, %cst [1] : vector<32x32xf32> to vector<32xf32>
    %2 = vector.shape_cast %1 : vector<32xf32> to vector<32x1xf32>
    %cst_1 = arith.constant 3.200000e+01 : f32
    %3 = vector.broadcast %cst_1 : f32 to vector<32x1xf32>
    %4 = arith.divf %2, %3 : vector<32x1xf32>
    %5 = vector.broadcast %4 : vector<32x1xf32> to vector<32x32xf32>
    %6 = arith.subf %0, %5 : vector<32x32xf32>
    %7 = arith.mulf %6, %6 : vector<32x32xf32>
    %cst_2 = arith.constant dense<0.000000e+00> : vector<32xf32>
    %8 = vector.multi_reduction <add>, %7, %cst_2 [1] : vector<32x32xf32> to vector<32xf32>
    %9 = vector.shape_cast %8 : vector<32xf32> to vector<32x1xf32>
    %cst_3 = arith.constant 0.0322580636 : f32
    %10 = vector.broadcast %cst_3 : f32 to vector<32x1xf32>
    %11 = arith.mulf %9, %10 : vector<32x1xf32>
    %c0_4 = arith.constant 0 : index
    %c0_5 = arith.constant 0 : index
    %12 = vector.load %arg11[%c0_4, %c0_5] : memref<1x32xf32, #tpu.memory_space<vmem>>, vector<1x32xf32>
    %13 = vector.broadcast %4 : vector<32x1xf32> to vector<32x32xf32>
    %14 = arith.subf %0, %13 : vector<32x32xf32>
    %15 = math.sqrt %11 : vector<32x1xf32>
    %cst_6 = arith.constant 9.99999997E-7 : f32
    %16 = vector.broadcast %cst_6 : f32 to vector<32x1xf32>
    %17 = arith.addf %15, %16 : vector<32x1xf32>
    %18 = vector.broadcast %17 : vector<32x1xf32> to vector<32x32xf32>
    %19 = arith.divf %14, %18 : vector<32x32xf32>
    %20 = vector.broadcast %12 : vector<1x32xf32> to vector<32x32xf32>
    %21 = arith.mulf %20, %19 : vector<32x32xf32>
    %c0_7 = arith.constant 0 : index
    %c0_8 = arith.constant 0 : index
    %22 = vector.load %arg12[%c0_7, %c0_8] : memref<1x32xf32, #tpu.memory_space<vmem>>, vector<1x32xf32>
    %23 = vector.broadcast %22 : vector<1x32xf32> to vector<32x32xf32>
    %24 = arith.addf %21, %23 : vector<32x32xf32>
    %25 = arith.truncf %24 : vector<32x32xf32> to vector<32x32xbf16>
    %c0_9 = arith.constant 0 : index
    %c0_10 = arith.constant 0 : index
    %26 = vector.load %arg3[%c0_9, %c0_10] : memref<32x32xbf16, #tpu.memory_space<vmem>>, vector<32x32xbf16>
    %cst_11 = arith.constant dense<0.000000e+00> : vector<32x32xf32>
    %27 = tpu.matmul %25, %26, %cst_11 {dimension_numbers = #tpu.dot_dimension_numbers<[1], [0], [0], [1], [0, 0, 1, 1], [], []>} : vector<32x32xbf16>, vector<32x32xbf16>, vector<32x32xf32> -> vector<32x32xf32>
    %c0_12 = arith.constant 0 : index
    %c0_13 = arith.constant 0 : index
    %28 = vector.load %arg4[%c0_12, %c0_13] : memref<1x32xf32, #tpu.memory_space<vmem>>, vector<1x32xf32>
    %29 = vector.broadcast %28 : vector<1x32xf32> to vector<32x32xf32>
    %30 = arith.addf %27, %29 : vector<32x32xf32>
    %31 = arith.truncf %30 : vector<32x32xf32> to vector<32x32xbf16>
    %c0_14 = arith.constant 0 : index
    %c0_15 = arith.constant 0 : index
    %32 = vector.load %arg2[%c0_14, %c0_15] : memref<64x32xbf16, #tpu.memory_space<vmem>>, vector<64x32xbf16>
    %c0_16 = arith.constant 0 : index
    %c0_17 = arith.constant 0 : index
    %33 = vector.load %arg5[%c0_16, %c0_17] : memref<32x32xbf16, #tpu.memory_space<vmem>>, vector<32x32xbf16>
    %cst_18 = arith.constant dense<0.000000e+00> : vector<64x32xf32>
    %34 = tpu.matmul %32, %33, %cst_18 {dimension_numbers = #tpu.dot_dimension_numbers<[1], [0], [0], [1], [0, 0, 1, 1], [], []>} : vector<64x32xbf16>, vector<32x32xbf16>, vector<64x32xf32> -> vector<64x32xf32>
    %c0_19 = arith.constant 0 : index
    %c0_20 = arith.constant 0 : index
    %35 = vector.load %arg6[%c0_19, %c0_20] : memref<1x32xf32, #tpu.memory_space<vmem>>, vector<1x32xf32>
    %36 = vector.broadcast %35 : vector<1x32xf32> to vector<64x32xf32>
    %37 = arith.addf %34, %36 : vector<64x32xf32>
    %38 = arith.truncf %37 : vector<64x32xf32> to vector<64x32xbf16>
    %c0_21 = arith.constant 0 : index
    %c0_22 = arith.constant 0 : index
    %39 = vector.load %arg7[%c0_21, %c0_22] : memref<32x32xbf16, #tpu.memory_space<vmem>>, vector<32x32xbf16>
    %cst_23 = arith.constant dense<0.000000e+00> : vector<64x32xf32>
    %40 = tpu.matmul %32, %39, %cst_23 {dimension_numbers = #tpu.dot_dimension_numbers<[1], [0], [0], [1], [0, 0, 1, 1], [], []>} : vector<64x32xbf16>, vector<32x32xbf16>, vector<64x32xf32> -> vector<64x32xf32>
    %c0_24 = arith.constant 0 : index
    %c0_25 = arith.constant 0 : index
    %41 = vector.load %arg8[%c0_24, %c0_25] : memref<1x32xf32, #tpu.memory_space<vmem>>, vector<1x32xf32>
    %42 = vector.broadcast %41 : vector<1x32xf32> to vector<64x32xf32>
    %43 = arith.addf %40, %42 : vector<64x32xf32>
    %44 = arith.truncf %43 : vector<64x32xf32> to vector<64x32xbf16>
    %45 = vector.extract_strided_slice %31 {offsets = [0, 0], sizes = [8, 32], strides = [1, 1]} : vector<32x32xbf16> to vector<8x32xbf16>
    %46 = vector.extract_strided_slice %38 {offsets = [0, 0], sizes = [16, 32], strides = [1, 1]} : vector<64x32xbf16> to vector<16x32xbf16>
    %47 = vector.extract_strided_slice %44 {offsets = [0, 0], sizes = [16, 32], strides = [1, 1]} : vector<64x32xbf16> to vector<16x32xbf16>
    %48 = vector.extract_strided_slice %45 {offsets = [0, 0], sizes = [8, 8], strides = [1, 1]} : vector<8x32xbf16> to vector<8x8xbf16>
    %49 = vector.extract_strided_slice %46 {offsets = [0, 0], sizes = [16, 8], strides = [1, 1]} : vector<16x32xbf16> to vector<16x8xbf16>
    %cst_26 = arith.constant dense<0.000000e+00> : vector<8x16xf32>
    %50 = tpu.matmul %48, %49, %cst_26 {dimension_numbers = #tpu.dot_dimension_numbers<[1], [1], [0], [0], [0, 0, 1, 0], [], []>} : vector<8x8xbf16>, vector<16x8xbf16>, vector<8x16xf32> -> vector<8x16xf32>
    %cst_27 = arith.constant dense<0xFF800000> : vector<8xf32>
    %51 = vector.multi_reduction <maximumf>, %50, %cst_27 [1] : vector<8x16xf32> to vector<8xf32>
    %52 = vector.shape_cast %51 : vector<8xf32> to vector<8x1xf32>
    %53 = vector.broadcast %52 : vector<8x1xf32> to vector<8x16xf32>
    %54 = arith.subf %50, %53 : vector<8x16xf32>
    %55 = math.exp %54 : vector<8x16xf32>
    %cst_28 = arith.constant dense<0.000000e+00> : vector<8xf32>
    %56 = vector.multi_reduction <add>, %55, %cst_28 [1] : vector<8x16xf32> to vector<8xf32>
    %57 = vector.shape_cast %56 : vector<8xf32> to vector<8x1xf32>
    %58 = tpu.reciprocal %57 {approx = true} : vector<8x1xf32> -> vector<8x1xf32>
    %59 = vector.broadcast %58 : vector<8x1xf32> to vector<8x16xf32>
    %60 = arith.mulf %55, %59 : vector<8x16xf32>
    %61 = arith.truncf %60 : vector<8x16xf32> to vector<8x16xbf16>
    %62 = vector.extract_strided_slice %47 {offsets = [0, 0], sizes = [16, 8], strides = [1, 1]} : vector<16x32xbf16> to vector<16x8xbf16>
    %cst_29 = arith.constant dense<0.000000e+00> : vector<8x8xf32>
    %63 = tpu.matmul %61, %62, %cst_29 {dimension_numbers = #tpu.dot_dimension_numbers<[1], [0], [0], [1], [0, 0, 1, 1], [], []>} : vector<8x16xbf16>, vector<16x8xbf16>, vector<8x8xf32> -> vector<8x8xf32>
    %64 = arith.truncf %63 : vector<8x8xf32> to vector<8x8xbf16>
    %c0_30 = arith.constant 0 : index
    %c0_31 = arith.constant 0 : index
    %65 = vector.load %arg14[%c0_30, %c0_31] : memref<32x32xbf16, #tpu.memory_space<vmem>>, vector<8x8xbf16>
    tpu.vector_store %arg14[%c0_30, %c0_31], %64 {strides = array<i32>} : memref<32x32xbf16, #tpu.memory_space<vmem>>, vector<8x8xbf16>,
    %66 = vector.extract_strided_slice %45 {offsets = [0, 8], sizes = [8, 8], strides = [1, 1]} : vector<8x32xbf16> to vector<8x8xbf16>
    %67 = vector.extract_strided_slice %46 {offsets = [0, 8], sizes = [16, 8], strides = [1, 1]} : vector<16x32xbf16> to vector<16x8xbf16>
    %cst_32 = arith.constant dense<0.000000e+00> : vector<8x16xf32>
    %68 = tpu.matmul %66, %67, %cst_32 {dimension_numbers = #tpu.dot_dimension_numbers<[1], [1], [0], [0], [0, 0, 1, 0], [], []>} : vector<8x8xbf16>, vector<16x8xbf16>, vector<8x16xf32> -> vector<8x16xf32>
    %cst_33 = arith.constant dense<0xFF800000> : vector<8xf32>
    %69 = vector.multi_reduction <maximumf>, %68, %cst_33 [1] : vector<8x16xf32> to vector<8xf32>
    %70 = vector.shape_cast %69 : vector<8xf32> to vector<8x1xf32>
    %71 = vector.broadcast %70 : vector<8x1xf32> to vector<8x16xf32>
    %72 = arith.subf %68, %71 : vector<8x16xf32>
    %73 = math.exp %72 : vector<8x16xf32>
    %cst_34 = arith.constant dense<0.000000e+00> : vector<8xf32>
    %74 = vector.multi_reduction <add>, %73, %cst_34 [1] : vector<8x16xf32> to vector<8xf32>
    %75 = vector.shape_cast %74 : vector<8xf32> to vector<8x1xf32>
    %76 = tpu.reciprocal %75 {approx = true} : vector<8x1xf32> -> vector<8x1xf32>
    %77 = vector.broadcast %76 : vector<8x1xf32> to vector<8x16xf32>
    %78 = arith.mulf %73, %77 : vector<8x16xf32>
    %79 = arith.truncf %78 : vector<8x16xf32> to vector<8x16xbf16>
    %80 = vector.extract_strided_slice %47 {offsets = [0, 8], sizes = [16, 8], strides = [1, 1]} : vector<16x32xbf16> to vector<16x8xbf16>
    %cst_35 = arith.constant dense<0.000000e+00> : vector<8x8xf32>
    %81 = tpu.matmul %79, %80, %cst_35 {dimension_numbers = #tpu.dot_dimension_numbers<[1], [0], [0], [1], [0, 0, 1, 1], [], []>} : vector<8x16xbf16>, vector<16x8xbf16>, vector<8x8xf32> -> vector<8x8xf32>
    %82 = arith.truncf %81 : vector<8x8xf32> to vector<8x8xbf16>
    %c0_36 = arith.constant 0 : index
    %c8 = arith.constant 8 : index
    %83 = vector.load %arg14[%c0_36, %c8] : memref<32x32xbf16, #tpu.memory_space<vmem>>, vector<8x8xbf16>
    tpu.vector_store %arg14[%c0_36, %c8], %82 {strides = array<i32>} : memref<32x32xbf16, #tpu.memory_space<vmem>>, vector<8x8xbf16>,
    %84 = vector.extract_strided_slice %45 {offsets = [0, 16], sizes = [8, 8], strides = [1, 1]} : vector<8x32xbf16> to vector<8x8xbf16>
    %85 = vector.extract_strided_slice %46 {offsets = [0, 16], sizes = [16, 8], strides = [1, 1]} : vector<16x32xbf16> to vector<16x8xbf16>
    %cst_37 = arith.constant dense<0.000000e+00> : vector<8x16xf32>
    %86 = tpu.matmul %84, %85, %cst_37 {dimension_numbers = #tpu.dot_dimension_numbers<[1], [1], [0], [0], [0, 0, 1, 0], [], []>} : vector<8x8xbf16>, vector<16x8xbf16>, vector<8x16xf32> -> vector<8x16xf32>
    %cst_38 = arith.constant dense<0xFF800000> : vector<8xf32>
    %87 = vector.multi_reduction <maximumf>, %86, %cst_38 [1] : vector<8x16xf32> to vector<8xf32>
    %88 = vector.shape_cast %87 : vector<8xf32> to vector<8x1xf32>
    %89 = vector.broadcast %88 : vector<8x1xf32> to vector<8x16xf32>
    %90 = arith.subf %86, %89 : vector<8x16xf32>
    %91 = math.exp %90 : vector<8x16xf32>
    %cst_39 = arith.constant dense<0.000000e+00> : vector<8xf32>
    %92 = vector.multi_reduction <add>, %91, %cst_39 [1] : vector<8x16xf32> to vector<8xf32>
    %93 = vector.shape_cast %92 : vector<8xf32> to vector<8x1xf32>
    %94 = tpu.reciprocal %93 {approx = true} : vector<8x1xf32> -> vector<8x1xf32>
    %95 = vector.broadcast %94 : vector<8x1xf32> to vector<8x16xf32>
    %96 = arith.mulf %91, %95 : vector<8x16xf32>
    %97 = arith.truncf %96 : vector<8x16xf32> to vector<8x16xbf16>
    %98 = vector.extract_strided_slice %47 {offsets = [0, 16], sizes = [16, 8], strides = [1, 1]} : vector<16x32xbf16> to vector<16x8xbf16>
    %cst_40 = arith.constant dense<0.000000e+00> : vector<8x8xf32>
    %99 = tpu.matmul %97, %98, %cst_40 {dimension_numbers = #tpu.dot_dimension_numbers<[1], [0], [0], [1], [0, 0, 1, 1], [], []>} : vector<8x16xbf16>, vector<16x8xbf16>, vector<8x8xf32> -> vector<8x8xf32>
    %100 = arith.truncf %99 : vector<8x8xf32> to vector<8x8xbf16>
    %c0_41 = arith.constant 0 : index
    %c16 = arith.constant 16 : index
    %101 = vector.load %arg14[%c0_41, %c16] : memref<32x32xbf16, #tpu.memory_space<vmem>>, vector<8x8xbf16>
    tpu.vector_store %arg14[%c0_41, %c16], %100 {strides = array<i32>} : memref<32x32xbf16, #tpu.memory_space<vmem>>, vector<8x8xbf16>,
    %102 = vector.extract_strided_slice %45 {offsets = [0, 24], sizes = [8, 8], strides = [1, 1]} : vector<8x32xbf16> to vector<8x8xbf16>
    %103 = vector.extract_strided_slice %46 {offsets = [0, 24], sizes = [16, 8], strides = [1, 1]} : vector<16x32xbf16> to vector<16x8xbf16>
    %cst_42 = arith.constant dense<0.000000e+00> : vector<8x16xf32>
    %104 = tpu.matmul %102, %103, %cst_42 {dimension_numbers = #tpu.dot_dimension_numbers<[1], [1], [0], [0], [0, 0, 1, 0], [], []>} : vector<8x8xbf16>, vector<16x8xbf16>, vector<8x16xf32> -> vector<8x16xf32>
    %cst_43 = arith.constant dense<0xFF800000> : vector<8xf32>
    %105 = vector.multi_reduction <maximumf>, %104, %cst_43 [1] : vector<8x16xf32> to vector<8xf32>
    %106 = vector.shape_cast %105 : vector<8xf32> to vector<8x1xf32>
    %107 = vector.broadcast %106 : vector<8x1xf32> to vector<8x16xf32>
    %108 = arith.subf %104, %107 : vector<8x16xf32>
    %109 = math.exp %108 : vector<8x16xf32>
    %cst_44 = arith.constant dense<0.000000e+00> : vector<8xf32>
    %110 = vector.multi_reduction <add>, %109, %cst_44 [1] : vector<8x16xf32> to vector<8xf32>
    %111 = vector.shape_cast %110 : vector<8xf32> to vector<8x1xf32>
    %112 = tpu.reciprocal %111 {approx = true} : vector<8x1xf32> -> vector<8x1xf32>
    %113 = vector.broadcast %112 : vector<8x1xf32> to vector<8x16xf32>
    %114 = arith.mulf %109, %113 : vector<8x16xf32>
    %115 = arith.truncf %114 : vector<8x16xf32> to vector<8x16xbf16>
    %116 = vector.extract_strided_slice %47 {offsets = [0, 24], sizes = [16, 8], strides = [1, 1]} : vector<16x32xbf16> to vector<16x8xbf16>
    %cst_45 = arith.constant dense<0.000000e+00> : vector<8x8xf32>
    %117 = tpu.matmul %115, %116, %cst_45 {dimension_numbers = #tpu.dot_dimension_numbers<[1], [0], [0], [1], [0, 0, 1, 1], [], []>} : vector<8x16xbf16>, vector<16x8xbf16>, vector<8x8xf32> -> vector<8x8xf32>
    %118 = arith.truncf %117 : vector<8x8xf32> to vector<8x8xbf16>
    %c0_46 = arith.constant 0 : index
    %c24 = arith.constant 24 : index
    %119 = vector.load %arg14[%c0_46, %c24] : memref<32x32xbf16, #tpu.memory_space<vmem>>, vector<8x8xbf16>
    tpu.vector_store %arg14[%c0_46, %c24], %118 {strides = array<i32>} : memref<32x32xbf16, #tpu.memory_space<vmem>>, vector<8x8xbf16>,
    %120 = vector.extract_strided_slice %31 {offsets = [8, 0], sizes = [8, 32], strides = [1, 1]} : vector<32x32xbf16> to vector<8x32xbf16>
    %121 = vector.extract_strided_slice %38 {offsets = [16, 0], sizes = [16, 32], strides = [1, 1]} : vector<64x32xbf16> to vector<16x32xbf16>
    %122 = vector.extract_strided_slice %44 {offsets = [16, 0], sizes = [16, 32], strides = [1, 1]} : vector<64x32xbf16> to vector<16x32xbf16>
    %123 = vector.extract_strided_slice %120 {offsets = [0, 0], sizes = [8, 8], strides = [1, 1]} : vector<8x32xbf16> to vector<8x8xbf16>
    %124 = vector.extract_strided_slice %121 {offsets = [0, 0], sizes = [16, 8], strides = [1, 1]} : vector<16x32xbf16> to vector<16x8xbf16>
    %cst_47 = arith.constant dense<0.000000e+00> : vector<8x16xf32>
    %125 = tpu.matmul %123, %124, %cst_47 {dimension_numbers = #tpu.dot_dimension_numbers<[1], [1], [0], [0], [0, 0, 1, 0], [], []>} : vector<8x8xbf16>, vector<16x8xbf16>, vector<8x16xf32> -> vector<8x16xf32>
    %cst_48 = arith.constant dense<0xFF800000> : vector<8xf32>
    %126 = vector.multi_reduction <maximumf>, %125, %cst_48 [1] : vector<8x16xf32> to vector<8xf32>
    %127 = vector.shape_cast %126 : vector<8xf32> to vector<8x1xf32>
    %128 = vector.broadcast %127 : vector<8x1xf32> to vector<8x16xf32>
    %129 = arith.subf %125, %128 : vector<8x16xf32>
    %130 = math.exp %129 : vector<8x16xf32>
    %cst_49 = arith.constant dense<0.000000e+00> : vector<8xf32>
    %131 = vector.multi_reduction <add>, %130, %cst_49 [1] : vector<8x16xf32> to vector<8xf32>
    %132 = vector.shape_cast %131 : vector<8xf32> to vector<8x1xf32>
    %133 = tpu.reciprocal %132 {approx = true} : vector<8x1xf32> -> vector<8x1xf32>
    %134 = vector.broadcast %133 : vector<8x1xf32> to vector<8x16xf32>
    %135 = arith.mulf %130, %134 : vector<8x16xf32>
    %136 = arith.truncf %135 : vector<8x16xf32> to vector<8x16xbf16>
    %137 = vector.extract_strided_slice %122 {offsets = [0, 0], sizes = [16, 8], strides = [1, 1]} : vector<16x32xbf16> to vector<16x8xbf16>
    %cst_50 = arith.constant dense<0.000000e+00> : vector<8x8xf32>
    %138 = tpu.matmul %136, %137, %cst_50 {dimension_numbers = #tpu.dot_dimension_numbers<[1], [0], [0], [1], [0, 0, 1, 1], [], []>} : vector<8x16xbf16>, vector<16x8xbf16>, vector<8x8xf32> -> vector<8x8xf32>
    %139 = arith.truncf %138 : vector<8x8xf32> to vector<8x8xbf16>
    %c8_51 = arith.constant 8 : index
    %c0_52 = arith.constant 0 : index
    %140 = vector.load %arg14[%c8_51, %c0_52] : memref<32x32xbf16, #tpu.memory_space<vmem>>, vector<8x8xbf16>
    tpu.vector_store %arg14[%c8_51, %c0_52], %139 {strides = array<i32>} : memref<32x32xbf16, #tpu.memory_space<vmem>>, vector<8x8xbf16>,
    %141 = vector.extract_strided_slice %120 {offsets = [0, 8], sizes = [8, 8], strides = [1, 1]} : vector<8x32xbf16> to vector<8x8xbf16>
    %142 = vector.extract_strided_slice %121 {offsets = [0, 8], sizes = [16, 8], strides = [1, 1]} : vector<16x32xbf16> to vector<16x8xbf16>
    %cst_53 = arith.constant dense<0.000000e+00> : vector<8x16xf32>
    %143 = tpu.matmul %141, %142, %cst_53 {dimension_numbers = #tpu.dot_dimension_numbers<[1], [1], [0], [0], [0, 0, 1, 0], [], []>} : vector<8x8xbf16>, vector<16x8xbf16>, vector<8x16xf32> -> vector<8x16xf32>
    %cst_54 = arith.constant dense<0xFF800000> : vector<8xf32>
    %144 = vector.multi_reduction <maximumf>, %143, %cst_54 [1] : vector<8x16xf32> to vector<8xf32>
    %145 = vector.shape_cast %144 : vector<8xf32> to vector<8x1xf32>
    %146 = vector.broadcast %145 : vector<8x1xf32> to vector<8x16xf32>
    %147 = arith.subf %143, %146 : vector<8x16xf32>
    %148 = math.exp %147 : vector<8x16xf32>
    %cst_55 = arith.constant dense<0.000000e+00> : vector<8xf32>
    %149 = vector.multi_reduction <add>, %148, %cst_55 [1] : vector<8x16xf32> to vector<8xf32>
    %150 = vector.shape_cast %149 : vector<8xf32> to vector<8x1xf32>
    %151 = tpu.reciprocal %150 {approx = true} : vector<8x1xf32> -> vector<8x1xf32>
    %152 = vector.broadcast %151 : vector<8x1xf32> to vector<8x16xf32>
    %153 = arith.mulf %148, %152 : vector<8x16xf32>
    %154 = arith.truncf %153 : vector<8x16xf32> to vector<8x16xbf16>
    %155 = vector.extract_strided_slice %122 {offsets = [0, 8], sizes = [16, 8], strides = [1, 1]} : vector<16x32xbf16> to vector<16x8xbf16>
    %cst_56 = arith.constant dense<0.000000e+00> : vector<8x8xf32>
    %156 = tpu.matmul %154, %155, %cst_56 {dimension_numbers = #tpu.dot_dimension_numbers<[1], [0], [0], [1], [0, 0, 1, 1], [], []>} : vector<8x16xbf16>, vector<16x8xbf16>, vector<8x8xf32> -> vector<8x8xf32>
    %157 = arith.truncf %156 : vector<8x8xf32> to vector<8x8xbf16>
    %c8_57 = arith.constant 8 : index
    %c8_58 = arith.constant 8 : index
    %158 = vector.load %arg14[%c8_57, %c8_58] : memref<32x32xbf16, #tpu.memory_space<vmem>>, vector<8x8xbf16>
    tpu.vector_store %arg14[%c8_57, %c8_58], %157 {strides = array<i32>} : memref<32x32xbf16, #tpu.memory_space<vmem>>, vector<8x8xbf16>,
    %159 = vector.extract_strided_slice %120 {offsets = [0, 16], sizes = [8, 8], strides = [1, 1]} : vector<8x32xbf16> to vector<8x8xbf16>
    %160 = vector.extract_strided_slice %121 {offsets = [0, 16], sizes = [16, 8], strides = [1, 1]} : vector<16x32xbf16> to vector<16x8xbf16>
    %cst_59 = arith.constant dense<0.000000e+00> : vector<8x16xf32>
    %161 = tpu.matmul %159, %160, %cst_59 {dimension_numbers = #tpu.dot_dimension_numbers<[1], [1], [0], [0], [0, 0, 1, 0], [], []>} : vector<8x8xbf16>, vector<16x8xbf16>, vector<8x16xf32> -> vector<8x16xf32>
    %cst_60 = arith.constant dense<0xFF800000> : vector<8xf32>
    %162 = vector.multi_reduction <maximumf>, %161, %cst_60 [1] : vector<8x16xf32> to vector<8xf32>
    %163 = vector.shape_cast %162 : vector<8xf32> to vector<8x1xf32>
    %164 = vector.broadcast %163 : vector<8x1xf32> to vector<8x16xf32>
    %165 = arith.subf %161, %164 : vector<8x16xf32>
    %166 = math.exp %165 : vector<8x16xf32>
    %cst_61 = arith.constant dense<0.000000e+00> : vector<8xf32>
    %167 = vector.multi_reduction <add>, %166, %cst_61 [1] : vector<8x16xf32> to vector<8xf32>
    %168 = vector.shape_cast %167 : vector<8xf32> to vector<8x1xf32>
    %169 = tpu.reciprocal %168 {approx = true} : vector<8x1xf32> -> vector<8x1xf32>
    %170 = vector.broadcast %169 : vector<8x1xf32> to vector<8x16xf32>
    %171 = arith.mulf %166, %170 : vector<8x16xf32>
    %172 = arith.truncf %171 : vector<8x16xf32> to vector<8x16xbf16>
    %173 = vector.extract_strided_slice %122 {offsets = [0, 16], sizes = [16, 8], strides = [1, 1]} : vector<16x32xbf16> to vector<16x8xbf16>
    %cst_62 = arith.constant dense<0.000000e+00> : vector<8x8xf32>
    %174 = tpu.matmul %172, %173, %cst_62 {dimension_numbers = #tpu.dot_dimension_numbers<[1], [0], [0], [1], [0, 0, 1, 1], [], []>} : vector<8x16xbf16>, vector<16x8xbf16>, vector<8x8xf32> -> vector<8x8xf32>
    %175 = arith.truncf %174 : vector<8x8xf32> to vector<8x8xbf16>
    %c8_63 = arith.constant 8 : index
    %c16_64 = arith.constant 16 : index
    %176 = vector.load %arg14[%c8_63, %c16_64] : memref<32x32xbf16, #tpu.memory_space<vmem>>, vector<8x8xbf16>
    tpu.vector_store %arg14[%c8_63, %c16_64], %175 {strides = array<i32>} : memref<32x32xbf16, #tpu.memory_space<vmem>>, vector<8x8xbf16>,
    %177 = vector.extract_strided_slice %120 {offsets = [0, 24], sizes = [8, 8], strides = [1, 1]} : vector<8x32xbf16> to vector<8x8xbf16>
    %178 = vector.extract_strided_slice %121 {offsets = [0, 24], sizes = [16, 8], strides = [1, 1]} : vector<16x32xbf16> to vector<16x8xbf16>
    %cst_65 = arith.constant dense<0.000000e+00> : vector<8x16xf32>
    %179 = tpu.matmul %177, %178, %cst_65 {dimension_numbers = #tpu.dot_dimension_numbers<[1], [1], [0], [0], [0, 0, 1, 0], [], []>} : vector<8x8xbf16>, vector<16x8xbf16>, vector<8x16xf32> -> vector<8x16xf32>
    %cst_66 = arith.constant dense<0xFF800000> : vector<8xf32>
    %180 = vector.multi_reduction <maximumf>, %179, %cst_66 [1] : vector<8x16xf32> to vector<8xf32>
    %181 = vector.shape_cast %180 : vector<8xf32> to vector<8x1xf32>
    %182 = vector.broadcast %181 : vector<8x1xf32> to vector<8x16xf32>
    %183 = arith.subf %179, %182 : vector<8x16xf32>
    %184 = math.exp %183 : vector<8x16xf32>
    %cst_67 = arith.constant dense<0.000000e+00> : vector<8xf32>
    %185 = vector.multi_reduction <add>, %184, %cst_67 [1] : vector<8x16xf32> to vector<8xf32>
    %186 = vector.shape_cast %185 : vector<8xf32> to vector<8x1xf32>
    %187 = tpu.reciprocal %186 {approx = true} : vector<8x1xf32> -> vector<8x1xf32>
    %188 = vector.broadcast %187 : vector<8x1xf32> to vector<8x16xf32>
    %189 = arith.mulf %184, %188 : vector<8x16xf32>
    %190 = arith.truncf %189 : vector<8x16xf32> to vector<8x16xbf16>
    %191 = vector.extract_strided_slice %122 {offsets = [0, 24], sizes = [16, 8], strides = [1, 1]} : vector<16x32xbf16> to vector<16x8xbf16>
    %cst_68 = arith.constant dense<0.000000e+00> : vector<8x8xf32>
    %192 = tpu.matmul %190, %191, %cst_68 {dimension_numbers = #tpu.dot_dimension_numbers<[1], [0], [0], [1], [0, 0, 1, 1], [], []>} : vector<8x16xbf16>, vector<16x8xbf16>, vector<8x8xf32> -> vector<8x8xf32>
    %193 = arith.truncf %192 : vector<8x8xf32> to vector<8x8xbf16>
    %c8_69 = arith.constant 8 : index
    %c24_70 = arith.constant 24 : index
    %194 = vector.load %arg14[%c8_69, %c24_70] : memref<32x32xbf16, #tpu.memory_space<vmem>>, vector<8x8xbf16>
    tpu.vector_store %arg14[%c8_69, %c24_70], %193 {strides = array<i32>} : memref<32x32xbf16, #tpu.memory_space<vmem>>, vector<8x8xbf16>,
    %195 = vector.extract_strided_slice %31 {offsets = [16, 0], sizes = [8, 32], strides = [1, 1]} : vector<32x32xbf16> to vector<8x32xbf16>
    %196 = vector.extract_strided_slice %38 {offsets = [32, 0], sizes = [16, 32], strides = [1, 1]} : vector<64x32xbf16> to vector<16x32xbf16>
    %197 = vector.extract_strided_slice %44 {offsets = [32, 0], sizes = [16, 32], strides = [1, 1]} : vector<64x32xbf16> to vector<16x32xbf16>
    %198 = vector.extract_strided_slice %195 {offsets = [0, 0], sizes = [8, 8], strides = [1, 1]} : vector<8x32xbf16> to vector<8x8xbf16>
    %199 = vector.extract_strided_slice %196 {offsets = [0, 0], sizes = [16, 8], strides = [1, 1]} : vector<16x32xbf16> to vector<16x8xbf16>
    %cst_71 = arith.constant dense<0.000000e+00> : vector<8x16xf32>
    %200 = tpu.matmul %198, %199, %cst_71 {dimension_numbers = #tpu.dot_dimension_numbers<[1], [1], [0], [0], [0, 0, 1, 0], [], []>} : vector<8x8xbf16>, vector<16x8xbf16>, vector<8x16xf32> -> vector<8x16xf32>
    %cst_72 = arith.constant dense<0xFF800000> : vector<8xf32>
    %201 = vector.multi_reduction <maximumf>, %200, %cst_72 [1] : vector<8x16xf32> to vector<8xf32>
    %202 = vector.shape_cast %201 : vector<8xf32> to vector<8x1xf32>
    %203 = vector.broadcast %202 : vector<8x1xf32> to vector<8x16xf32>
    %204 = arith.subf %200, %203 : vector<8x16xf32>
    %205 = math.exp %204 : vector<8x16xf32>
    %cst_73 = arith.constant dense<0.000000e+00> : vector<8xf32>
    %206 = vector.multi_reduction <add>, %205, %cst_73 [1] : vector<8x16xf32> to vector<8xf32>
    %207 = vector.shape_cast %206 : vector<8xf32> to vector<8x1xf32>
    %208 = tpu.reciprocal %207 {approx = true} : vector<8x1xf32> -> vector<8x1xf32>
    %209 = vector.broadcast %208 : vector<8x1xf32> to vector<8x16xf32>
    %210 = arith.mulf %205, %209 : vector<8x16xf32>
    %211 = arith.truncf %210 : vector<8x16xf32> to vector<8x16xbf16>
    %212 = vector.extract_strided_slice %197 {offsets = [0, 0], sizes = [16, 8], strides = [1, 1]} : vector<16x32xbf16> to vector<16x8xbf16>
    %cst_74 = arith.constant dense<0.000000e+00> : vector<8x8xf32>
    %213 = tpu.matmul %211, %212, %cst_74 {dimension_numbers = #tpu.dot_dimension_numbers<[1], [0], [0], [1], [0, 0, 1, 1], [], []>} : vector<8x16xbf16>, vector<16x8xbf16>, vector<8x8xf32> -> vector<8x8xf32>
    %214 = arith.truncf %213 : vector<8x8xf32> to vector<8x8xbf16>
    %c16_75 = arith.constant 16 : index
    %c0_76 = arith.constant 0 : index
    %215 = vector.load %arg14[%c16_75, %c0_76] : memref<32x32xbf16, #tpu.memory_space<vmem>>, vector<8x8xbf16>
    tpu.vector_store %arg14[%c16_75, %c0_76], %214 {strides = array<i32>} : memref<32x32xbf16, #tpu.memory_space<vmem>>, vector<8x8xbf16>,
    %216 = vector.extract_strided_slice %195 {offsets = [0, 8], sizes = [8, 8], strides = [1, 1]} : vector<8x32xbf16> to vector<8x8xbf16>
    %217 = vector.extract_strided_slice %196 {offsets = [0, 8], sizes = [16, 8], strides = [1, 1]} : vector<16x32xbf16> to vector<16x8xbf16>
    %cst_77 = arith.constant dense<0.000000e+00> : vector<8x16xf32>
    %218 = tpu.matmul %216, %217, %cst_77 {dimension_numbers = #tpu.dot_dimension_numbers<[1], [1], [0], [0], [0, 0, 1, 0], [], []>} : vector<8x8xbf16>, vector<16x8xbf16>, vector<8x16xf32> -> vector<8x16xf32>
    %cst_78 = arith.constant dense<0xFF800000> : vector<8xf32>
    %219 = vector.multi_reduction <maximumf>, %218, %cst_78 [1] : vector<8x16xf32> to vector<8xf32>
    %220 = vector.shape_cast %219 : vector<8xf32> to vector<8x1xf32>
    %221 = vector.broadcast %220 : vector<8x1xf32> to vector<8x16xf32>
    %222 = arith.subf %218, %221 : vector<8x16xf32>
    %223 = math.exp %222 : vector<8x16xf32>
    %cst_79 = arith.constant dense<0.000000e+00> : vector<8xf32>
    %224 = vector.multi_reduction <add>, %223, %cst_79 [1] : vector<8x16xf32> to vector<8xf32>
    %225 = vector.shape_cast %224 : vector<8xf32> to vector<8x1xf32>
    %226 = tpu.reciprocal %225 {approx = true} : vector<8x1xf32> -> vector<8x1xf32>
    %227 = vector.broadcast %226 : vector<8x1xf32> to vector<8x16xf32>
    %228 = arith.mulf %223, %227 : vector<8x16xf32>
    %229 = arith.truncf %228 : vector<8x16xf32> to vector<8x16xbf16>
    %230 = vector.extract_strided_slice %197 {offsets = [0, 8], sizes = [16, 8], strides = [1, 1]} : vector<16x32xbf16> to vector<16x8xbf16>
    %cst_80 = arith.constant dense<0.000000e+00> : vector<8x8xf32>
    %231 = tpu.matmul %229, %230, %cst_80 {dimension_numbers = #tpu.dot_dimension_numbers<[1], [0], [0], [1], [0, 0, 1, 1], [], []>} : vector<8x16xbf16>, vector<16x8xbf16>, vector<8x8xf32> -> vector<8x8xf32>
    %232 = arith.truncf %231 : vector<8x8xf32> to vector<8x8xbf16>
    %c16_81 = arith.constant 16 : index
    %c8_82 = arith.constant 8 : index
    %233 = vector.load %arg14[%c16_81, %c8_82] : memref<32x32xbf16, #tpu.memory_space<vmem>>, vector<8x8xbf16>
    tpu.vector_store %arg14[%c16_81, %c8_82], %232 {strides = array<i32>} : memref<32x32xbf16, #tpu.memory_space<vmem>>, vector<8x8xbf16>,
    %234 = vector.extract_strided_slice %195 {offsets = [0, 16], sizes = [8, 8], strides = [1, 1]} : vector<8x32xbf16> to vector<8x8xbf16>
    %235 = vector.extract_strided_slice %196 {offsets = [0, 16], sizes = [16, 8], strides = [1, 1]} : vector<16x32xbf16> to vector<16x8xbf16>
    %cst_83 = arith.constant dense<0.000000e+00> : vector<8x16xf32>
    %236 = tpu.matmul %234, %235, %cst_83 {dimension_numbers = #tpu.dot_dimension_numbers<[1], [1], [0], [0], [0, 0, 1, 0], [], []>} : vector<8x8xbf16>, vector<16x8xbf16>, vector<8x16xf32> -> vector<8x16xf32>
    %cst_84 = arith.constant dense<0xFF800000> : vector<8xf32>
    %237 = vector.multi_reduction <maximumf>, %236, %cst_84 [1] : vector<8x16xf32> to vector<8xf32>
    %238 = vector.shape_cast %237 : vector<8xf32> to vector<8x1xf32>
    %239 = vector.broadcast %238 : vector<8x1xf32> to vector<8x16xf32>
    %240 = arith.subf %236, %239 : vector<8x16xf32>
    %241 = math.exp %240 : vector<8x16xf32>
    %cst_85 = arith.constant dense<0.000000e+00> : vector<8xf32>
    %242 = vector.multi_reduction <add>, %241, %cst_85 [1] : vector<8x16xf32> to vector<8xf32>
    %243 = vector.shape_cast %242 : vector<8xf32> to vector<8x1xf32>
    %244 = tpu.reciprocal %243 {approx = true} : vector<8x1xf32> -> vector<8x1xf32>
    %245 = vector.broadcast %244 : vector<8x1xf32> to vector<8x16xf32>
    %246 = arith.mulf %241, %245 : vector<8x16xf32>
    %247 = arith.truncf %246 : vector<8x16xf32> to vector<8x16xbf16>
    %248 = vector.extract_strided_slice %197 {offsets = [0, 16], sizes = [16, 8], strides = [1, 1]} : vector<16x32xbf16> to vector<16x8xbf16>
    %cst_86 = arith.constant dense<0.000000e+00> : vector<8x8xf32>
    %249 = tpu.matmul %247, %248, %cst_86 {dimension_numbers = #tpu.dot_dimension_numbers<[1], [0], [0], [1], [0, 0, 1, 1], [], []>} : vector<8x16xbf16>, vector<16x8xbf16>, vector<8x8xf32> -> vector<8x8xf32>
    %250 = arith.truncf %249 : vector<8x8xf32> to vector<8x8xbf16>
    %c16_87 = arith.constant 16 : index
    %c16_88 = arith.constant 16 : index
    %251 = vector.load %arg14[%c16_87, %c16_88] : memref<32x32xbf16, #tpu.memory_space<vmem>>, vector<8x8xbf16>
    tpu.vector_store %arg14[%c16_87, %c16_88], %250 {strides = array<i32>} : memref<32x32xbf16, #tpu.memory_space<vmem>>, vector<8x8xbf16>,
    %252 = vector.extract_strided_slice %195 {offsets = [0, 24], sizes = [8, 8], strides = [1, 1]} : vector<8x32xbf16> to vector<8x8xbf16>
    %253 = vector.extract_strided_slice %196 {offsets = [0, 24], sizes = [16, 8], strides = [1, 1]} : vector<16x32xbf16> to vector<16x8xbf16>
    %cst_89 = arith.constant dense<0.000000e+00> : vector<8x16xf32>
    %254 = tpu.matmul %252, %253, %cst_89 {dimension_numbers = #tpu.dot_dimension_numbers<[1], [1], [0], [0], [0, 0, 1, 0], [], []>} : vector<8x8xbf16>, vector<16x8xbf16>, vector<8x16xf32> -> vector<8x16xf32>
    %cst_90 = arith.constant dense<0xFF800000> : vector<8xf32>
    %255 = vector.multi_reduction <maximumf>, %254, %cst_90 [1] : vector<8x16xf32> to vector<8xf32>
    %256 = vector.shape_cast %255 : vector<8xf32> to vector<8x1xf32>
    %257 = vector.broadcast %256 : vector<8x1xf32> to vector<8x16xf32>
    %258 = arith.subf %254, %257 : vector<8x16xf32>
    %259 = math.exp %258 : vector<8x16xf32>
    %cst_91 = arith.constant dense<0.000000e+00> : vector<8xf32>
    %260 = vector.multi_reduction <add>, %259, %cst_91 [1] : vector<8x16xf32> to vector<8xf32>
    %261 = vector.shape_cast %260 : vector<8xf32> to vector<8x1xf32>
    %262 = tpu.reciprocal %261 {approx = true} : vector<8x1xf32> -> vector<8x1xf32>
    %263 = vector.broadcast %262 : vector<8x1xf32> to vector<8x16xf32>
    %264 = arith.mulf %259, %263 : vector<8x16xf32>
    %265 = arith.truncf %264 : vector<8x16xf32> to vector<8x16xbf16>
    %266 = vector.extract_strided_slice %197 {offsets = [0, 24], sizes = [16, 8], strides = [1, 1]} : vector<16x32xbf16> to vector<16x8xbf16>
    %cst_92 = arith.constant dense<0.000000e+00> : vector<8x8xf32>
    %267 = tpu.matmul %265, %266, %cst_92 {dimension_numbers = #tpu.dot_dimension_numbers<[1], [0], [0], [1], [0, 0, 1, 1], [], []>} : vector<8x16xbf16>, vector<16x8xbf16>, vector<8x8xf32> -> vector<8x8xf32>
    %268 = arith.truncf %267 : vector<8x8xf32> to vector<8x8xbf16>
    %c16_93 = arith.constant 16 : index
    %c24_94 = arith.constant 24 : index
    %269 = vector.load %arg14[%c16_93, %c24_94] : memref<32x32xbf16, #tpu.memory_space<vmem>>, vector<8x8xbf16>
    tpu.vector_store %arg14[%c16_93, %c24_94], %268 {strides = array<i32>} : memref<32x32xbf16, #tpu.memory_space<vmem>>, vector<8x8xbf16>,
    %270 = vector.extract_strided_slice %31 {offsets = [24, 0], sizes = [8, 32], strides = [1, 1]} : vector<32x32xbf16> to vector<8x32xbf16>
    %271 = vector.extract_strided_slice %38 {offsets = [48, 0], sizes = [16, 32], strides = [1, 1]} : vector<64x32xbf16> to vector<16x32xbf16>
    %272 = vector.extract_strided_slice %44 {offsets = [48, 0], sizes = [16, 32], strides = [1, 1]} : vector<64x32xbf16> to vector<16x32xbf16>
    %273 = vector.extract_strided_slice %270 {offsets = [0, 0], sizes = [8, 8], strides = [1, 1]} : vector<8x32xbf16> to vector<8x8xbf16>
    %274 = vector.extract_strided_slice %271 {offsets = [0, 0], sizes = [16, 8], strides = [1, 1]} : vector<16x32xbf16> to vector<16x8xbf16>
    %cst_95 = arith.constant dense<0.000000e+00> : vector<8x16xf32>
    %275 = tpu.matmul %273, %274, %cst_95 {dimension_numbers = #tpu.dot_dimension_numbers<[1], [1], [0], [0], [0, 0, 1, 0], [], []>} : vector<8x8xbf16>, vector<16x8xbf16>, vector<8x16xf32> -> vector<8x16xf32>
    %cst_96 = arith.constant dense<0xFF800000> : vector<8xf32>
    %276 = vector.multi_reduction <maximumf>, %275, %cst_96 [1] : vector<8x16xf32> to vector<8xf32>
    %277 = vector.shape_cast %276 : vector<8xf32> to vector<8x1xf32>
    %278 = vector.broadcast %277 : vector<8x1xf32> to vector<8x16xf32>
    %279 = arith.subf %275, %278 : vector<8x16xf32>
    %280 = math.exp %279 : vector<8x16xf32>
    %cst_97 = arith.constant dense<0.000000e+00> : vector<8xf32>
    %281 = vector.multi_reduction <add>, %280, %cst_97 [1] : vector<8x16xf32> to vector<8xf32>
    %282 = vector.shape_cast %281 : vector<8xf32> to vector<8x1xf32>
    %283 = tpu.reciprocal %282 {approx = true} : vector<8x1xf32> -> vector<8x1xf32>
    %284 = vector.broadcast %283 : vector<8x1xf32> to vector<8x16xf32>
    %285 = arith.mulf %280, %284 : vector<8x16xf32>
    %286 = arith.truncf %285 : vector<8x16xf32> to vector<8x16xbf16>
    %287 = vector.extract_strided_slice %272 {offsets = [0, 0], sizes = [16, 8], strides = [1, 1]} : vector<16x32xbf16> to vector<16x8xbf16>
    %cst_98 = arith.constant dense<0.000000e+00> : vector<8x8xf32>
    %288 = tpu.matmul %286, %287, %cst_98 {dimension_numbers = #tpu.dot_dimension_numbers<[1], [0], [0], [1], [0, 0, 1, 1], [], []>} : vector<8x16xbf16>, vector<16x8xbf16>, vector<8x8xf32> -> vector<8x8xf32>
    %289 = arith.truncf %288 : vector<8x8xf32> to vector<8x8xbf16>
    %c24_99 = arith.constant 24 : index
    %c0_100 = arith.constant 0 : index
    %290 = vector.load %arg14[%c24_99, %c0_100] : memref<32x32xbf16, #tpu.memory_space<vmem>>, vector<8x8xbf16>
    tpu.vector_store %arg14[%c24_99, %c0_100], %289 {strides = array<i32>} : memref<32x32xbf16, #tpu.memory_space<vmem>>, vector<8x8xbf16>,
    %291 = vector.extract_strided_slice %270 {offsets = [0, 8], sizes = [8, 8], strides = [1, 1]} : vector<8x32xbf16> to vector<8x8xbf16>
    %292 = vector.extract_strided_slice %271 {offsets = [0, 8], sizes = [16, 8], strides = [1, 1]} : vector<16x32xbf16> to vector<16x8xbf16>
    %cst_101 = arith.constant dense<0.000000e+00> : vector<8x16xf32>
    %293 = tpu.matmul %291, %292, %cst_101 {dimension_numbers = #tpu.dot_dimension_numbers<[1], [1], [0], [0], [0, 0, 1, 0], [], []>} : vector<8x8xbf16>, vector<16x8xbf16>, vector<8x16xf32> -> vector<8x16xf32>
    %cst_102 = arith.constant dense<0xFF800000> : vector<8xf32>
    %294 = vector.multi_reduction <maximumf>, %293, %cst_102 [1] : vector<8x16xf32> to vector<8xf32>
    %295 = vector.shape_cast %294 : vector<8xf32> to vector<8x1xf32>
    %296 = vector.broadcast %295 : vector<8x1xf32> to vector<8x16xf32>
    %297 = arith.subf %293, %296 : vector<8x16xf32>
    %298 = math.exp %297 : vector<8x16xf32>
    %cst_103 = arith.constant dense<0.000000e+00> : vector<8xf32>
    %299 = vector.multi_reduction <add>, %298, %cst_103 [1] : vector<8x16xf32> to vector<8xf32>
    %300 = vector.shape_cast %299 : vector<8xf32> to vector<8x1xf32>
    %301 = tpu.reciprocal %300 {approx = true} : vector<8x1xf32> -> vector<8x1xf32>
    %302 = vector.broadcast %301 : vector<8x1xf32> to vector<8x16xf32>
    %303 = arith.mulf %298, %302 : vector<8x16xf32>
    %304 = arith.truncf %303 : vector<8x16xf32> to vector<8x16xbf16>
    %305 = vector.extract_strided_slice %272 {offsets = [0, 8], sizes = [16, 8], strides = [1, 1]} : vector<16x32xbf16> to vector<16x8xbf16>
    %cst_104 = arith.constant dense<0.000000e+00> : vector<8x8xf32>
    %306 = tpu.matmul %304, %305, %cst_104 {dimension_numbers = #tpu.dot_dimension_numbers<[1], [0], [0], [1], [0, 0, 1, 1], [], []>} : vector<8x16xbf16>, vector<16x8xbf16>, vector<8x8xf32> -> vector<8x8xf32>
    %307 = arith.truncf %306 : vector<8x8xf32> to vector<8x8xbf16>
    %c24_105 = arith.constant 24 : index
    %c8_106 = arith.constant 8 : index
    %308 = vector.load %arg14[%c24_105, %c8_106] : memref<32x32xbf16, #tpu.memory_space<vmem>>, vector<8x8xbf16>
    tpu.vector_store %arg14[%c24_105, %c8_106], %307 {strides = array<i32>} : memref<32x32xbf16, #tpu.memory_space<vmem>>, vector<8x8xbf16>,
    %309 = vector.extract_strided_slice %270 {offsets = [0, 16], sizes = [8, 8], strides = [1, 1]} : vector<8x32xbf16> to vector<8x8xbf16>
    %310 = vector.extract_strided_slice %271 {offsets = [0, 16], sizes = [16, 8], strides = [1, 1]} : vector<16x32xbf16> to vector<16x8xbf16>
    %cst_107 = arith.constant dense<0.000000e+00> : vector<8x16xf32>
    %311 = tpu.matmul %309, %310, %cst_107 {dimension_numbers = #tpu.dot_dimension_numbers<[1], [1], [0], [0], [0, 0, 1, 0], [], []>} : vector<8x8xbf16>, vector<16x8xbf16>, vector<8x16xf32> -> vector<8x16xf32>
    %cst_108 = arith.constant dense<0xFF800000> : vector<8xf32>
    %312 = vector.multi_reduction <maximumf>, %311, %cst_108 [1] : vector<8x16xf32> to vector<8xf32>
    %313 = vector.shape_cast %312 : vector<8xf32> to vector<8x1xf32>
    %314 = vector.broadcast %313 : vector<8x1xf32> to vector<8x16xf32>
    %315 = arith.subf %311, %314 : vector<8x16xf32>
    %316 = math.exp %315 : vector<8x16xf32>
    %cst_109 = arith.constant dense<0.000000e+00> : vector<8xf32>
    %317 = vector.multi_reduction <add>, %316, %cst_109 [1] : vector<8x16xf32> to vector<8xf32>
    %318 = vector.shape_cast %317 : vector<8xf32> to vector<8x1xf32>
    %319 = tpu.reciprocal %318 {approx = true} : vector<8x1xf32> -> vector<8x1xf32>
    %320 = vector.broadcast %319 : vector<8x1xf32> to vector<8x16xf32>
    %321 = arith.mulf %316, %320 : vector<8x16xf32>
    %322 = arith.truncf %321 : vector<8x16xf32> to vector<8x16xbf16>
    %323 = vector.extract_strided_slice %272 {offsets = [0, 16], sizes = [16, 8], strides = [1, 1]} : vector<16x32xbf16> to vector<16x8xbf16>
    %cst_110 = arith.constant dense<0.000000e+00> : vector<8x8xf32>
    %324 = tpu.matmul %322, %323, %cst_110 {dimension_numbers = #tpu.dot_dimension_numbers<[1], [0], [0], [1], [0, 0, 1, 1], [], []>} : vector<8x16xbf16>, vector<16x8xbf16>, vector<8x8xf32> -> vector<8x8xf32>
    %325 = arith.truncf %324 : vector<8x8xf32> to vector<8x8xbf16>
    %c24_111 = arith.constant 24 : index
    %c16_112 = arith.constant 16 : index
    %326 = vector.load %arg14[%c24_111, %c16_112] : memref<32x32xbf16, #tpu.memory_space<vmem>>, vector<8x8xbf16>
    tpu.vector_store %arg14[%c24_111, %c16_112], %325 {strides = array<i32>} : memref<32x32xbf16, #tpu.memory_space<vmem>>, vector<8x8xbf16>,
    %327 = vector.extract_strided_slice %270 {offsets = [0, 24], sizes = [8, 8], strides = [1, 1]} : vector<8x32xbf16> to vector<8x8xbf16>
    %328 = vector.extract_strided_slice %271 {offsets = [0, 24], sizes = [16, 8], strides = [1, 1]} : vector<16x32xbf16> to vector<16x8xbf16>
    %cst_113 = arith.constant dense<0.000000e+00> : vector<8x16xf32>
    %329 = tpu.matmul %327, %328, %cst_113 {dimension_numbers = #tpu.dot_dimension_numbers<[1], [1], [0], [0], [0, 0, 1, 0], [], []>} : vector<8x8xbf16>, vector<16x8xbf16>, vector<8x16xf32> -> vector<8x16xf32>
    %cst_114 = arith.constant dense<0xFF800000> : vector<8xf32>
    %330 = vector.multi_reduction <maximumf>, %329, %cst_114 [1] : vector<8x16xf32> to vector<8xf32>
    %331 = vector.shape_cast %330 : vector<8xf32> to vector<8x1xf32>
    %332 = vector.broadcast %331 : vector<8x1xf32> to vector<8x16xf32>
    %333 = arith.subf %329, %332 : vector<8x16xf32>
    %334 = math.exp %333 : vector<8x16xf32>
    %cst_115 = arith.constant dense<0.000000e+00> : vector<8xf32>
    %335 = vector.multi_reduction <add>, %334, %cst_115 [1] : vector<8x16xf32> to vector<8xf32>
    %336 = vector.shape_cast %335 : vector<8xf32> to vector<8x1xf32>
    %337 = tpu.reciprocal %336 {approx = true} : vector<8x1xf32> -> vector<8x1xf32>
    %338 = vector.broadcast %337 : vector<8x1xf32> to vector<8x16xf32>
    %339 = arith.mulf %334, %338 : vector<8x16xf32>
    %340 = arith.truncf %339 : vector<8x16xf32> to vector<8x16xbf16>
    %341 = vector.extract_strided_slice %272 {offsets = [0, 24], sizes = [16, 8], strides = [1, 1]} : vector<16x32xbf16> to vector<16x8xbf16>
    %cst_116 = arith.constant dense<0.000000e+00> : vector<8x8xf32>
    %342 = tpu.matmul %340, %341, %cst_116 {dimension_numbers = #tpu.dot_dimension_numbers<[1], [0], [0], [1], [0, 0, 1, 1], [], []>} : vector<8x16xbf16>, vector<16x8xbf16>, vector<8x8xf32> -> vector<8x8xf32>
    %343 = arith.truncf %342 : vector<8x8xf32> to vector<8x8xbf16>
    %c24_117 = arith.constant 24 : index
    %c24_118 = arith.constant 24 : index
    %344 = vector.load %arg14[%c24_117, %c24_118] : memref<32x32xbf16, #tpu.memory_space<vmem>>, vector<8x8xbf16>
    tpu.vector_store %arg14[%c24_117, %c24_118], %343 {strides = array<i32>} : memref<32x32xbf16, #tpu.memory_space<vmem>>, vector<8x8xbf16>,
    %c0_119 = arith.constant 0 : index
    %c0_120 = arith.constant 0 : index
    %345 = vector.load %arg14[%c0_119, %c0_120] : memref<32x32xbf16, #tpu.memory_space<vmem>>, vector<32x32xbf16>
    %c0_121 = arith.constant 0 : index
    %c0_122 = arith.constant 0 : index
    %346 = vector.load %arg9[%c0_121, %c0_122] : memref<32x32xbf16, #tpu.memory_space<vmem>>, vector<32x32xbf16>
    %cst_123 = arith.constant dense<0.000000e+00> : vector<32x32xf32>
    %347 = tpu.matmul %345, %346, %cst_123 {dimension_numbers = #tpu.dot_dimension_numbers<[1], [0], [0], [1], [0, 0, 1, 1], [], []>} : vector<32x32xbf16>, vector<32x32xbf16>, vector<32x32xf32> -> vector<32x32xf32>
    %c0_124 = arith.constant 0 : index
    %c0_125 = arith.constant 0 : index
    %348 = vector.load %arg1[%c0_124, %c0_125] : memref<32x32xf32, #tpu.memory_space<vmem>>, vector<32x32xf32>
    %349 = arith.addf %348, %347 : vector<32x32xf32>
    %c0_126 = arith.constant 0 : index
    %c0_127 = arith.constant 0 : index
    %350 = vector.load %arg10[%c0_126, %c0_127] : memref<1x32xf32, #tpu.memory_space<vmem>>, vector<1x32xf32>
    %351 = vector.broadcast %350 : vector<1x32xf32> to vector<32x32xf32>
    %352 = arith.addf %349, %351 : vector<32x32xf32>
    %c0_128 = arith.constant 0 : index
    %c0_129 = arith.constant 0 : index
    %353 = vector.load %arg13[%c0_128, %c0_129] : memref<32x32xf32, #tpu.memory_space<vmem>>, vector<32x32xf32>
    tpu.vector_store %arg13[%c0_128, %c0_129], %352 {strides = array<i32>} : memref<32x32xf32, #tpu.memory_space<vmem>>, vector<32x32xf32>,
    return
  }
  func.func @transform_0(%arg0: i32) -> (i32, i32) {
    %c0_i32 = arith.constant 0 : i32
    %c0_i32_0 = arith.constant 0 : i32
    return %arg0, %c0_i32 : i32, i32
  }
  func.func @transform_1(%arg0: i32) -> (i32, i32) {
    %c0_i32 = arith.constant 0 : i32
    %c0_i32_0 = arith.constant 0 : i32
    return %arg0, %c0_i32 : i32, i32
  }
  func.func @transform_2(%arg0: i32) -> (i32, i32) {
    %c0_i32 = arith.constant 0 : i32
    %c0_i32_0 = arith.constant 0 : i32
    %c0_i32_1 = arith.constant 0 : i32
    return %c0_i32, %c0_i32_0 : i32, i32
  }
  func.func @transform_3(%arg0: i32) -> (i32, i32) {
    %c0_i32 = arith.constant 0 : i32
    %c0_i32_0 = arith.constant 0 : i32
    %c0_i32_1 = arith.constant 0 : i32
    return %c0_i32, %c0_i32_0 : i32, i32
  }
  func.func @transform_4(%arg0: i32) -> (i32, i32) {
    %c0_i32 = arith.constant 0 : i32
    %c0_i32_0 = arith.constant 0 : i32
    %c0_i32_1 = arith.constant 0 : i32
    return %c0_i32, %c0_i32_0 : i32, i32
  }
  func.func @transform_5(%arg0: i32) -> (i32, i32) {
    %c0_i32 = arith.constant 0 : i32
    %c0_i32_0 = arith.constant 0 : i32
    %c0_i32_1 = arith.constant 0 : i32
    return %c0_i32, %c0_i32_0 : i32, i32
  }
  func.func @transform_6(%arg0: i32) -> (i32, i32) {
    %c0_i32 = arith.constant 0 : i32
    %c0_i32_0 = arith.constant 0 : i32
    %c0_i32_1 = arith.constant 0 : i32
    return %c0_i32, %c0_i32_0 : i32, i32
  }
  func.func @transform_7(%arg0: i32) -> (i32, i32) {
    %c0_i32 = arith.constant 0 : i32
    %c0_i32_0 = arith.constant 0 : i32
    %c0_i32_1 = arith.constant 0 : i32
    return %c0_i32, %c0_i32_0 : i32, i32
  }
  func.func @transform_8(%arg0: i32) -> (i32, i32) {
    %c0_i32 = arith.constant 0 : i32
    %c0_i32_0 = arith.constant 0 : i32
    %c0_i32_1 = arith.constant 0 : i32
    return %c0_i32, %c0_i32_0 : i32, i32
  }
  func.func @transform_9(%arg0: i32) -> (i32, i32) {
    %c0_i32 = arith.constant 0 : i32
    %c0_i32_0 = arith.constant 0 : i32
    %c0_i32_1 = arith.constant 0 : i32
    return %c0_i32, %c0_i32_0 : i32, i32
  }
  func.func @transform_10(%arg0: i32) -> (i32, i32) {
    %c0_i32 = arith.constant 0 : i32
    %c0_i32_0 = arith.constant 0 : i32
    %c0_i32_1 = arith.constant 0 : i32
    return %c0_i32, %c0_i32_0 : i32, i32
  }
  func.func @transform_11(%arg0: i32) -> (i32, i32) {
    %c0_i32 = arith.constant 0 : i32
    %c0_i32_0 = arith.constant 0 : i32
    %c0_i32_1 = arith.constant 0 : i32
    return %c0_i32, %c0_i32_0 : i32, i32
  }
  func.func @transform_12(%arg0: i32) -> (i32, i32) {
    %c0_i32 = arith.constant 0 : i32
    %c0_i32_0 = arith.constant 0 : i32
    return %arg0, %c0_i32 : i32, i32
  }
}

</mosaic_0001>

<bundles_post_ra>
// kernel: tpu_custom_call.1
= control target key start
LH: loop header
LB: loop body
LE: loop exit
PB: predicated region body
PF: predicated region fallthrough
CT: control target
= control target key end

     0   :  { %17 = vsyncpa [#allocation4], 0  ;;  %s3660_s0 = inlined_call_operand.vmem [shape: f32[32,32], index: 0, kind: input, shape index: {}]   ;;  %s3661_s1 = inlined_call_operand.vmem [shape: bf16[64,32], index: 1, kind: input, shape index: {}]   ;;  %s3662_s2 = inlined_call_operand.vmem [shape: bf16[32,32], index: 2, kind: input, shape index: {}]   ;;  %s3663_s3 = inlined_call_operand.vmem [shape: f32[1,32], index: 3, kind: input, shape index: {}]   ;;  %s3664_s4 = inlined_call_operand.hbm [shape: bf16[32,32], index: 4, kind: input, shape index: {}]   ;;  %s3665_s5 = inlined_call_operand.vmem [shape: f32[1,32], index: 5, kind: input, shape index: {}]   ;;  %s3666_s6 = inlined_call_operand.vmem [shape: bf16[32,32], index: 6, kind: input, shape index: {}]   ;;  %s3667_s7 = inlined_call_operand.vmem [shape: f32[1,32], index: 7, kind: input, shape index: {}]   ;;  %s3668_s8 = inlined_call_operand.hbm [shape: bf16[32,32], index: 8, kind: input, shape index: {}]   ;;  %s3669_s9 = inlined_call_operand.vmem [shape: f32[1,32], index: 9, kind: input, shape index: {}]   ;;  %s3670_s10 = inlined_call_operand.vmem [shape: f32[1,32], index: 10, kind: input, shape index: {}]   ;;  %s3671_s11 = inlined_call_operand.vmem [shape: f32[1,32], index: 11, kind: input, shape index: {}]   ;;  %s3672_s12 = inlined_call_operand.hbm [shape: f32[32,32], index: 12, kind: output, shape index: {}]  }
   0x1   :  { %18 = vsyncpa [#allocation7], 0 }
   0x2   :  { %19 = vsyncpa [#allocation5], 0  ;;  %s2969_s21 = smov [#allocation3]   ;;  %s2897_s25 = scalar_lea.hbm %s3664_s4, 256 }
   0x3   :  { %s33_s22 = sshll.u32 %s2969_s21, 4  ;;  %p2898_p0 = scmp.ne.s32.totalorder %s3664_s4, %s2897_s25  ;;  %s34_s22 = int_to_ptr.vmem [resolvable:$true] %s33_s22 }
   0x4   :  { %p2901_p1 = scmp.lt.u32.totalorder %s2897_s25, %s3664_s4 }
   0x6   :  { %p2903_p2 = pnand %p2901_p1, %p2898_p0 }
   0x8   :  { %2906 = shalt.err (!%p2903_p2)
}
   0x9   :  { %s2907_s30 = scalar_lea.vmem %s34_s22, 256  ;;  %p2912_p4 = scmp.lt.s32.totalorder %s34_s22, %s34_s22 }
   0xa   :  { %p2908_p3 = scmp.ne.s32.totalorder %s34_s22, %s2907_s30  ;;  %p2913_p5 = scmp.lt.s32.totalorder %s2907_s30, %s2907_s30 }
   0xc   :  { %p2914_p6 = por %p2913_p5, %p2912_p4 }
   0xe   :  { %p2915_p7 = pnand %p2914_p6, %p2908_p3 }
  0x10   :  { %2918 = shalt.err (!%p2915_p7)
}
  0x11   :  { %s2970_s13 = smov 64   ;;  %s2971_s14 = smov 4  }
  0x12   :  { %39 = dma.hbm_to_vmem [thread:$0]  %s3664_s4, 256, %s34_s22, [#allocation4], %s2970_s13, %s2970_s13, %s2971_s14  }
  0x13   :  { %s2972_s17 = smov [#allocation6]   ;;  %s2919_s21 = scalar_lea.hbm %s3668_s8, 256 }
  0x14   :  { %s51_s18 = sshll.u32 %s2972_s17, 4  ;;  %p2920_p8 = scmp.ne.s32.totalorder %s3668_s8, %s2919_s21  ;;  %s52_s18 = int_to_ptr.vmem [resolvable:$true] %s51_s18 }
  0x15   :  { %p2923_p9 = scmp.lt.u32.totalorder %s2919_s21, %s3668_s8 }
  0x17   :  { %p2925_p10 = pnand %p2923_p9, %p2920_p8 }
  0x19   :  { %2928 = shalt.err (!%p2925_p10)
}
  0x1a   :  { %s2929_s27 = scalar_lea.vmem %s52_s18, 256  ;;  %p2934_p12 = scmp.lt.s32.totalorder %s52_s18, %s52_s18 }
  0x1b   :  { %p2930_p11 = scmp.ne.s32.totalorder %s52_s18, %s2929_s27  ;;  %p2935_p13 = scmp.lt.s32.totalorder %s2929_s27, %s2929_s27 }
  0x1d   :  { %p2936_p0 = por %p2935_p13, %p2934_p12 }
  0x1f   :  { %p2937_p1 = pnand %p2936_p0, %p2930_p11 }
  0x21   :  { %2940 = shalt.err (!%p2937_p1)
}
  0x22   :  { %57 = dma.hbm_to_vmem [thread:$0]  %s3668_s8, 256, %s52_s18, [#allocation7], %s2970_s13, %s2970_s13, %s2971_s14  }
  0x23   :  { %2963 = dma.done.wait [#allocation4], 256  }
  0x24   :  { %2964 = vsyncadd [#allocation4], 4294967040 }
  0x25   :  { %2965 = dma.done.wait [#allocation7], 256  }
  0x26   :  { %2966 = vsyncadd [#allocation7], 4294967040  ;;  %vm75_vm0 = vcmask 261120   ;;  %v71_v0 = vld [vmem:[%s3660_s0] sm:$0xff]  ;;  %v73_v1 = vld [vmem:[%s3660_s0 + $0x10] sm:$0xff]  ;;  %s2973_s17 = smov 120  }
  0x27   :  { %v72_v2 = vld [vmem:[%s3660_s0 + $0x8] sm:$0xff]  ;;  %v76_v3 = vsel %vm75_vm0, %v71_v0, 0.0  ;;  %v82_v4 = vsel %vm75_vm0, %v73_v1, 0.0  ;;  %v74_v5 = vld [vmem:[%s3660_s0 + $0x18] sm:$0xff]  ;;  %v2805_v28 = vld [vmem:[#allocation3] sm:$0xff]   ;;  %s2974_s8 = smov 104  }
  0x28   :  { %77 = vadd.xlane.f32.xlu0 %v76_v3  ;;  %83 = vadd.xlane.f32.xlu1 %v82_v4  ;;  %v79_v6 = vsel %vm75_vm0, %v72_v2, 0.0  ;;  %v85_v7 = vsel %vm75_vm0, %v74_v5, 0.0  ;;  %v2806_v29 = vld [vmem:[#allocation3 + $0x8] sm:$0xff]   ;;  %v3111_v30 = vld [vmem:[%s3661_s1] sm:$0xff]   ;;  %v3116_v31 = vld [vmem:[%s3661_s1 + $0x8] sm:$0xff]   ;;  %vm485_vm9 = vcmask 64512  }
  0x29   :  { %2567 = vmatprep.subr.bf16.mxu1 %v2805_v28  ;;  %2571 = vmatprep.mubr.msk.bf16.mxu1 %vm75_vm0, %v3111_v30  ;;  %v2809_v32 = vld [vmem:[%s3662_s2] sm:$0xff]   ;;  %v2810_v33 = vld [vmem:[%s3662_s2 + $0x8] sm:$0xff]   ;;  %v3131_v34 = vld [vmem:[%s3661_s1 + $0x10] sm:$0xff]   ;;  %vm2977_vm10 = vmmov 0   ;;  %vm532_vm11 = vcmask 130048   ;;  %vm589_vm12 = vcmask 60416  }
  0x2a   :  { %2568 = vmatpush3.bf16.msra.mxu1 %v2805_v28  ;;  %2559 = vmatprep.subr.bf16.mxu0 %v2809_v32  ;;  %v3136_v35 = vld [vmem:[%s3661_s1 + $0x18] sm:$0xff]   ;;  %v3141_v36 = vld [vmem:[%s3666_s6] sm:$0xff]   ;;  %s2979_s19 = smov 16   ;;  %s2980_s20 = smov 24   ;;  %vm1045_vm13 = vcmask 64516   ;;  %vm707_vm14 = vcmask 126016  }
  0x2b   :  { %2569 = vmatprep.subr.bf16.mxu1 %v2806_v29  ;;  %2560 = vmatpush3.bf16.msra.mxu0 %v2809_v32  ;;  %vm822_vm15 = vcmask 191616   ;;  %s2981_s1 = smov [#allocation8]  }
  0x2c   :  { %80 = vadd.xlane.f32.xlu0 %v79_v6  ;;  %86 = vadd.xlane.f32.xlu1 %v85_v7  ;;  %v2413_v7 = vld [vmem:[%s3670_s10] ss:$0 sm:$0xff]  ;;  %s2400_s2 = sshll.u32 %s2981_s1, 4  ;;  %s2401_s2 = int_to_ptr.vmem [resolvable:$true] %s2400_s2 }
  0x2d   :  { %2561 = vmatprep.subr.bf16.mxu0 %v2810_v33  ;;  %p2946_p3 = scmp.lt.s32.totalorder %s2401_s2, %s2401_s2 }
  0x2e   :  { %2570 = vmatpush3.bf16.msra.mxu1 %v2806_v29 }
  0x2f   :  { %2562 = vmatpush3.bf16.msra.mxu0 %v2810_v33 }
  0x30   :  { %2579 = vmatprep.subr.bf16.mxu0 %v3141_v36 }
  0x31   :  { %2572 = vmatmul.mubr.msk.bf16.vlgmr.msra.gmra.mrb[0].mxu1 %vm75_vm0, %v3116_v31 }
  0x32   :  { %2575 = vmatprep.mubr.msk.bf16.mxu1 %vm75_vm0, %v3131_v34 }
  0x39   :  { %2576 = vmatmul.mubr.msk.bf16.gmra.mrb[4].mxu1 %vm75_vm0, %v3136_v35 }
  0xb5   :  { %v78_v8 = vpop.xlane.xlu0 %77  ;;  %v84_v9 = vpop.xlane.xlu1 %83 }
  0xb6   :  { %v89_v10 = vmul.f32 0.03125, %v78_v8  ;;  %v91_v11 = vmul.f32 0.03125, %v84_v9 }
  0xb8   :  { %v3088_v12 = vsub.f32 %v71_v0, %v89_v10  ;;  %v3090_v13 = vsub.f32 %v73_v1, %v91_v11 }
  0xb9   :  { %v81_v14 = vpop.xlane.xlu0 %80  ;;  %v87_v15 = vpop.xlane.xlu1 %86 }
  0xba   :  { %v90_v16 = vmul.f32 0.03125, %v81_v14  ;;  %v92_v17 = vmul.f32 0.03125, %v87_v15  ;;  %v97_v18 = vmul.f32 %v3088_v12, %v3088_v12  ;;  %v99_v19 = vmul.f32 %v3090_v13, %v3090_v13  ;;  %v2414_v14 = vld [vmem:[%s3671_s11] ss:$0 sm:$0xff] }
  0xbc   :  { %v3096_v20 = vsub.f32 %v72_v2, %v90_v16  ;;  %v3098_v21 = vsub.f32 %v74_v5, %v92_v17  ;;  %v101_v22 = vsel %vm75_vm0, %v97_v18, 0.0  ;;  %v107_v23 = vsel %vm75_vm0, %v99_v19, 0.0 }
  0xbd   :  { %102 = vadd.xlane.f32.xlu0 %v101_v22 }
  0xbe   :  { %v98_v24 = vmul.f32 %v3096_v20, %v3096_v20  ;;  %v100_v25 = vmul.f32 %v3098_v21, %v3098_v21 }
  0xc0   :  { %v104_v26 = vsel %vm75_vm0, %v98_v24, 0.0  ;;  %v110_v27 = vsel %vm75_vm0, %v100_v25, 0.0 }
  0xc1   :  { %108 = vadd.xlane.f32.xlu0 %v107_v23  ;;  %105 = vadd.xlane.f32.xlu1 %v104_v26 }
  0xc5   :  { %111 = vadd.xlane.f32.xlu1 %v110_v27  ;;  %v2814_v27 = vld [vmem:[%s3666_s6 + $0x8] sm:$0xff]  }
 0x14a   :  { %v103_v37 = vpop.xlane.xlu0 %102 }
 0x14b   :  { %v113_v38 = vmul.f32 0.032258064, %v103_v37 }
 0x14d   :  { %2817 = vrsqrt.f32 %v113_v38  ;;  %vm120_vm1 = vcmp.eq.f32.partialorder %v113_v38, inf  ;;  %v123_v47 = vand.u32 2147483648, %v113_v38  ;;  %vm122_vm2 = vcmp.eq.f32.partialorder %v113_v38, 0.0 }
 0x14e   :  { %v106_v39 = vpop.xlane.xlu1 %105  ;;  %v109_v40 = vpop.xlane.xlu0 %108 }
 0x14f   :  { %v114_v41 = vmul.f32 0.032258064, %v106_v39  ;;  %v115_v42 = vmul.f32 0.032258064, %v109_v40 }
 0x151   :  { %2819 = vrsqrt.f32 %v114_v41  ;;  %vm127_vm3 = vcmp.eq.f32.partialorder %v114_v41, inf  ;;  %vm129_vm4 = vcmp.eq.f32.partialorder %v114_v41, 0.0  ;;  %v130_v54 = vand.u32 2147483648, %v114_v41 }
 0x152   :  { %2821 = vrsqrt.f32 %v115_v42  ;;  %v112_v43 = vpop.xlane.xlu1 %111  ;;  %vm134_vm5 = vcmp.eq.f32.partialorder %v115_v42, inf  ;;  %v137_v57 = vand.u32 2147483648, %v115_v42  ;;  %vm136_vm6 = vcmp.eq.f32.partialorder %v115_v42, 0.0 }
 0x153   :  { %v116_v44 = vmul.f32 0.032258064, %v112_v43 }
 0x155   :  { %2823 = vrsqrt.f32 %v116_v44  ;;  %vm141_vm7 = vcmp.eq.f32.partialorder %v116_v44, inf  ;;  %v144_v1 = vand.u32 2147483648, %v116_v44  ;;  %vm143_vm8 = vcmp.eq.f32.partialorder %v116_v44, 0.0 }
 0x157   :  { %v2818_v45 = vpop.eup %2817 }
 0x158   :  { %v119_v46 = vmul.f32 %v2818_v45, %v113_v38 }
 0x15a   :  { %v121_v48 = vsel %vm120_vm1, %v113_v38, %v119_v46  ;;  %vm937_vm1 = vcmask 257216  }
 0x15b   :  { %v2820_v49 = vpop.eup %2819  ;;  %v124_v50 = vsel %vm122_vm2, %v123_v47, %v121_v48  ;;  %vm1163_vm2 = vcmask 130116  }
 0x15c   :  { %v2822_v51 = vpop.eup %2821  ;;  %v126_v52 = vmul.f32 %v2820_v49, %v114_v41  ;;  %v146_v53 = vadd.f32 1e-06, %v124_v50  ;;  %v2415_v50 = vld [vmem:[%s3663_s3] ss:$0 sm:$0xff] }
 0x15d   :  { %v133_v55 = vmul.f32 %v2822_v51, %v115_v42 }
 0x15e   :  { %v128_v56 = vsel %vm127_vm3, %v114_v41, %v126_v52  ;;  %2825 = vrcp.f32 %v146_v53  ;;  %vm1279_vm3 = vcmask 195716  }
 0x15f   :  { %v2824_v58 = vpop.eup %2823  ;;  %v135_v59 = vsel %vm134_vm5, %v115_v42, %v133_v55  ;;  %v131_v60 = vsel %vm129_vm4, %v130_v54, %v128_v56  ;;  %vm1395_vm4 = vcmask 261316  }
 0x160   :  { %v138_v61 = vsel %vm136_vm6, %v137_v57, %v135_v59  ;;  %v140_v62 = vmul.f32 %v2824_v58, %v116_v44  ;;  %v147_v63 = vadd.f32 1e-06, %v131_v60 }
 0x161   :  { %v148_v0 = vadd.f32 1e-06, %v138_v61 }
 0x162   :  { %v142_v2 = vsel %vm141_vm7, %v116_v44, %v140_v62  ;;  %2827 = vrcp.f32 %v147_v63 }
 0x163   :  { %2829 = vrcp.f32 %v148_v0  ;;  %v145_v3 = vsel %vm143_vm8, %v144_v1, %v142_v2  ;;  %v3240_v1 = vld [vmem:[%s3667_s7] ss:$0 sm:$0xff]  ;;  %s2978_s7 = smov 8  }
 0x164   :  { %v149_v4 = vadd.f32 1e-06, %v145_v3 }
 0x166   :  { %2831 = vrcp.f32 %v149_v4 }
 0x168   :  { %v2826_v5 = vpop.eup %2825 }
 0x169   :  { %v151_v6 = vmul.f32 %v2826_v5, %v3088_v12 }
 0x16b   :  { %v164_v11 = vmul.f32 %v2413_v7, %v151_v6 }
 0x16c   :  { %v2828_v8 = vpop.eup %2827 }
 0x16d   :  { %v2830_v9 = vpop.eup %2829  ;;  %v153_v10 = vmul.f32 %v2828_v8, %v3096_v20  ;;  %v175_v18 = vadd.f32 %v2414_v14, %v164_v11 }
 0x16e   :  { %v155_v15 = vmul.f32 %v2830_v9, %v3090_v13  ;;  %v2420_v13 = vld [vmem:[%s3665_s5] ss:$0 sm:$0xff]  ;;  %s2975_s5 = smov 112  }
 0x16f   :  { %v165_v16 = vmul.f32 %v2413_v7, %v153_v10 }
 0x170   :  { %v2832_v17 = vpop.eup %2831  ;;  %v166_v22 = vmul.f32 %v2413_v7, %v155_v15 }
 0x171   :  { %v176_v19 = vadd.f32 %v2414_v14, %v165_v16  ;;  %v157_v12 = vmul.f32 %v2832_v17, %v3098_v21  ;;  %v2573_v21 = vpop.f32.mrb[0].mxu1 }
 0x172   :  { %v177_v25 = vadd.f32 %v2414_v14, %v166_v22  ;;  %v367_v28 = vadd.f32 %v2573_v21, %v2420_v13  ;;  %v358_v29 = vpop.f32.mrb[1].mxu1 }
 0x173   :  { %v179_v23 = vpack.c.bf16 %v176_v19, %v175_v18  ;;  %v167_v24 = vmul.f32 %v2413_v7, %v157_v12  ;;  %v359_v32 = vadd.f32 %v2420_v13, %v358_v29 }
 0x175   :  { %2563 = vmatprep.mubr.msk.bf16.mxu0 %vm75_vm0, %v179_v23  ;;  %v178_v20 = vadd.f32 %v2414_v14, %v167_v24 }
 0x177   :  { %v180_v26 = vpack.c.bf16 %v178_v20, %v177_v25 }
 0x179   :  { %2564 = vmatmul.mubr.msk.bf16.vlgmr.msra.gmra.mrb[0].mxu0 %vm75_vm0, %v180_v26 }
 0x17a   :  { %2580 = vmatpush3.bf16.msra.mxu0 %v3141_v36  ;;  %2583 = vmatprep.mubr.msk.bf16.mxu0 %vm75_vm0, %v3111_v30  ;;  %v2574_v30 = vpop.f32.mrb[2].mxu1 }
 0x17b   :  { %2581 = vmatprep.subr.bf16.mxu0 %v2814_v27  ;;  %v370_v33 = vadd.f32 %v2574_v30, %v2420_v13  ;;  %v361_v36 = vpop.f32.mrb[3].mxu1 }
 0x17c   :  { %v362_v37 = vadd.f32 %v2420_v13, %v361_v36  ;;  %v2577_v39 = vpop.f32.mrb[4].mxu1 }
 0x17d   :  { %v3175_v38 = vpack.c.bf16 %v370_v33, %v367_v28  ;;  %v383_v40 = vadd.f32 %v2577_v39, %v2420_v13  ;;  %v374_v41 = vpop.f32.mrb[5].mxu1 }
 0x17e   :  { %2582 = vmatpush3.bf16.msra.mxu0 %v2814_v27  ;;  %v375_v42 = vadd.f32 %v2420_v13, %v374_v41  ;;  %v2578_v43 = vpop.f32.mrb[6].mxu1 }
 0x17f   :  { %v386_v44 = vadd.f32 %v2578_v43, %v2420_v13  ;;  %v377_v45 = vpop.f32.mrb[7].mxu1  ;;  %v944_v12 = vsel %vm485_vm9, %v3175_v38, 0 }
 0x180   :  { %v378_v46 = vadd.f32 %v2420_v13, %v377_v45 }
 0x181   :  { %2584 = vmatmul.mubr.msk.bf16.vlgmr.msra.gmra.mrb[4].mxu0 %vm75_vm0, %v3116_v31  ;;  %v389_v31 = vpack.c.bf16 %v362_v37, %v359_v32  ;;  %v3193_v47 = vpack.c.bf16 %v386_v44, %v383_v40 }
 0x182   :  { %2587 = vmatprep.mubr.msk.bf16.mxu0 %vm75_vm0, %v3131_v34  ;;  %v2976_v34 = vmov 0.0   ;;  %v3195_v48 = vpack.c.bf16 %v378_v46, %v375_v42 }
 0x183   :  { %595 = vrot.lane.b32.xlu0 %v389_v31, %s2973_s17  ;;  %2591 = vmatprep.subr.bf16.mxu1 %v2976_v34  ;;  %v1850_v39 = vsel %vm485_vm9, %v3193_v47, 0 }
 0x184   :  { %2597 = vmatprep.subr.bf16.mxu0 %v2976_v34  ;;  %2593 = vmatprep.mubr.msk.bf16.mxu1 %vm2977_vm10, %v2976_v34  ;;  %v1401_v28 = vsel %vm485_vm9, %v3195_v48, 0 }
 0x187   :  { %826 = vrot.lane.b32.xlu0 %v389_v31, %s2974_s8 }
 0x189   :  { %2588 = vmatmul.mubr.msk.bf16.gmra.mrb[8].mxu0 %vm75_vm0, %v3136_v35  ;;  %v490_v35 = vsel %vm485_vm9, %v389_v31, 0 }
 0x18a   :  { %2592 = vmatpush3.bf16.xpose.msra.mxu1 %v490_v35  ;;  %2599 = vmatprep.mubr.msk.bf16.mxu0 %vm2977_vm10, %v2976_v34 }
 0x18b   :  { %1050 = vrot.lane.b32.xlu0 %v3175_v38, %s2973_s17  ;;  %2603 = vmatprep.subr.bf16.mxu1 %v2976_v34 }
 0x18f   :  { %1167 = vrot.lane.b32.xlu0 %v3175_v38, %s2975_s5 }
 0x193   :  { %1283 = vrot.lane.b32.xlu0 %v3175_v38, %s2974_s8 }
 0x197   :  { %1504 = vrot.lane.b32.xlu0 %v3195_v48, %s2973_s17 }
 0x19b   :  { %1619 = vrot.lane.b32.xlu0 %v3195_v48, %s2975_s5 }
 0x19f   :  { %1733 = vrot.lane.b32.xlu0 %v3195_v48, %s2974_s8 }
 0x1a3   :  { %1955 = vrot.lane.b32.xlu0 %v3193_v47, %s2973_s17 }
 0x1a7   :  { %2071 = vrot.lane.b32.xlu0 %v3193_v47, %s2975_s5 }
 0x1ab   :  { %2186 = vrot.lane.b32.xlu0 %v3193_v47, %s2974_s8 }
 0x1f5   :  { %v596_v59 = vpop.permute.xlu0 %595 }
 0x1f6   :  { %v601_v61 = vsel %vm485_vm9, %v596_v59, 0 }
 0x1f9   :  { %v827_v16 = vpop.permute.xlu0 %826 }
 0x1fa   :  { %v832_v18 = vsel %vm485_vm9, %v827_v16, 0 }
 0x1fd   :  { %v1051_v22 = vpop.permute.xlu0 %1050 }
 0x1fe   :  { %v1056_v23 = vsel %vm485_vm9, %v1051_v22, 0 }
 0x201   :  { %v1168_v24 = vpop.permute.xlu0 %1167 }
 0x202   :  { %v1173_v20 = vsel %vm485_vm9, %v1168_v24, 0 }
 0x205   :  { %v1284_v26 = vpop.permute.xlu0 %1283 }
 0x206   :  { %v1289_v13 = vsel %vm485_vm9, %v1284_v26, 0 }
 0x209   :  { %v1505_v29 = vpop.permute.xlu0 %1504 }
 0x20a   :  { %v1510_v32 = vsel %vm485_vm9, %v1505_v29, 0 }
 0x20d   :  { %v1620_v30 = vpop.permute.xlu0 %1619 }
 0x20e   :  { %v1625_v33 = vsel %vm485_vm9, %v1620_v30, 0 }
 0x211   :  { %v1734_v37 = vpop.permute.xlu0 %1733 }
 0x212   :  { %v1739_v38 = vsel %vm485_vm9, %v1734_v37, 0 }
 0x215   :  { %v1956_v40 = vpop.permute.xlu0 %1955 }
 0x216   :  { %v1961_v41 = vsel %vm485_vm9, %v1956_v40, 0 }
 0x219   :  { %v2072_v42 = vpop.permute.xlu0 %2071 }
 0x21a   :  { %v2077_v47 = vsel %vm485_vm9, %v2072_v42, 0 }
 0x24c   :  { %v2565_v49 = vpop.f32.mrb[0].mxu0 }
 0x24d   :  { %v244_v51 = vpop.f32.mrb[1].mxu0  ;;  %v253_v53 = vadd.f32 %v2565_v49, %v2415_v50 }
 0x24e   :  { %v2566_v52 = vpop.f32.mrb[2].mxu0  ;;  %v245_v56 = vadd.f32 %v2415_v50, %v244_v51 }
 0x24f   :  { %v256_v54 = vadd.f32 %v2566_v52, %v2415_v50  ;;  %v247_v55 = vpop.f32.mrb[3].mxu0 }
 0x250   :  { %v248_v57 = vadd.f32 %v2415_v50, %v247_v55  ;;  %v2187_v50 = vpop.permute.xlu0 %2186 }
 0x251   :  { %v3212_v58 = vpack.c.bf16 %v256_v54, %v253_v53  ;;  %v2192_v51 = vsel %vm485_vm9, %v2187_v50, 0 }
 0x252   :  { %v259_v60 = vpack.c.bf16 %v248_v57, %v245_v56 }
 0x253   :  { %v3233_v63 = vrot.slane %v3212_v58, 4 }
 0x254   :  { %592 = vrot.lane.b32.xlu1 %v259_v60, %s2973_s17  ;;  %2594 = vmatmul.mubr.msk.bf16.vlgmr.msra.gmra.mrb[8].mxu1 %vm485_vm9, %v259_v60  ;;  %v939_v62 = vrot.slane %v259_v60, 4  ;;  %v2585_v0 = vpop.f32.mrb[4].mxu0 }
 0x255   :  { %2604 = vmatpush3.bf16.xpose.msra.mxu1 %v601_v61  ;;  %2605 = vmatprep.mubr.msk.bf16.mxu1 %vm2977_vm10, %v2976_v34  ;;  %v459_v2 = vadd.f32 %v2585_v0, %v3240_v1  ;;  %v450_v3 = vpop.f32.mrb[5].mxu0 }
 0x256   :  { %2615 = vmatprep.subr.bf16.mxu1 %v2976_v34  ;;  %v451_v4 = vadd.f32 %v3240_v1, %v450_v3  ;;  %v2586_v5 = vpop.f32.mrb[6].mxu0 }
 0x257   :  { %v462_v6 = vadd.f32 %v2586_v5, %v3240_v1  ;;  %v453_v7 = vpop.f32.mrb[7].mxu0 }
 0x258   :  { %711 = vrot.lane.b32.xlu1 %v389_v31, %s2975_s5  ;;  %v454_v8 = vadd.f32 %v3240_v1, %v453_v7 }
 0x259   :  { %v3248_v9 = vpack.c.bf16 %v462_v6, %v459_v2 }
 0x25a   :  { %v481_v10 = vpack.c.bf16 %v454_v8, %v451_v4 }
 0x25c   :  { %709 = vrot.lane.b32.xlu1 %v259_v60, %s2975_s5  ;;  %771 = vrot.lane.b32.xlu0 %v481_v10, %s2975_s5 }
 0x25d   :  { %2598 = vmatpush3.bf16.msra.mxu0 %v481_v10 }
 0x25e   :  { %2609 = vmatprep.subr.bf16.mxu0 %v2976_v34 }
 0x260   :  { %824 = vrot.lane.b32.xlu1 %v259_v60, %s2974_s8  ;;  %886 = vrot.lane.b32.xlu0 %v481_v10, %s2974_s8 }
 0x264   :  { %1047 = vrot.lane.b32.xlu1 %v939_v62, %s2973_s17 }
 0x268   :  { %1165 = vrot.lane.b32.xlu1 %v939_v62, %s2975_s5 }
 0x26c   :  { %1281 = vrot.lane.b32.xlu1 %v939_v62, %s2974_s8 }
 0x270   :  { %1501 = vrot.lane.b32.xlu1 %v3212_v58, %s2973_s17 }
 0x274   :  { %1617 = vrot.lane.b32.xlu1 %v3212_v58, %s2975_s5 }
 0x278   :  { %1731 = vrot.lane.b32.xlu1 %v3212_v58, %s2974_s8 }
 0x27c   :  { %1952 = vrot.lane.b32.xlu1 %v3233_v63, %s2973_s17 }
 0x280   :  { %2069 = vrot.lane.b32.xlu1 %v3233_v63, %s2975_s5 }
 0x284   :  { %2184 = vrot.lane.b32.xlu1 %v3233_v63, %s2974_s8 }
 0x288   :  { %656 = vrot.lane.b32.xlu1 %v481_v10, %s2973_s17 }
 0x2c6   :  { %v593_v11 = vpop.permute.xlu1 %592 }
 0x2c7   :  { %2606 = vmatmul.mubr.msk.bf16.vlgmr.msra.gmra.mrb[12].mxu1 %vm485_vm9, %v593_v11 }
 0x2c8   :  { %2617 = vmatprep.mubr.msk.bf16.mxu1 %vm2977_vm10, %v2976_v34 }
 0x2ca   :  { %v712_v14 = vpop.permute.xlu1 %711 }
 0x2cb   :  { %v717_v15 = vsel %vm485_vm9, %v712_v14, 0 }
 0x2cc   :  { %2616 = vmatpush3.bf16.xpose.msra.mxu1 %v717_v15 }
 0x2cd   :  { %2627 = vmatprep.subr.bf16.mxu1 %v2976_v34 }
 0x2ce   :  { %v710_v17 = vpop.permute.xlu1 %709 }
 0x2d2   :  { %v825_v19 = vpop.permute.xlu1 %824 }
 0x2d3   :  { %2618 = vmatmul.mubr.msk.bf16.vlgmr.msra.gmra.mrb[16].mxu1 %vm485_vm9, %v710_v17 }
 0x2d4   :  { %2628 = vmatpush3.bf16.xpose.msra.mxu1 %v832_v18  ;;  %2629 = vmatprep.mubr.msk.bf16.mxu1 %vm2977_vm10, %v2976_v34 }
 0x2d5   :  { %2639 = vmatprep.subr.bf16.mxu1 %v2976_v34 }
 0x2d6   :  { %v1048_v25 = vpop.permute.xlu1 %1047 }
 0x2da   :  { %v1166_v27 = vpop.permute.xlu1 %1165 }
 0x2db   :  { %2630 = vmatmul.mubr.msk.bf16.vlgmr.msra.gmra.mrb[20].mxu1 %vm485_vm9, %v825_v19 }
 0x2dc   :  { %2640 = vmatpush3.bf16.xpose.msra.mxu1 %v944_v12  ;;  %2641 = vmatprep.mubr.msk.bf16.mxu1 %vm2977_vm10, %v2976_v34 }
 0x2dd   :  { %2651 = vmatprep.subr.bf16.mxu1 %v2976_v34 }
 0x2de   :  { %v1282_v21 = vpop.permute.xlu1 %1281 }
 0x2e2   :  { %v1502_v36 = vpop.permute.xlu1 %1501 }
 0x2e3   :  { %2642 = vmatmul.mubr.msk.bf16.vlgmr.msra.gmra.mrb[24].mxu1 %vm485_vm9, %v939_v62 }
 0x2e4   :  { %2652 = vmatpush3.bf16.xpose.msra.mxu1 %v1056_v23  ;;  %2653 = vmatprep.mubr.msk.bf16.mxu1 %vm2977_vm10, %v2976_v34 }
 0x2e5   :  { %2663 = vmatprep.subr.bf16.mxu1 %v2976_v34 }
 0x2e6   :  { %v1618_v31 = vpop.permute.xlu1 %1617 }
 0x2ea   :  { %v1732_v35 = vpop.permute.xlu1 %1731 }
 0x2eb   :  { %2654 = vmatmul.mubr.msk.bf16.vlgmr.msra.gmra.mrb[28].mxu1 %vm485_vm9, %v1048_v25 }
 0x2ec   :  { %2664 = vmatpush3.bf16.xpose.msra.mxu1 %v1173_v20  ;;  %2665 = vmatprep.mubr.msk.bf16.mxu1 %vm2977_vm10, %v2976_v34  ;;  %v3361_v20 = vpop.permute.xlu0 %771 }
 0x2ed   :  { %2675 = vmatprep.subr.bf16.mxu1 %v2976_v34 }
 0x2ee   :  { %v1953_v48 = vpop.permute.xlu1 %1952 }
 0x2f2   :  { %v2070_v52 = vpop.permute.xlu1 %2069 }
 0x2f3   :  { %2666 = vmatmul.mubr.msk.bf16.vlgmr.msra.gmra.mrb[32].mxu1 %vm485_vm9, %v1166_v27 }
 0x2f4   :  { %2676 = vmatpush3.bf16.xpose.msra.mxu1 %v1289_v13  ;;  %2677 = vmatprep.mubr.msk.bf16.mxu1 %vm2977_vm10, %v2976_v34  ;;  %v3365_v13 = vpop.permute.xlu0 %886 }
 0x2f5   :  { %2687 = vmatprep.subr.bf16.mxu1 %v2976_v34 }
 0x2f6   :  { %v2185_v53 = vpop.permute.xlu1 %2184 }
 0x2fb   :  { %2678 = vmatmul.mubr.msk.bf16.vlgmr.msra.gmra.mrb[36].mxu1 %vm485_vm9, %v1282_v21 }
 0x2fc   :  { %2688 = vmatpush3.bf16.xpose.msra.mxu1 %v1401_v28  ;;  %2689 = vmatprep.mubr.msk.bf16.mxu1 %vm2977_vm10, %v2976_v34 }
 0x2fd   :  { %2699 = vmatprep.subr.bf16.mxu1 %v2976_v34 }
 0x303   :  { %2690 = vmatmul.mubr.msk.bf16.vlgmr.msra.gmra.mrb[40].mxu1 %vm485_vm9, %v3212_v58 }
 0x304   :  { %2700 = vmatpush3.bf16.xpose.msra.mxu1 %v1510_v32  ;;  %2701 = vmatprep.mubr.msk.bf16.mxu1 %vm2977_vm10, %v2976_v34 }
 0x305   :  { %2711 = vmatprep.subr.bf16.mxu1 %v2976_v34 }
 0x30b   :  { %2702 = vmatmul.mubr.msk.bf16.vlgmr.msra.gmra.mrb[44].mxu1 %vm485_vm9, %v1502_v36  ;;  %v2589_v36 = vpop.f32.mrb[8].mxu0 }
 0x30c   :  { %2712 = vmatpush3.bf16.xpose.msra.mxu1 %v1625_v33  ;;  %2713 = vmatprep.mubr.msk.bf16.mxu1 %vm2977_vm10, %v2976_v34 }
 0x30d   :  { %2723 = vmatprep.subr.bf16.mxu1 %v2976_v34 }
 0x313   :  { %2714 = vmatmul.mubr.msk.bf16.vlgmr.msra.gmra.mrb[48].mxu1 %vm485_vm9, %v1618_v31  ;;  %v475_v31 = vadd.f32 %v2589_v36, %v3240_v1 }
 0x314   :  { %2724 = vmatpush3.bf16.xpose.msra.mxu1 %v1739_v38  ;;  %2725 = vmatprep.mubr.msk.bf16.mxu1 %vm2977_vm10, %v2976_v34 }
 0x315   :  { %2735 = vmatprep.subr.bf16.mxu1 %v2976_v34 }
 0x31b   :  { %2726 = vmatmul.mubr.msk.bf16.vlgmr.msra.gmra.mrb[52].mxu1 %vm485_vm9, %v1732_v35  ;;  %v466_v35 = vpop.f32.mrb[9].mxu0 }
 0x31c   :  { %2736 = vmatpush3.bf16.xpose.msra.mxu1 %v1850_v39  ;;  %2737 = vmatprep.mubr.msk.bf16.mxu1 %vm2977_vm10, %v2976_v34  ;;  %v467_v40 = vadd.f32 %v3240_v1, %v466_v35 }
 0x31d   :  { %2747 = vmatprep.subr.bf16.mxu1 %v2976_v34 }
 0x323   :  { %2738 = vmatmul.mubr.msk.bf16.vlgmr.msra.gmra.mrb[56].mxu1 %vm485_vm9, %v3233_v63 }
 0x324   :  { %2748 = vmatpush3.bf16.xpose.msra.mxu1 %v1961_v41  ;;  %2749 = vmatprep.mubr.msk.bf16.mxu1 %vm2977_vm10, %v2976_v34  ;;  %v2590_v41 = vpop.f32.mrb[10].mxu0 }
 0x325   :  { %2759 = vmatprep.subr.bf16.mxu1 %v2976_v34 }
 0x327   :  { %v3321_v43 = vpop.f32.mrb[8].mxu1 }
 0x328   :  { %v2595_v44 = vpop.f32.mrb[9].mxu1  ;;  %v533_v45 = vsel %vm532_vm11, %v3321_v43, -inf }
 0x329   :  { %534 = vmax.xlane.f32.xlu0 %v533_v45  ;;  %v529_v46 = vpop.f32.mrb[10].mxu1  ;;  %v478_v44 = vadd.f32 %v2590_v41, %v3240_v1  ;;  %v469_v45 = vpop.f32.mrb[11].mxu0 }
 0x32a   :  { %v2596_v49 = vpop.f32.mrb[11].mxu1  ;;  %v470_v46 = vadd.f32 %v3240_v1, %v469_v45 }
 0x32b   :  { %2750 = vmatmul.mubr.msk.bf16.vlgmr.msra.gmra.mrb[60].mxu1 %vm485_vm9, %v1953_v48  ;;  %v3376_v48 = vpack.c.bf16 %v478_v44, %v475_v31 }
 0x32c   :  { %2760 = vmatpush3.bf16.xpose.msra.mxu1 %v2077_v47  ;;  %2761 = vmatprep.mubr.msk.bf16.mxu1 %vm2977_vm10, %v2976_v34  ;;  %v3378_v49 = vpack.c.bf16 %v470_v46, %v467_v40 }
 0x32d   :  { %2771 = vmatprep.subr.bf16.mxu1 %v2976_v34 }
 0x333   :  { %2762 = vmatmul.mubr.msk.bf16.vlgmr.msra.gmra.mrb[64].mxu1 %vm485_vm9, %v2070_v52 }
 0x334   :  { %2772 = vmatpush3.bf16.xpose.msra.mxu1 %v2192_v51  ;;  %2773 = vmatprep.mubr.msk.bf16.mxu1 %vm2977_vm10, %v2976_v34 }
 0x33b   :  { %2774 = vmatmul.mubr.msk.bf16.vlgmr.msra.gmra.mrb[68].mxu1 %vm485_vm9, %v2185_v53 }
 0x39a   :  { %v3335_v54 = vpop.f32.mrb[12].mxu1 }
 0x39b   :  { %v2607_v55 = vpop.f32.mrb[13].mxu1  ;;  %v643_v56 = vsel %vm532_vm11, %v3335_v54, -inf }
 0x39c   :  { %644 = vmax.xlane.f32.xlu1 %v643_v56  ;;  %v640_v57 = vpop.f32.mrb[14].mxu1 }
 0x39d   :  { %v2608_v58 = vpop.f32.mrb[15].mxu1 }
 0x3a6   :  { %v3339_v59 = vpop.f32.mrb[16].mxu1 }
 0x3a7   :  { %v2619_v60 = vpop.f32.mrb[17].mxu1  ;;  %v759_v61 = vsel %vm532_vm11, %v3339_v59, -inf }
 0x3a8   :  { %760 = vmax.xlane.f32.xlu0 %v759_v61  ;;  %v756_v62 = vpop.f32.mrb[18].mxu1 }
 0x3a9   :  { %v2620_v63 = vpop.f32.mrb[19].mxu1 }
 0x3ae   :  { %v3343_v0 = vpop.f32.mrb[20].mxu1 }
 0x3af   :  { %v2631_v2 = vpop.f32.mrb[21].mxu1  ;;  %v874_v3 = vsel %vm532_vm11, %v3343_v0, -inf }
 0x3b0   :  { %875 = vmax.xlane.f32.xlu0 %v874_v3  ;;  %v871_v4 = vpop.f32.mrb[22].mxu1 }
 0x3b1   :  { %v2632_v5 = vpop.f32.mrb[23].mxu1 }
 0x3b6   :  { %v3347_v6 = vpop.f32.mrb[24].mxu1  ;;  %v535_v30 = vpop.xlane.xlu0 %534 }
 0x3b7   :  { %v2643_v7 = vpop.f32.mrb[25].mxu1  ;;  %v986_v8 = vsel %vm532_vm11, %v3347_v6, -inf  ;;  %v536_v37 = vsub.f32 %v3321_v43, %v535_v30 }
 0x3b8   :  { %987 = vmax.xlane.f32.xlu0 %v986_v8  ;;  %v983_v10 = vpop.f32.mrb[26].mxu1 }
 0x3b9   :  { %v2644_v11 = vpop.f32.mrb[27].mxu1  ;;  %v537_v47 = vmul.f32 1.442695, %v536_v37 }
 0x3bb   :  { %2833 = vpow2.f32 %v537_v47 }
 0x3be   :  { %v3351_v14 = vpop.f32.mrb[28].mxu1 }
 0x3bf   :  { %v2655_v15 = vpop.f32.mrb[29].mxu1  ;;  %v1098_v16 = vsel %vm532_vm11, %v3351_v14, -inf }
 0x3c0   :  { %1099 = vmax.xlane.f32.xlu1 %v1098_v16  ;;  %v1095_v17 = vpop.f32.mrb[30].mxu1 }
 0x3c1   :  { %v2656_v18 = vpop.f32.mrb[31].mxu1 }
 0x3c5   :  { %v3386_v1 = vpop.eup %2833 }
 0x3c6   :  { %v3355_v19 = vpop.f32.mrb[32].mxu1  ;;  %v539_v60 = vsel %vm532_vm11, %v3386_v1, 0.0 }
 0x3c7   :  { %v2667_v12 = vpop.f32.mrb[33].mxu1  ;;  %v1215_v53 = vsel %vm532_vm11, %v3355_v19, -inf }
 0x3c8   :  { %v1212_v22 = vpop.f32.mrb[34].mxu1 }
 0x3c9   :  { %v2668_v23 = vpop.f32.mrb[35].mxu1 }
 0x3ce   :  { %1227 = vrot.lane.b32.xlu0 %v3248_v9, %s2975_s5  ;;  %v3359_v24 = vpop.f32.mrb[36].mxu1 }
 0x3cf   :  { %v2679_v25 = vpop.f32.mrb[37].mxu1  ;;  %v1331_v2 = vsel %vm532_vm11, %v3359_v24, -inf }
 0x3d0   :  { %v1328_v26 = vpop.f32.mrb[38].mxu1 }
 0x3d1   :  { %1111 = vrot.lane.b32.xlu1 %v3248_v9, %s2973_s17  ;;  %v2680_v27 = vpop.f32.mrb[39].mxu1  ;;  %v3406_v26 = vpop.permute.xlu1 %656 }
 0x3d6   :  { %v3367_v21 = vpop.f32.mrb[40].mxu1 }
 0x3d7   :  { %v2691_v28 = vpop.f32.mrb[41].mxu1  ;;  %v1443_v25 = vsel %vm532_vm11, %v3367_v21, -inf }
 0x3d8   :  { %v1440_v29 = vpop.f32.mrb[42].mxu1 }
 0x3d9   :  { %v2692_v32 = vpop.f32.mrb[43].mxu1 }
 0x3de   :  { %v3369_v33 = vpop.f32.mrb[44].mxu1 }
 0x3df   :  { %v2703_v38 = vpop.f32.mrb[45].mxu1  ;;  %v1552_v4 = vsel %vm532_vm11, %v3369_v33, -inf }
 0x3e0   :  { %v1549_v39 = vpop.f32.mrb[46].mxu1 }
 0x3e1   :  { %v2704_v42 = vpop.f32.mrb[47].mxu1 }
 0x3e6   :  { %v3380_v43 = vpop.f32.mrb[48].mxu1 }
 0x3e7   :  { %v2715_v50 = vpop.f32.mrb[49].mxu1  ;;  %v1667_v27 = vsel %vm532_vm11, %v3380_v43, -inf }
 0x3e8   :  { %v1664_v51 = vpop.f32.mrb[50].mxu1 }
 0x3e9   :  { %v2716_v52 = vpop.f32.mrb[51].mxu1 }
 0x3ed   :  { %1216 = vmax.xlane.f32.xlu0 %v1215_v53 }
 0x3ee   :  { %v3384_v55 = vpop.f32.mrb[52].mxu1 }
 0x3ef   :  { %v2727_v56 = vpop.f32.mrb[53].mxu1  ;;  %v1781_v29 = vsel %vm532_vm11, %v3384_v55, -inf }
 0x3f0   :  { %v1778_v57 = vpop.f32.mrb[54].mxu1 }
 0x3f1   :  { %v2728_v58 = vpop.f32.mrb[55].mxu1 }
 0x3f5   :  { %540 = vadd.xlane.f32.xlu1 %v539_v60 }
 0x3f6   :  { %v3390_v61 = vpop.f32.mrb[56].mxu1 }
 0x3f7   :  { %v2739_v62 = vpop.f32.mrb[57].mxu1  ;;  %v1892_v36 = vsel %vm532_vm11, %v3390_v61, -inf }
 0x3f8   :  { %v1889_v63 = vpop.f32.mrb[58].mxu1 }
 0x3f9   :  { %v2740_v3 = vpop.f32.mrb[59].mxu1  ;;  %1332 = vmax.xlane.f32.xlu1 %v1331_v2 }
 0x3fd   :  { %1553 = vmax.xlane.f32.xlu1 %v1552_v4 }
 0x3fe   :  { %v3396_v5 = vpop.f32.mrb[60].mxu1 }
 0x3ff   :  { %v2751_v7 = vpop.f32.mrb[61].mxu1  ;;  %v2003_v37 = vsel %vm532_vm11, %v3396_v5, -inf }
 0x400   :  { %v2000_v8 = vpop.f32.mrb[62].mxu1 }
 0x401   :  { %v2752_v10 = vpop.f32.mrb[63].mxu1 }
 0x403   :  { %1343 = vrot.lane.b32.xlu0 %v3248_v9, %s2974_s8 }
 0x406   :  { %v3400_v11 = vpop.f32.mrb[64].mxu1 }
 0x407   :  { %v2763_v15 = vpop.f32.mrb[65].mxu1  ;;  %v2119_v31 = vsel %vm532_vm11, %v3400_v11, -inf }
 0x408   :  { %v2116_v16 = vpop.f32.mrb[66].mxu1 }
 0x409   :  { %v2764_v17 = vpop.f32.mrb[67].mxu1 }
 0x40e   :  { %v3402_v18 = vpop.f32.mrb[68].mxu1 }
 0x40f   :  { %v2775_v12 = vpop.f32.mrb[69].mxu1  ;;  %v2234_v40 = vsel %vm532_vm11, %v3402_v18, -inf }
 0x410   :  { %v2231_v22 = vpop.f32.mrb[70].mxu1 }
 0x411   :  { %v2776_v23 = vpop.f32.mrb[71].mxu1 }
 0x422   :  { %1444 = vmax.xlane.f32.xlu0 %v1443_v25 }
 0x426   :  { %1668 = vmax.xlane.f32.xlu0 %v1667_v27 }
 0x429   :  { %v645_v28 = vpop.xlane.xlu1 %644 }
 0x42a   :  { %v646_v32 = vsub.f32 %v3335_v54, %v645_v28  ;;  %1782 = vmax.xlane.f32.xlu0 %v1781_v29 }
 0x42c   :  { %v647_v30 = vmul.f32 1.442695, %v646_v32 }
 0x42e   :  { %2835 = vpow2.f32 %v647_v30  ;;  %1893 = vmax.xlane.f32.xlu0 %v1892_v36 }
 0x432   :  { %2004 = vmax.xlane.f32.xlu0 %v2003_v37 }
 0x435   :  { %v761_v38 = vpop.xlane.xlu0 %760 }
 0x436   :  { %v762_v35 = vsub.f32 %v3339_v59, %v761_v38  ;;  %2120 = vmax.xlane.f32.xlu0 %v2119_v31 }
 0x438   :  { %v3420_v39 = vpop.eup %2835  ;;  %v763_v54 = vmul.f32 1.442695, %v762_v35 }
 0x439   :  { %v649_v41 = vsel %vm532_vm11, %v3420_v39, 0.0 }
 0x43a   :  { %2837 = vpow2.f32 %v763_v54  ;;  %2235 = vmax.xlane.f32.xlu0 %v2234_v40  ;;  %650 = vadd.xlane.f32.xlu1 %v649_v41 }
 0x43d   :  { %v876_v42 = vpop.xlane.xlu0 %875 }
 0x43e   :  { %v877_v44 = vsub.f32 %v3343_v0, %v876_v42 }
 0x440   :  { %v878_v45 = vmul.f32 1.442695, %v877_v44 }
 0x442   :  { %2839 = vpow2.f32 %v878_v45 }
 0x444   :  { %v3427_v46 = vpop.eup %2837 }
 0x445   :  { %v988_v59 = vpop.xlane.xlu0 %987  ;;  %v765_v47 = vsel %vm532_vm11, %v3427_v46, 0.0 }
 0x446   :  { %v989_v50 = vsub.f32 %v3347_v6, %v988_v59  ;;  %766 = vadd.xlane.f32.xlu1 %v765_v47 }
 0x448   :  { %v990_v51 = vmul.f32 1.442695, %v989_v50 }
 0x44a   :  { %2841 = vpow2.f32 %v990_v51 }
 0x44c   :  { %v3432_v52 = vpop.eup %2839 }
 0x44d   :  { %v1100_v53 = vpop.xlane.xlu1 %1099  ;;  %v880_v56 = vsel %vm532_vm11, %v3432_v52, 0.0 }
 0x44e   :  { %v1101_v0 = vsub.f32 %v3351_v14, %v1100_v53  ;;  %881 = vadd.xlane.f32.xlu1 %v880_v56  ;;  %v3449_v14 = vpop.permute.xlu0 %1227 }
 0x450   :  { %v1102_v57 = vmul.f32 1.442695, %v1101_v0 }
 0x451   :  { %v3452_v4 = vpop.permute.xlu1 %1111 }
 0x452   :  { %2843 = vpow2.f32 %v1102_v57 }
 0x454   :  { %v3437_v58 = vpop.eup %2841 }
 0x455   :  { %v992_v60 = vsel %vm532_vm11, %v3437_v58, 0.0 }
 0x456   :  { %993 = vadd.xlane.f32.xlu1 %v992_v60 }
 0x45c   :  { %v3441_v6 = vpop.eup %2843 }
 0x45d   :  { %v1104_v62 = vsel %vm532_vm11, %v3441_v6, 0.0 }
 0x45e   :  { %1105 = vadd.xlane.f32.xlu0 %v1104_v62 }
 0x467   :  { %1565 = vrot.lane.b32.xlu1 %v3378_v49, %s2973_s17 }
 0x474   :  { %1679 = vrot.lane.b32.xlu0 %v3378_v49, %s2975_s5 }
 0x47a   :  { %v1217_v63 = vpop.xlane.xlu0 %1216 }
 0x47b   :  { %v1218_v2 = vsub.f32 %v3355_v19, %v1217_v63 }
 0x47d   :  { %v1219_v3 = vmul.f32 1.442695, %v1218_v2 }
 0x47e   :  { %v3474_v29 = vpop.permute.xlu0 %1343 }
 0x47f   :  { %2845 = vpow2.f32 %v1219_v3 }
 0x482   :  { %v541_v7 = vpop.xlane.xlu1 %540 }
 0x483   :  { %2847 = vrcp.f32 %v541_v7 }
 0x486   :  { %v1333_v8 = vpop.xlane.xlu1 %1332 }
 0x487   :  { %v1334_v10 = vsub.f32 %v3359_v24, %v1333_v8 }
 0x489   :  { %v3455_v15 = vpop.eup %2845  ;;  %v1335_v16 = vmul.f32 1.442695, %v1334_v10 }
 0x48a   :  { %v1554_v17 = vpop.xlane.xlu1 %1553  ;;  %v1221_v12 = vsel %vm532_vm11, %v3455_v15, 0.0 }
 0x48b   :  { %2849 = vpow2.f32 %v1335_v16  ;;  %v1555_v22 = vsub.f32 %v3369_v33, %v1554_v17  ;;  %1222 = vadd.xlane.f32.xlu1 %v1221_v12 }
 0x48d   :  { %v2848_v19 = vpop.eup %2847  ;;  %v1556_v23 = vmul.f32 1.442695, %v1555_v22 }
 0x48e   :  { %v543_v25 = vmul.f32 %v2848_v19, %v3386_v1 }
 0x48f   :  { %2851 = vpow2.f32 %v1556_v23 }
 0x490   :  { %v544_v27 = vpack.c.bf16 %v543_v25, %v543_v25 }
 0x492   :  { %2600 = vmatmul.mubr.msk.bf16.vlgmr.msra.gmra.mrb[12].mxu0 %vm532_vm11, %v544_v27 }
 0x493   :  { %2610 = vmatpush3.bf16.msra.mxu0 %v3406_v26  ;;  %2611 = vmatprep.mubr.msk.bf16.mxu0 %vm2977_vm10, %v2976_v34 }
 0x494   :  { %2621 = vmatprep.subr.bf16.mxu0 %v2976_v34 }
 0x495   :  { %v3466_v24 = vpop.eup %2849 }
 0x496   :  { %v1337_v33 = vsel %vm532_vm11, %v3466_v24, 0.0 }
 0x497   :  { %1338 = vadd.xlane.f32.xlu0 %v1337_v33 }
 0x499   :  { %v3470_v28 = vpop.eup %2851 }
 0x49a   :  { %v1558_v1 = vsel %vm532_vm11, %v3470_v28, 0.0 }
 0x49b   :  { %1559 = vadd.xlane.f32.xlu0 %v1558_v1 }
 0x4af   :  { %v1445_v26 = vpop.xlane.xlu0 %1444 }
 0x4b0   :  { %v1446_v32 = vsub.f32 %v3367_v21, %v1445_v26 }
 0x4b2   :  { %v1447_v30 = vmul.f32 1.442695, %v1446_v32 }
 0x4b3   :  { %v1669_v36 = vpop.xlane.xlu0 %1668 }
 0x4b4   :  { %2853 = vpow2.f32 %v1447_v30  ;;  %v1670_v37 = vsub.f32 %v3380_v43, %v1669_v36 }
 0x4b6   :  { %v1671_v38 = vmul.f32 1.442695, %v1670_v37 }
 0x4b7   :  { %v1783_v31 = vpop.xlane.xlu0 %1782 }
 0x4b8   :  { %2855 = vpow2.f32 %v1671_v38  ;;  %v1784_v35 = vsub.f32 %v3384_v55, %v1783_v31 }
 0x4ba   :  { %v1785_v54 = vmul.f32 1.442695, %v1784_v35 }
 0x4bb   :  { %v1894_v40 = vpop.xlane.xlu0 %1893 }
 0x4bc   :  { %2857 = vpow2.f32 %v1785_v54  ;;  %v1895_v41 = vsub.f32 %v3390_v61, %v1894_v40 }
 0x4be   :  { %v3480_v42 = vpop.eup %2853  ;;  %v1896_v44 = vmul.f32 1.442695, %v1895_v41 }
 0x4bf   :  { %v2005_v45 = vpop.xlane.xlu0 %2004  ;;  %v1449_v21 = vsel %vm532_vm11, %v3480_v42, 0.0 }
 0x4c0   :  { %2859 = vpow2.f32 %v1896_v44  ;;  %v2006_v43 = vsub.f32 %v3396_v5, %v2005_v45  ;;  %1450 = vadd.xlane.f32.xlu1 %v1449_v21 }
 0x4c2   :  { %v3485_v59 = vpop.eup %2855  ;;  %v2007_v47 = vmul.f32 1.442695, %v2006_v43 }
 0x4c3   :  { %v1673_v55 = vsel %vm532_vm11, %v3485_v59, 0.0 }
 0x4c4   :  { %2861 = vpow2.f32 %v2007_v47  ;;  %1674 = vadd.xlane.f32.xlu1 %v1673_v55 }
 0x4c6   :  { %v3489_v61 = vpop.eup %2857 }
 0x4c7   :  { %v651_v50 = vpop.xlane.xlu1 %650  ;;  %v1787_v51 = vsel %vm532_vm11, %v3489_v61, 0.0 }
 0x4c8   :  { %1788 = vadd.xlane.f32.xlu0 %v1787_v51  ;;  %2863 = vrcp.f32 %v651_v50 }
 0x4ca   :  { %v3493_v53 = vpop.eup %2859 }
 0x4cb   :  { %v1898_v5 = vsel %vm532_vm11, %v3493_v53, 0.0 }
 0x4cc   :  { %1899 = vadd.xlane.f32.xlu1 %v1898_v5 }
 0x4ce   :  { %v3497_v56 = vpop.eup %2861 }
 0x4cf   :  { %v2009_v0 = vsel %vm532_vm11, %v3497_v56, 0.0 }
 0x4d0   :  { %2010 = vadd.xlane.f32.xlu0 %v2009_v0 }
 0x4d2   :  { %v2864_v57 = vpop.eup %2863 }
 0x4d3   :  { %v767_v60 = vpop.xlane.xlu1 %766  ;;  %v653_v62 = vmul.f32 %v2864_v57, %v3420_v39  ;;  %v2121_v39 = vpop.xlane.xlu0 %2120 }
 0x4d4   :  { %2865 = vrcp.f32 %v767_v60  ;;  %v2122_v12 = vsub.f32 %v3400_v11, %v2121_v39 }
 0x4d5   :  { %v654_v63 = vpack.c.bf16 %v653_v62, %v653_v62 }
 0x4d6   :  { %v2123_v19 = vmul.f32 1.442695, %v2122_v12 }
 0x4d7   :  { %2612 = vmatmul.mubr.msk.bf16.vlgmr.msra.gmra.mrb[16].mxu0 %vm532_vm11, %v654_v63  ;;  %v2236_v16 = vpop.xlane.xlu0 %2235 }
 0x4d8   :  { %2622 = vmatpush3.bf16.msra.mxu0 %v3361_v20  ;;  %2623 = vmatprep.mubr.msk.bf16.mxu0 %vm2977_vm10, %v2976_v34  ;;  %v2237_v23 = vsub.f32 %v3402_v18, %v2236_v16 }
 0x4d9   :  { %2633 = vmatprep.subr.bf16.mxu0 %v2976_v34 }
 0x4da   :  { %v2238_v11 = vmul.f32 1.442695, %v2237_v23 }
 0x4db   :  { %v882_v2 = vpop.xlane.xlu1 %881 }
 0x4dc   :  { %2867 = vrcp.f32 %v882_v2 }
 0x4dd   :  { %2016 = vrot.lane.b32.xlu1 %v3376_v48, %s2973_s17 }
 0x4de   :  { %v2866_v3 = vpop.eup %2865 }
 0x4df   :  { %v769_v7 = vmul.f32 %v2866_v3, %v3427_v46 }
 0x4e1   :  { %v770_v8 = vpack.c.bf16 %v769_v7, %v769_v7 }
 0x4e3   :  { %2624 = vmatmul.mubr.msk.bf16.vlgmr.msra.gmra.mrb[20].mxu0 %vm532_vm11, %v770_v8  ;;  %v994_v10 = vpop.xlane.xlu1 %993 }
 0x4e4   :  { %2634 = vmatpush3.bf16.msra.mxu0 %v3365_v13  ;;  %2869 = vrcp.f32 %v994_v10  ;;  %2635 = vmatprep.mubr.msk.bf16.mxu0 %vm2977_vm10, %v2976_v34 }
 0x4e5   :  { %2645 = vmatprep.subr.bf16.mxu0 %v2976_v34 }
 0x4e6   :  { %v2868_v20 = vpop.eup %2867  ;;  %1793 = vrot.lane.b32.xlu0 %v3378_v49, %s2974_s8 }
 0x4e7   :  { %v884_v46 = vmul.f32 %v2868_v20, %v3432_v52 }
 0x4e9   :  { %v885_v17 = vpack.c.bf16 %v884_v46, %v884_v46 }
 0x4eb   :  { %2636 = vmatmul.mubr.msk.bf16.vlgmr.msra.gmra.mrb[24].mxu0 %vm532_vm11, %v885_v17  ;;  %v1106_v22 = vpop.xlane.xlu0 %1105 }
 0x4ec   :  { %2646 = vmatpush3.bf16.msra.mxu0 %v3248_v9  ;;  %2871 = vrcp.f32 %v1106_v22  ;;  %2647 = vmatprep.mubr.msk.bf16.mxu0 %vm2977_vm10, %v2976_v34 }
 0x4ed   :  { %2657 = vmatprep.subr.bf16.mxu0 %v2976_v34  ;;  %2873 = vpow2.f32 %v2123_v19 }
 0x4ee   :  { %v2870_v13 = vpop.eup %2869  ;;  %2875 = vpow2.f32 %v2238_v11 }
 0x4ef   :  { %v996_v52 = vmul.f32 %v2870_v13, %v3437_v58  ;;  %v1680_v26 = vpop.permute.xlu0 %1679 }
 0x4f1   :  { %v997_v25 = vpack.c.bf16 %v996_v52, %v996_v52 }
 0x4f3   :  { %2648 = vmatmul.mubr.msk.bf16.vlgmr.msra.gmra.mrb[28].mxu0 %vm532_vm11, %v997_v25 }
 0x4f4   :  { %2658 = vmatpush3.bf16.msra.mxu0 %v3452_v4  ;;  %2659 = vmatprep.mubr.msk.bf16.mxu0 %vm2977_vm10, %v2976_v34 }
 0x4f5   :  { %2669 = vmatprep.subr.bf16.mxu0 %v2976_v34 }
 0x4f6   :  { %v2872_v9 = vpop.eup %2871 }
 0x4f7   :  { %v1108_v27 = vmul.f32 %v2872_v9, %v3441_v6  ;;  %v3536_v18 = vpop.eup %2873 }
 0x4f8   :  { %v2125_v58 = vsel %vm532_vm11, %v3536_v18, 0.0  ;;  %v3541_v4 = vpop.eup %2875 }
 0x4f9   :  { %v1109_v33 = vpack.c.bf16 %v1108_v27, %v1108_v27  ;;  %v2240_v6 = vsel %vm532_vm11, %v3541_v4, 0.0 }
 0x4fb   :  { %2660 = vmatmul.mubr.msk.bf16.vlgmr.msra.gmra.mrb[32].mxu0 %vm532_vm11, %v1109_v33 }
 0x4fc   :  { %2670 = vmatpush3.bf16.msra.mxu0 %v3449_v14  ;;  %2671 = vmatprep.mubr.msk.bf16.mxu0 %vm2977_vm10, %v2976_v34  ;;  %v1566_v14 = vpop.permute.xlu1 %1565 }
 0x4fd   :  { %2681 = vmatprep.subr.bf16.mxu0 %v2976_v34 }
 0x501   :  { %2126 = vadd.xlane.f32.xlu1 %v2125_v58 }
 0x505   :  { %2241 = vadd.xlane.f32.xlu0 %v2240_v6 }
 0x512   :  { %2131 = vrot.lane.b32.xlu1 %v3376_v48, %s2975_s5 }
 0x518   :  { %v1223_v1 = vpop.xlane.xlu1 %1222 }
 0x519   :  { %2877 = vrcp.f32 %v1223_v1 }
 0x51b   :  { %2246 = vrot.lane.b32.xlu0 %v3376_v48, %s2974_s8 }
 0x523   :  { %v2878_v32 = vpop.eup %2877 }
 0x524   :  { %v1225_v30 = vmul.f32 %v2878_v32, %v3455_v15  ;;  %v1339_v36 = vpop.xlane.xlu0 %1338 }
 0x525   :  { %2879 = vrcp.f32 %v1339_v36 }
 0x526   :  { %v1226_v37 = vpack.c.bf16 %v1225_v30, %v1225_v30 }
 0x528   :  { %2672 = vmatmul.mubr.msk.bf16.vlgmr.msra.gmra.mrb[36].mxu0 %vm532_vm11, %v1226_v37 }
 0x529   :  { %2682 = vmatpush3.bf16.msra.mxu0 %v3474_v29  ;;  %2683 = vmatprep.mubr.msk.bf16.mxu0 %vm2977_vm10, %v2976_v34  ;;  %v1560_v29 = vpop.xlane.xlu0 %1559 }
 0x52a   :  { %2693 = vmatprep.subr.bf16.mxu0 %v2976_v34 }
 0x52f   :  { %v2880_v38 = vpop.eup %2879 }
 0x530   :  { %v1341_v31 = vmul.f32 %v2880_v38, %v3466_v24 }
 0x532   :  { %v1342_v35 = vpack.c.bf16 %v1341_v31, %v1341_v31 }
 0x534   :  { %2684 = vmatmul.mubr.msk.bf16.vlgmr.msra.gmra.mrb[40].mxu0 %vm532_vm11, %v1342_v35 }
 0x535   :  { %2694 = vmatpush3.bf16.msra.mxu0 %v3378_v49  ;;  %2695 = vmatprep.mubr.msk.bf16.mxu0 %vm2977_vm10, %v2976_v34 }
 0x536   :  { %2705 = vmatprep.subr.bf16.mxu0 %v2976_v34 }
 0x54d   :  { %v1451_v15 = vpop.xlane.xlu1 %1450 }
 0x54e   :  { %2881 = vrcp.f32 %v1451_v15 }
 0x54f   :  { %2883 = vrcp.f32 %v1560_v29 }
 0x551   :  { %v1675_v54 = vpop.xlane.xlu1 %1674 }
 0x552   :  { %2885 = vrcp.f32 %v1675_v54 }
 0x555   :  { %v1789_v45 = vpop.xlane.xlu0 %1788 }
 0x556   :  { %2887 = vrcp.f32 %v1789_v45 }
 0x558   :  { %v2882_v40 = vpop.eup %2881 }
 0x559   :  { %v1453_v41 = vmul.f32 %v2882_v40, %v3480_v42  ;;  %v2884_v44 = vpop.eup %2883  ;;  %v1900_v42 = vpop.xlane.xlu1 %1899 }
 0x55a   :  { %v1562_v49 = vmul.f32 %v2884_v44, %v3470_v28  ;;  %2889 = vrcp.f32 %v1900_v42 }
 0x55b   :  { %v1454_v24 = vpack.c.bf16 %v1453_v41, %v1453_v41 }
 0x55c   :  { %v1563_v21 = vpack.c.bf16 %v1562_v49, %v1562_v49  ;;  %v2886_v43 = vpop.eup %2885 }
 0x55d   :  { %2696 = vmatmul.mubr.msk.bf16.vlgmr.msra.gmra.mrb[44].mxu0 %vm532_vm11, %v1454_v24  ;;  %v1677_v51 = vmul.f32 %v2886_v43, %v3485_v59  ;;  %v2011_v28 = vpop.xlane.xlu0 %2010  ;;  %v2017_v8 = vpop.permute.xlu1 %2016 }
 0x55e   :  { %2706 = vmatpush3.bf16.msra.mxu0 %v1566_v14  ;;  %2707 = vmatprep.mubr.msk.bf16.mxu0 %vm2977_vm10, %v2976_v34  ;;  %2891 = vrcp.f32 %v2011_v28 }
 0x55f   :  { %2717 = vmatprep.subr.bf16.mxu0 %v2976_v34  ;;  %v1678_v57 = vpack.c.bf16 %v1677_v51, %v1677_v51 }
 0x560   :  { %v2888_v60 = vpop.eup %2887 }
 0x561   :  { %v1794_v62 = vpop.permute.xlu0 %1793  ;;  %v1791_v63 = vmul.f32 %v2888_v60, %v3489_v61 }
 0x563   :  { %v1792_v59 = vpack.c.bf16 %v1791_v63, %v1791_v63 }
 0x564   :  { %v2890_v2 = vpop.eup %2889 }
 0x565   :  { %v582_v47 = vpop.f32.mrb[12].mxu0  ;;  %2708 = vmatmul.mubr.msk.bf16.vlgmr.msra.gmra.mrb[48].mxu0 %vm532_vm11, %v1563_v21  ;;  %v1902_v3 = vmul.f32 %v2890_v2, %v3493_v53 }
 0x566   :  { %v588_v55 = vpack.c.bf16 %v582_v47, %v582_v47  ;;  %2718 = vmatpush3.bf16.msra.mxu0 %v1680_v26  ;;  %v2601_v50 = vpop.f32.mrb[13].mxu0  ;;  %2719 = vmatprep.mubr.msk.bf16.mxu0 %vm2977_vm10, %v2976_v34 }
 0x567   :  { %v585_v5 = vpop.f32.mrb[14].mxu0  ;;  %2729 = vmatprep.subr.bf16.mxu0 %v2976_v34  ;;  %v1903_v7 = vpack.c.bf16 %v1902_v3, %v1902_v3 }
 0x568   :  { %590 = vst.msk [vmem:[#allocation2] sm:$0xf] %vm589_vm12, %v588_v55  ;;  %v2602_v0 = vpop.f32.mrb[15].mxu0  ;;  %v2892_v39 = vpop.eup %2891 }
 0x569   :  { %v2013_v61 = vmul.f32 %v2892_v39, %v3497_v56 }
 0x56d   :  { %2720 = vmatmul.mubr.msk.bf16.vlgmr.msra.gmra.mrb[52].mxu0 %vm532_vm11, %v1678_v57 }
 0x56e   :  { %2730 = vmatpush3.bf16.msra.mxu0 %v1794_v62  ;;  %2731 = vmatprep.mubr.msk.bf16.mxu0 %vm2977_vm10, %v2976_v34 }
 0x56f   :  { %2741 = vmatprep.subr.bf16.mxu0 %v2976_v34 }
 0x575   :  { %2732 = vmatmul.mubr.msk.bf16.vlgmr.msra.gmra.mrb[56].mxu0 %vm532_vm11, %v1792_v59 }
 0x576   :  { %2742 = vmatpush3.bf16.msra.mxu0 %v3376_v48  ;;  %2743 = vmatprep.mubr.msk.bf16.mxu0 %vm2977_vm10, %v2976_v34  ;;  %v2014_v48 = vpack.c.bf16 %v2013_v61, %v2013_v61 }
 0x577   :  { %2753 = vmatprep.subr.bf16.mxu0 %v2976_v34 }
 0x57d   :  { %2744 = vmatmul.mubr.msk.bf16.vlgmr.msra.gmra.mrb[60].mxu0 %vm532_vm11, %v1903_v7 }
 0x57e   :  { %2754 = vmatpush3.bf16.msra.mxu0 %v2017_v8  ;;  %2755 = vmatprep.mubr.msk.bf16.mxu0 %vm2977_vm10, %v2976_v34 }
 0x57f   :  { %2765 = vmatprep.subr.bf16.mxu0 %v2976_v34 }
 0x585   :  { %2756 = vmatmul.mubr.msk.bf16.vlgmr.msra.gmra.mrb[64].mxu0 %vm532_vm11, %v2014_v48 }
 0x586   :  { %2767 = vmatprep.mubr.msk.bf16.mxu0 %vm2977_vm10, %v2976_v34 }
 0x58e   :  { %v2127_v53 = vpop.xlane.xlu1 %2126 }
 0x58f   :  { %2893 = vrcp.f32 %v2127_v53 }
 0x592   :  { %v2132_v10 = vpop.permute.xlu1 %2131  ;;  %v2242_v20 = vpop.xlane.xlu0 %2241 }
 0x593   :  { %2895 = vrcp.f32 %v2242_v20  ;;  %2766 = vmatpush3.bf16.msra.mxu0 %v2132_v10 }
 0x594   :  { %2777 = vmatprep.subr.bf16.mxu0 %v2976_v34 }
 0x596   :  { %v2247_v12 = vpop.permute.xlu0 %2246 }
 0x599   :  { %v2894_v16 = vpop.eup %2893 }
 0x59a   :  { %v2129_v46 = vmul.f32 %v2894_v16, %v3536_v18 }
 0x59c   :  { %v2130_v56 = vpack.c.bf16 %v2129_v46, %v2129_v46 }
 0x59d   :  { %v2896_v17 = vpop.eup %2895 }
 0x59e   :  { %2768 = vmatmul.mubr.msk.bf16.vlgmr.msra.gmra.mrb[68].mxu0 %vm532_vm11, %v2130_v56  ;;  %v2244_v22 = vmul.f32 %v2896_v17, %v3541_v4 }
 0x59f   :  { %2778 = vmatpush3.bf16.msra.mxu0 %v2247_v12  ;;  %2779 = vmatprep.mubr.msk.bf16.mxu0 %vm2977_vm10, %v2976_v34 }
 0x5a0   :  { %v2245_v13 = vpack.c.bf16 %v2244_v22, %v2244_v22 }
 0x5a6   :  { %2780 = vmatmul.mubr.msk.bf16.vlgmr.msra.gmra.mrb[72].mxu0 %vm532_vm11, %v2245_v13 }
 0x5aa   :  { %v696_v19 = vpop.f32.mrb[16].mxu0 }
 0x5ab   :  { %v702_v23 = vpack.c.bf16 %v696_v19, %v696_v19  ;;  %v2613_v52 = vpop.f32.mrb[17].mxu0 }
 0x5ac   :  { %v699_v25 = vpop.f32.mrb[18].mxu0 }
 0x5ad   :  { %v2614_v11 = vpop.f32.mrb[19].mxu0  ;;  %704 = vrot.lane.b32.xlu1 %v702_v23, %s2978_s7 }
 0x5b6   :  { %v811_v9 = vpop.f32.mrb[20].mxu0 }
 0x5b7   :  { %v817_v27 = vpack.c.bf16 %v811_v9, %v811_v9  ;;  %v2625_v33 = vpop.f32.mrb[21].mxu0 }
 0x5b8   :  { %v814_v18 = vpop.f32.mrb[22].mxu0 }
 0x5b9   :  { %v2626_v58 = vpop.f32.mrb[23].mxu0  ;;  %819 = vrot.lane.b32.xlu1 %v817_v27, %s2979_s19 }
 0x5be   :  { %v926_v34 = vpop.f32.mrb[24].mxu0 }
 0x5bf   :  { %v932_v4 = vpack.c.bf16 %v926_v34, %v926_v34  ;;  %v2637_v6 = vpop.f32.mrb[25].mxu0 }
 0x5c0   :  { %v929_v14 = vpop.f32.mrb[26].mxu0  ;;  %v2815_v6 = vld [vmem:[#allocation6] sm:$0xff]  }
 0x5c1   :  { %v2638_v1 = vpop.f32.mrb[27].mxu0  ;;  %934 = vrot.lane.b32.xlu0 %v932_v4, %s2980_s20  ;;  %v2816_v14 = vld [vmem:[#allocation6 + $0x8] sm:$0xff]   ;;  %2783 = vmatprep.subr.bf16.mxu1 %v2815_v6 }
 0x5c2   :  { %2784 = vmatpush3.bf16.msra.mxu1 %v2815_v6 }
 0x5c3   :  { %2785 = vmatprep.subr.bf16.mxu1 %v2816_v14 }
 0x5c6   :  { %v1035_v26 = vpop.f32.mrb[28].mxu0  ;;  %2786 = vmatpush3.bf16.msra.mxu1 %v2816_v14 }
 0x5c7   :  { %v1041_v32 = vpack.c.bf16 %v1035_v26, %v1035_v26  ;;  %v2649_v30 = vpop.f32.mrb[29].mxu0 }
 0x5c8   :  { %v1038_v36 = vpop.f32.mrb[30].mxu0 }
 0x5c9   :  { %v1043_v37 = vrot.slane %v1041_v32, 4  ;;  %v2650_v38 = vpop.f32.mrb[31].mxu0 }
 0x5cb   :  { %1046 = vst.msk [vmem:[#allocation2] sm:$0xf0] %vm1045_vm13, %v1043_v37 }
 0x5ce   :  { %v1151_v31 = vpop.f32.mrb[32].mxu0 }
 0x5cf   :  { %v1157_v35 = vpack.c.bf16 %v1151_v31, %v1151_v31  ;;  %v2661_v15 = vpop.f32.mrb[33].mxu0 }
 0x5d0   :  { %v1154_v29 = vpop.f32.mrb[34].mxu0 }
 0x5d1   :  { %v1159_v54 = vrot.slane %v1157_v35, 4  ;;  %v2662_v40 = vpop.f32.mrb[35].mxu0 }
 0x5d3   :  { %1160 = vrot.lane.b32.xlu1 %v1159_v54, %s2978_s7 }
 0x5fb   :  { %v1267_v41 = vpop.f32.mrb[36].mxu0 }
 0x5fc   :  { %v1273_v24 = vpack.c.bf16 %v1267_v41, %v1267_v41  ;;  %v2673_v44 = vpop.f32.mrb[37].mxu0 }
 0x5fd   :  { %v1270_v49 = vpop.f32.mrb[38].mxu0 }
 0x5fe   :  { %v1275_v45 = vrot.slane %v1273_v24, 4  ;;  %v2674_v21 = vpop.f32.mrb[39].mxu0 }
 0x600   :  { %1276 = vrot.lane.b32.xlu1 %v1275_v45, %s2979_s19 }
 0x607   :  { %v1383_v43 = vpop.f32.mrb[40].mxu0 }
 0x608   :  { %v1389_v47 = vpack.c.bf16 %v1383_v43, %v1383_v43  ;;  %v2685_v42 = vpop.f32.mrb[41].mxu0 }
 0x609   :  { %v1386_v55 = vpop.f32.mrb[42].mxu0  ;;  %v2374_v42 = vld [vmem:[%s3660_s0 + $0x10] sm:$0xff] }
 0x60a   :  { %v1391_v50 = vrot.slane %v1389_v47, 4  ;;  %v2686_v51 = vpop.f32.mrb[43].mxu0  ;;  %v2372_v55 = vld [vmem:[%s3660_s0] sm:$0xff] }
 0x60b   :  { %v2474_v51 = vld [vmem:[%s3669_s9] ss:$0 sm:$0xff] }
 0x60c   :  { %1392 = vrot.lane.b32.xlu1 %v1391_v50, %s2980_s20 }
 0x61f   :  { %v705_v28 = vpop.permute.xlu1 %704 }
 0x620   :  { %708 = vst.msk [vmem:[#allocation2] sm:$0xf] %vm707_vm14, %v705_v28  ;;  %v2375_v28 = vld [vmem:[%s3660_s0 + $0x18] sm:$0xff] }
 0x62b   :  { %v820_v5 = vpop.permute.xlu1 %819 }
 0x62c   :  { %823 = vst.msk [vmem:[#allocation2] sm:$0xf] %vm822_vm15, %v820_v5 }
 0x630   :  { %v1492_v0 = vpop.f32.mrb[44].mxu0 }
 0x631   :  { %v1498_v57 = vpack.c.bf16 %v1492_v0, %v1492_v0  ;;  %v2697_v60 = vpop.f32.mrb[45].mxu0 }
 0x632   :  { %v1495_v62 = vpop.f32.mrb[46].mxu0 }
 0x633   :  { %1499 = vst.msk [vmem:[#allocation2 + $0x8] sm:$0xf] %vm589_vm12, %v1498_v57  ;;  %v2698_v63 = vpop.f32.mrb[47].mxu0  ;;  %v935_v59 = vpop.permute.xlu0 %934  ;;  %v2373_v57 = vld [vmem:[%s3660_s0 + $0x8] sm:$0xff]  ;;  %s2941_s0 = scalar_lea.vmem %s2401_s2, 512 }
 0x634   :  { %938 = vst.msk [vmem:[#allocation2] sm:$0xf] %vm937_vm1, %v935_v59  ;;  %p2942_p2 = scmp.ne.s32.totalorder %s2401_s2, %s2941_s0  ;;  %p2947_p4 = scmp.lt.s32.totalorder %s2941_s0, %s2941_s0 }
 0x636   :  { %p2948_p5 = por %p2947_p4, %p2946_p3 }
 0x638   :  { %v1605_v2 = vpop.f32.mrb[48].mxu0  ;;  %p2949_p6 = pnand %p2948_p5, %p2942_p2 }
 0x639   :  { %v1611_v3 = vpack.c.bf16 %v1605_v2, %v1605_v2  ;;  %v2709_v7 = vpop.f32.mrb[49].mxu0 }
 0x63a   :  { %v1608_v39 = vpop.f32.mrb[50].mxu0 }
 0x63b   :  { %1613 = vrot.lane.b32.xlu1 %v1611_v3, %s2978_s7  ;;  %v2710_v8 = vpop.f32.mrb[51].mxu0 }
 0x640   :  { %v1719_v61 = vpop.f32.mrb[52].mxu0 }
 0x641   :  { %v1725_v48 = vpack.c.bf16 %v1719_v61, %v1719_v61  ;;  %v2721_v53 = vpop.f32.mrb[53].mxu0 }
 0x642   :  { %v1722_v10 = vpop.f32.mrb[54].mxu0 }
 0x643   :  { %1727 = vrot.lane.b32.xlu0 %v1725_v48, %s2979_s19  ;;  %v2722_v20 = vpop.f32.mrb[55].mxu0 }
 0x645   :  { %v1161_v16 = vpop.permute.xlu1 %1160 }
 0x646   :  { %1164 = vst.msk [vmem:[#allocation2] sm:$0xf0] %vm1163_vm2, %v1161_v16 }
 0x648   :  { %v1833_v46 = vpop.f32.mrb[56].mxu0 }
 0x649   :  { %v1839_v56 = vpack.c.bf16 %v1833_v46, %v1833_v46  ;;  %v2733_v17 = vpop.f32.mrb[57].mxu0 }
 0x64a   :  { %v1836_v12 = vpop.f32.mrb[58].mxu0 }
 0x64b   :  { %1841 = vrot.lane.b32.xlu0 %v1839_v56, %s2980_s20  ;;  %v2734_v22 = vpop.f32.mrb[59].mxu0 }
 0x650   :  { %v1941_v13 = vpop.f32.mrb[60].mxu0 }
 0x651   :  { %v1947_v19 = vpack.c.bf16 %v1941_v13, %v1941_v13  ;;  %v2745_v23 = vpop.f32.mrb[61].mxu0 }
 0x652   :  { %v1944_v52 = vpop.f32.mrb[62].mxu0 }
 0x653   :  { %v1949_v25 = vrot.slane %v1947_v19, 4  ;;  %v2746_v11 = vpop.f32.mrb[63].mxu0 }
 0x655   :  { %1951 = vst.msk [vmem:[#allocation2 + $0x8] sm:$0xf0] %vm1045_vm13, %v1949_v25 }
 0x658   :  { %v2056_v9 = vpop.f32.mrb[64].mxu0 }
 0x659   :  { %v2062_v27 = vpack.c.bf16 %v2056_v9, %v2056_v9  ;;  %v2757_v33 = vpop.f32.mrb[65].mxu0 }
 0x65a   :  { %v2059_v18 = vpop.f32.mrb[66].mxu0 }
 0x65b   :  { %v2064_v58 = vrot.slane %v2062_v27, 4  ;;  %v2758_v34 = vpop.f32.mrb[67].mxu0 }
 0x65d   :  { %2065 = vrot.lane.b32.xlu1 %v2064_v58, %s2978_s7 }
 0x671   :  { %v2171_v4 = vpop.f32.mrb[68].mxu0 }
 0x672   :  { %v2177_v1 = vpack.c.bf16 %v2171_v4, %v2171_v4  ;;  %v1277_v26 = vpop.permute.xlu1 %1276  ;;  %v2769_v32 = vpop.f32.mrb[69].mxu0 }
 0x673   :  { %1280 = vst.msk [vmem:[#allocation2] sm:$0xf0] %vm1279_vm3, %v1277_v26  ;;  %v2174_v30 = vpop.f32.mrb[70].mxu0 }
 0x674   :  { %v2179_v36 = vrot.slane %v2177_v1, 4  ;;  %v2770_v37 = vpop.f32.mrb[71].mxu0 }
 0x676   :  { %2180 = vrot.lane.b32.xlu1 %v2179_v36, %s2979_s19 }
 0x679   :  { %v2286_v38 = vpop.f32.mrb[72].mxu0 }
 0x67a   :  { %v2292_v31 = vpack.c.bf16 %v2286_v38, %v2286_v38  ;;  %v2781_v35 = vpop.f32.mrb[73].mxu0 }
 0x67b   :  { %v2289_v15 = vpop.f32.mrb[74].mxu0 }
 0x67c   :  { %v2294_v29 = vrot.slane %v2292_v31, 4  ;;  %v2782_v54 = vpop.f32.mrb[75].mxu0 }
 0x67e   :  { %v1393_v40 = vpop.permute.xlu1 %1392  ;;  %2295 = vrot.lane.b32.xlu1 %v2294_v29, %s2980_s20 }
 0x67f   :  { %1396 = vst.msk [vmem:[#allocation2] sm:$0xf0] %vm1395_vm4, %v1393_v40 }
 0x686   :  { %v2299_v41 = vld [vmem:[#allocation2] sm:$0xff] }
 0x687   :  { %2787 = vmatprep.mubr.msk.bf16.mxu1 %vm75_vm0, %v2299_v41 }
 0x6ad   :  { %v1614_v24 = vpop.permute.xlu1 %1613 }
 0x6ae   :  { %1616 = vst.msk [vmem:[#allocation2 + $0x8] sm:$0xf] %vm707_vm14, %v1614_v24 }
 0x6b5   :  { %v1728_v44 = vpop.permute.xlu0 %1727 }
 0x6b6   :  { %1730 = vst.msk [vmem:[#allocation2 + $0x8] sm:$0xf] %vm822_vm15, %v1728_v44 }
 0x6bd   :  { %v1842_v49 = vpop.permute.xlu0 %1841 }
 0x6be   :  { %1844 = vst.msk [vmem:[#allocation2 + $0x8] sm:$0xf] %vm937_vm1, %v1842_v49 }
 0x6cf   :  { %v2066_v45 = vpop.permute.xlu1 %2065 }
 0x6d0   :  { %2068 = vst.msk [vmem:[#allocation2 + $0x8] sm:$0xf0] %vm1163_vm2, %v2066_v45 }
 0x6e8   :  { %v2181_v21 = vpop.permute.xlu1 %2180 }
 0x6e9   :  { %2183 = vst.msk [vmem:[#allocation2 + $0x8] sm:$0xf0] %vm1279_vm3, %v2181_v21 }
 0x6f0   :  { %v2296_v43 = vpop.permute.xlu1 %2295 }
 0x6f1   :  { %2298 = vst.msk [vmem:[#allocation2 + $0x8] sm:$0xf0] %vm1395_vm4, %v2296_v43 }
 0x6f8   :  { %v2300_v47 = vld [vmem:[#allocation2 + $0x8] sm:$0xff] }
 0x6f9   :  { %2788 = vmatmul.mubr.msk.bf16.vlgmr.msra.gmra.mrb[72].mxu1 %vm75_vm0, %v2300_v47 }
 0x7cc   :  { %v2789_v50 = vpop.f32.mrb[72].mxu1 }
 0x7cd   :  { %v2378_v5 = vadd.f32 %v2789_v50, %v2374_v42  ;;  %v2357_v0 = vpop.f32.mrb[73].mxu1 }
 0x7ce   :  { %v2376_v60 = vadd.f32 %v2372_v55, %v2357_v0  ;;  %v2790_v62 = vpop.f32.mrb[74].mxu1 }
 0x7cf   :  { %v2389_v63 = vadd.f32 %v2474_v51, %v2378_v5  ;;  %v2379_v59 = vadd.f32 %v2790_v62, %v2375_v28  ;;  %v2360_v2 = vpop.f32.mrb[75].mxu1 }
 0x7d0   :  { %v2387_v3 = vadd.f32 %v2474_v51, %v2376_v60  ;;  %v2377_v7 = vadd.f32 %v2373_v57, %v2360_v2 }
 0x7d1   :  { %2393 = vst.msk [vmem:[#allocation8 + $0x10] sm:$0xff] %vm75_vm0, %v2389_v63  ;;  %v2390_v39 = vadd.f32 %v2474_v51, %v2379_v59 }
 0x7d2   :  { %2391 = vst.msk [vmem:[#allocation8] sm:$0xff] %vm75_vm0, %v2387_v3  ;;  %v2388_v8 = vadd.f32 %v2474_v51, %v2377_v7 }
 0x7d3   :  { %2394 = vst.msk [vmem:[#allocation8 + $0x18] sm:$0xff] %vm75_vm0, %v2390_v39 }
 0x7d4   :  { %2392 = vst.msk [vmem:[#allocation8 + $0x8] sm:$0xff] %vm75_vm0, %v2388_v8 }
 0x7d5   :  { %2952 = shalt.err (!%p2949_p6)
}
 0x7d6   :  { %s2953_s15 = scalar_lea.hbm %s3672_s12, 512 }
 0x7d7   :  { %p2954_p7 = scmp.ne.s32.totalorder %s3672_s12, %s2953_s15  ;;  %p2957_p8 = scmp.lt.u32.totalorder %s2953_s15, %s3672_s12 }
 0x7d9   :  { %p2959_p9 = pnand %p2957_p8, %p2954_p7 }
 0x7db   :  { %2962 = shalt.err (!%p2959_p9)
}
 0x7dc   :  { %s2982_s17 = smov 128  }
 0x7dd   :  { %2406 = dma.vmem_to_hbm [thread:$0]  %s2401_s2, 512, %s3672_s12, [#allocation5], %s2982_s17, %s2982_s17, %s2978_s7  }
 0x7de   :  { %2967 = dma.done.wait [#allocation5], 512  }
 0x7df   :  { %2968 = vsyncadd [#allocation5], 4294966784 }
 0x7e0   :  { %2410 = vsyncpa [#allocation4], 1 }
 0x7e1   :  { %2411 = vsyncpa [#allocation7], 1 }
 0x7e2   :  { %2412 = vsyncpa [#allocation5], 1 }

// kernel: tpu_custom_call.1
= control target key start
LH: loop header
LB: loop body
LE: loop exit
PB: predicated region body
PF: predicated region fallthrough
CT: control target
= control target key end

     0   :  { %17 = vsyncpa [#allocation4], 0  ;;  %s3660_s0 = inlined_call_operand.vmem [shape: f32[32,32], index: 0, kind: input, shape index: {}]   ;;  %s3661_s1 = inlined_call_operand.vmem [shape: bf16[64,32], index: 1, kind: input, shape index: {}]   ;;  %s3662_s2 = inlined_call_operand.vmem [shape: bf16[32,32], index: 2, kind: input, shape index: {}]   ;;  %s3663_s3 = inlined_call_operand.vmem [shape: f32[1,32], index: 3, kind: input, shape index: {}]   ;;  %s3664_s4 = inlined_call_operand.hbm [shape: bf16[32,32], index: 4, kind: input, shape index: {}]   ;;  %s3665_s5 = inlined_call_operand.vmem [shape: f32[1,32], index: 5, kind: input, shape index: {}]   ;;  %s3666_s6 = inlined_call_operand.vmem [shape: bf16[32,32], index: 6, kind: input, shape index: {}]   ;;  %s3667_s7 = inlined_call_operand.vmem [shape: f32[1,32], index: 7, kind: input, shape index: {}]   ;;  %s3668_s8 = inlined_call_operand.hbm [shape: bf16[32,32], index: 8, kind: input, shape index: {}]   ;;  %s3669_s9 = inlined_call_operand.vmem [shape: f32[1,32], index: 9, kind: input, shape index: {}]   ;;  %s3670_s10 = inlined_call_operand.vmem [shape: f32[1,32], index: 10, kind: input, shape index: {}]   ;;  %s3671_s11 = inlined_call_operand.vmem [shape: f32[1,32], index: 11, kind: input, shape index: {}]   ;;  %s3672_s12 = inlined_call_operand.hbm [shape: f32[32,32], index: 12, kind: output, shape index: {}]  }
   0x1   :  { %18 = vsyncpa [#allocation7], 0 }
   0x2   :  { %19 = vsyncpa [#allocation5], 0  ;;  %s2969_s21 = smov [#allocation3]   ;;  %s2897_s25 = scalar_lea.hbm %s3664_s4, 256 }
   0x3   :  { %s33_s22 = sshll.u32 %s2969_s21, 4  ;;  %p2898_p0 = scmp.ne.s32.totalorder %s3664_s4, %s2897_s25  ;;  %s34_s22 = int_to_ptr.vmem [resolvable:$true] %s33_s22 }
   0x4   :  { %p2901_p1 = scmp.lt.u32.totalorder %s2897_s25, %s3664_s4 }
   0x6   :  { %p2903_p2 = pnand %p2901_p1, %p2898_p0 }
   0x8   :  { %2906 = shalt.err (!%p2903_p2)
}
   0x9   :  { %s2907_s30 = scalar_lea.vmem %s34_s22, 256  ;;  %p2912_p4 = scmp.lt.s32.totalorder %s34_s22, %s34_s22 }
   0xa   :  { %p2908_p3 = scmp.ne.s32.totalorder %s34_s22, %s2907_s30  ;;  %p2913_p5 = scmp.lt.s32.totalorder %s2907_s30, %s2907_s30 }
   0xc   :  { %p2914_p6 = por %p2913_p5, %p2912_p4 }
   0xe   :  { %p2915_p7 = pnand %p2914_p6, %p2908_p3 }
  0x10   :  { %2918 = shalt.err (!%p2915_p7)
}
  0x11   :  { %s2970_s13 = smov 64   ;;  %s2971_s14 = smov 4  }
  0x12   :  { %39 = dma.hbm_to_vmem [thread:$0]  %s3664_s4, 256, %s34_s22, [#allocation4], %s2970_s13, %s2970_s13, %s2971_s14  }
  0x13   :  { %s2972_s17 = smov [#allocation6]   ;;  %s2919_s21 = scalar_lea.hbm %s3668_s8, 256 }
  0x14   :  { %s51_s18 = sshll.u32 %s2972_s17, 4  ;;  %p2920_p8 = scmp.ne.s32.totalorder %s3668_s8, %s2919_s21  ;;  %s52_s18 = int_to_ptr.vmem [resolvable:$true] %s51_s18 }
  0x15   :  { %p2923_p9 = scmp.lt.u32.totalorder %s2919_s21, %s3668_s8 }
  0x17   :  { %p2925_p10 = pnand %p2923_p9, %p2920_p8 }
  0x19   :  { %2928 = shalt.err (!%p2925_p10)
}
  0x1a   :  { %s2929_s27 = scalar_lea.vmem %s52_s18, 256  ;;  %p2934_p12 = scmp.lt.s32.totalorder %s52_s18, %s52_s18 }
  0x1b   :  { %p2930_p11 = scmp.ne.s32.totalorder %s52_s18, %s2929_s27  ;;  %p2935_p13 = scmp.lt.s32.totalorder %s2929_s27, %s2929_s27 }
  0x1d   :  { %p2936_p0 = por %p2935_p13, %p2934_p12 }
  0x1f   :  { %p2937_p1 = pnand %p2936_p0, %p2930_p11 }
  0x21   :  { %2940 = shalt.err (!%p2937_p1)
}
  0x22   :  { %57 = dma.hbm_to_vmem [thread:$0]  %s3668_s8, 256, %s52_s18, [#allocation7], %s2970_s13, %s2970_s13, %s2971_s14  }
  0x23   :  { %2963 = dma.done.wait [#allocation4], 256  }
  0x24   :  { %2964 = vsyncadd [#allocation4], 4294967040 }
  0x25   :  { %2965 = dma.done.wait [#allocation7], 256  }
  0x26   :  { %2966 = vsyncadd [#allocation7], 4294967040  ;;  %vm75_vm0 = vcmask 261120   ;;  %v71_v0 = vld [vmem:[%s3660_s0] sm:$0xff]  ;;  %v73_v1 = vld [vmem:[%s3660_s0 + $0x10] sm:$0xff]  ;;  %s2973_s17 = smov 120  }
  0x27   :  { %v72_v2 = vld [vmem:[%s3660_s0 + $0x8] sm:$0xff]  ;;  %v76_v3 = vsel %vm75_vm0, %v71_v0, 0.0  ;;  %v82_v4 = vsel %vm75_vm0, %v73_v1, 0.0  ;;  %v74_v5 = vld [vmem:[%s3660_s0 + $0x18] sm:$0xff]  ;;  %v2805_v28 = vld [vmem:[#allocation3] sm:$0xff]   ;;  %s2974_s8 = smov 104  }
  0x28   :  { %77 = vadd.xlane.f32.xlu0 %v76_v3  ;;  %83 = vadd.xlane.f32.xlu1 %v82_v4  ;;  %v79_v6 = vsel %vm75_vm0, %v72_v2, 0.0  ;;  %v85_v7 = vsel %vm75_vm0, %v74_v5, 0.0  ;;  %v2806_v29 = vld [vmem:[#allocation3 + $0x8] sm:$0xff]   ;;  %v3111_v30 = vld [vmem:[%s3661_s1] sm:$0xff]   ;;  %v3116_v31 = vld [vmem:[%s3661_s1 + $0x8] sm:$0xff]   ;;  %vm485_vm9 = vcmask 64512  }
  0x29   :  { %2567 = vmatprep.subr.bf16.mxu1 %v2805_v28  ;;  %2571 = vmatprep.mubr.msk.bf16.mxu1 %vm75_vm0, %v3111_v30  ;;  %v2809_v32 = vld [vmem:[%s3662_s2] sm:$0xff]   ;;  %v2810_v33 = vld [vmem:[%s3662_s2 + $0x8] sm:$0xff]   ;;  %v3131_v34 = vld [vmem:[%s3661_s1 + $0x10] sm:$0xff]   ;;  %vm2977_vm10 = vmmov 0   ;;  %vm532_vm11 = vcmask 130048   ;;  %vm589_vm12 = vcmask 60416  }
  0x2a   :  { %2568 = vmatpush3.bf16.msra.mxu1 %v2805_v28  ;;  %2559 = vmatprep.subr.bf16.mxu0 %v2809_v32  ;;  %v3136_v35 = vld [vmem:[%s3661_s1 + $0x18] sm:$0xff]   ;;  %v3141_v36 = vld [vmem:[%s3666_s6] sm:$0xff]   ;;  %s2979_s19 = smov 16   ;;  %s2980_s20 = smov 24   ;;  %vm1045_vm13 = vcmask 64516   ;;  %vm707_vm14 = vcmask 126016  }
  0x2b   :  { %2569 = vmatprep.subr.bf16.mxu1 %v2806_v29  ;;  %2560 = vmatpush3.bf16.msra.mxu0 %v2809_v32  ;;  %vm822_vm15 = vcmask 191616   ;;  %s2981_s1 = smov [#allocation8]  }
  0x2c   :  { %80 = vadd.xlane.f32.xlu0 %v79_v6  ;;  %86 = vadd.xlane.f32.xlu1 %v85_v7  ;;  %v2413_v7 = vld [vmem:[%s3670_s10] ss:$0 sm:$0xff]  ;;  %s2400_s2 = sshll.u32 %s2981_s1, 4  ;;  %s2401_s2 = int_to_ptr.vmem [resolvable:$true] %s2400_s2 }
  0x2d   :  { %2561 = vmatprep.subr.bf16.mxu0 %v2810_v33  ;;  %p2946_p3 = scmp.lt.s32.totalorder %s2401_s2, %s2401_s2 }
  0x2e   :  { %2570 = vmatpush3.bf16.msra.mxu1 %v2806_v29 }
  0x2f   :  { %2562 = vmatpush3.bf16.msra.mxu0 %v2810_v33 }
  0x30   :  { %2579 = vmatprep.subr.bf16.mxu0 %v3141_v36 }
  0x31   :  { %2572 = vmatmul.mubr.msk.bf16.vlgmr.msra.gmra.mrb[0].mxu1 %vm75_vm0, %v3116_v31 }
  0x32   :  { %2575 = vmatprep.mubr.msk.bf16.mxu1 %vm75_vm0, %v3131_v34 }
  0x39   :  { %2576 = vmatmul.mubr.msk.bf16.gmra.mrb[4].mxu1 %vm75_vm0, %v3136_v35 }
  0xb5   :  { %v78_v8 = vpop.xlane.xlu0 %77  ;;  %v84_v9 = vpop.xlane.xlu1 %83 }
  0xb6   :  { %v89_v10 = vmul.f32 0.03125, %v78_v8  ;;  %v91_v11 = vmul.f32 0.03125, %v84_v9 }
  0xb8   :  { %v3088_v12 = vsub.f32 %v71_v0, %v89_v10  ;;  %v3090_v13 = vsub.f32 %v73_v1, %v91_v11 }
  0xb9   :  { %v81_v14 = vpop.xlane.xlu0 %80  ;;  %v87_v15 = vpop.xlane.xlu1 %86 }
  0xba   :  { %v90_v16 = vmul.f32 0.03125, %v81_v14  ;;  %v92_v17 = vmul.f32 0.03125, %v87_v15  ;;  %v97_v18 = vmul.f32 %v3088_v12, %v3088_v12  ;;  %v99_v19 = vmul.f32 %v3090_v13, %v3090_v13  ;;  %v2414_v14 = vld [vmem:[%s3671_s11] ss:$0 sm:$0xff] }
  0xbc   :  { %v3096_v20 = vsub.f32 %v72_v2, %v90_v16  ;;  %v3098_v21 = vsub.f32 %v74_v5, %v92_v17  ;;  %v101_v22 = vsel %vm75_vm0, %v97_v18, 0.0  ;;  %v107_v23 = vsel %vm75_vm0, %v99_v19, 0.0 }
  0xbd   :  { %102 = vadd.xlane.f32.xlu0 %v101_v22 }
  0xbe   :  { %v98_v24 = vmul.f32 %v3096_v20, %v3096_v20  ;;  %v100_v25 = vmul.f32 %v3098_v21, %v3098_v21 }
  0xc0   :  { %v104_v26 = vsel %vm75_vm0, %v98_v24, 0.0  ;;  %v110_v27 = vsel %vm75_vm0, %v100_v25, 0.0 }
  0xc1   :  { %108 = vadd.xlane.f32.xlu0 %v107_v23  ;;  %105 = vadd.xlane.f32.xlu1 %v104_v26 }
  0xc5   :  { %111 = vadd.xlane.f32.xlu1 %v110_v27  ;;  %v2814_v27 = vld [vmem:[%s3666_s6 + $0x8] sm:$0xff]  }
 0x14a   :  { %v103_v37 = vpop.xlane.xlu0 %102 }
 0x14b   :  { %v113_v38 = vmul.f32 0.032258064, %v103_v37 }
 0x14d   :  { %2817 = vrsqrt.f32 %v113_v38  ;;  %vm120_vm1 = vcmp.eq.f32.partialorder %v113_v38, inf  ;;  %v123_v47 = vand.u32 2147483648, %v113_v38  ;;  %vm122_vm2 = vcmp.eq.f32.partialorder %v113_v38, 0.0 }
 0x14e   :  { %v106_v39 = vpop.xlane.xlu1 %105  ;;  %v109_v40 = vpop.xlane.xlu0 %108 }
 0x14f   :  { %v114_v41 = vmul.f32 0.032258064, %v106_v39  ;;  %v115_v42 = vmul.f32 0.032258064, %v109_v40 }
 0x151   :  { %2819 = vrsqrt.f32 %v114_v41  ;;  %vm127_vm3 = vcmp.eq.f32.partialorder %v114_v41, inf  ;;  %vm129_vm4 = vcmp.eq.f32.partialorder %v114_v41, 0.0  ;;  %v130_v54 = vand.u32 2147483648, %v114_v41 }
 0x152   :  { %2821 = vrsqrt.f32 %v115_v42  ;;  %v112_v43 = vpop.xlane.xlu1 %111  ;;  %vm134_vm5 = vcmp.eq.f32.partialorder %v115_v42, inf  ;;  %v137_v57 = vand.u32 2147483648, %v115_v42  ;;  %vm136_vm6 = vcmp.eq.f32.partialorder %v115_v42, 0.0 }
 0x153   :  { %v116_v44 = vmul.f32 0.032258064, %v112_v43 }
 0x155   :  { %2823 = vrsqrt.f32 %v116_v44  ;;  %vm141_vm7 = vcmp.eq.f32.partialorder %v116_v44, inf  ;;  %v144_v1 = vand.u32 2147483648, %v116_v44  ;;  %vm143_vm8 = vcmp.eq.f32.partialorder %v116_v44, 0.0 }
 0x157   :  { %v2818_v45 = vpop.eup %2817 }
 0x158   :  { %v119_v46 = vmul.f32 %v2818_v45, %v113_v38 }
 0x15a   :  { %v121_v48 = vsel %vm120_vm1, %v113_v38, %v119_v46  ;;  %vm937_vm1 = vcmask 257216  }
 0x15b   :  { %v2820_v49 = vpop.eup %2819  ;;  %v124_v50 = vsel %vm122_vm2, %v123_v47, %v121_v48  ;;  %vm1163_vm2 = vcmask 130116  }
 0x15c   :  { %v2822_v51 = vpop.eup %2821  ;;  %v126_v52 = vmul.f32 %v2820_v49, %v114_v41  ;;  %v146_v53 = vadd.f32 1e-06, %v124_v50  ;;  %v2415_v50 = vld [vmem:[%s3663_s3] ss:$0 sm:$0xff] }
 0x15d   :  { %v133_v55 = vmul.f32 %v2822_v51, %v115_v42 }
 0x15e   :  { %v128_v56 = vsel %vm127_vm3, %v114_v41, %v126_v52  ;;  %2825 = vrcp.f32 %v146_v53  ;;  %vm1279_vm3 = vcmask 195716  }
 0x15f   :  { %v2824_v58 = vpop.eup %2823  ;;  %v135_v59 = vsel %vm134_vm5, %v115_v42, %v133_v55  ;;  %v131_v60 = vsel %vm129_vm4, %v130_v54, %v128_v56  ;;  %vm1395_vm4 = vcmask 261316  }
 0x160   :  { %v138_v61 = vsel %vm136_vm6, %v137_v57, %v135_v59  ;;  %v140_v62 = vmul.f32 %v2824_v58, %v116_v44  ;;  %v147_v63 = vadd.f32 1e-06, %v131_v60 }
 0x161   :  { %v148_v0 = vadd.f32 1e-06, %v138_v61 }
 0x162   :  { %v142_v2 = vsel %vm141_vm7, %v116_v44, %v140_v62  ;;  %2827 = vrcp.f32 %v147_v63 }
 0x163   :  { %2829 = vrcp.f32 %v148_v0  ;;  %v145_v3 = vsel %vm143_vm8, %v144_v1, %v142_v2  ;;  %v3240_v1 = vld [vmem:[%s3667_s7] ss:$0 sm:$0xff]  ;;  %s2978_s7 = smov 8  }
 0x164   :  { %v149_v4 = vadd.f32 1e-06, %v145_v3 }
 0x166   :  { %2831 = vrcp.f32 %v149_v4 }
 0x168   :  { %v2826_v5 = vpop.eup %2825 }
 0x169   :  { %v151_v6 = vmul.f32 %v2826_v5, %v3088_v12 }
 0x16b   :  { %v164_v11 = vmul.f32 %v2413_v7, %v151_v6 }
 0x16c   :  { %v2828_v8 = vpop.eup %2827 }
 0x16d   :  { %v2830_v9 = vpop.eup %2829  ;;  %v153_v10 = vmul.f32 %v2828_v8, %v3096_v20  ;;  %v175_v18 = vadd.f32 %v2414_v14, %v164_v11 }
 0x16e   :  { %v155_v15 = vmul.f32 %v2830_v9, %v3090_v13  ;;  %v2420_v13 = vld [vmem:[%s3665_s5] ss:$0 sm:$0xff]  ;;  %s2975_s5 = smov 112  }
 0x16f   :  { %v165_v16 = vmul.f32 %v2413_v7, %v153_v10 }
 0x170   :  { %v2832_v17 = vpop.eup %2831  ;;  %v166_v22 = vmul.f32 %v2413_v7, %v155_v15 }
 0x171   :  { %v176_v19 = vadd.f32 %v2414_v14, %v165_v16  ;;  %v157_v12 = vmul.f32 %v2832_v17, %v3098_v21  ;;  %v2573_v21 = vpop.f32.mrb[0].mxu1 }
 0x172   :  { %v177_v25 = vadd.f32 %v2414_v14, %v166_v22  ;;  %v367_v28 = vadd.f32 %v2573_v21, %v2420_v13  ;;  %v358_v29 = vpop.f32.mrb[1].mxu1 }
 0x173   :  { %v179_v23 = vpack.c.bf16 %v176_v19, %v175_v18  ;;  %v167_v24 = vmul.f32 %v2413_v7, %v157_v12  ;;  %v359_v32 = vadd.f32 %v2420_v13, %v358_v29 }
 0x175   :  { %2563 = vmatprep.mubr.msk.bf16.mxu0 %vm75_vm0, %v179_v23  ;;  %v178_v20 = vadd.f32 %v2414_v14, %v167_v24 }
 0x177   :  { %v180_v26 = vpack.c.bf16 %v178_v20, %v177_v25 }
 0x179   :  { %2564 = vmatmul.mubr.msk.bf16.vlgmr.msra.gmra.mrb[0].mxu0 %vm75_vm0, %v180_v26 }
 0x17a   :  { %2580 = vmatpush3.bf16.msra.mxu0 %v3141_v36  ;;  %2583 = vmatprep.mubr.msk.bf16.mxu0 %vm75_vm0, %v3111_v30  ;;  %v2574_v30 = vpop.f32.mrb[2].mxu1 }
 0x17b   :  { %2581 = vmatprep.subr.bf16.mxu0 %v2814_v27  ;;  %v370_v33 = vadd.f32 %v2574_v30, %v2420_v13  ;;  %v361_v36 = vpop.f32.mrb[3].mxu1 }
 0x17c   :  { %v362_v37 = vadd.f32 %v2420_v13, %v361_v36  ;;  %v2577_v39 = vpop.f32.mrb[4].mxu1 }
 0x17d   :  { %v3175_v38 = vpack.c.bf16 %v370_v33, %v367_v28  ;;  %v383_v40 = vadd.f32 %v2577_v39, %v2420_v13  ;;  %v374_v41 = vpop.f32.mrb[5].mxu1 }
 0x17e   :  { %2582 = vmatpush3.bf16.msra.mxu0 %v2814_v27  ;;  %v375_v42 = vadd.f32 %v2420_v13, %v374_v41  ;;  %v2578_v43 = vpop.f32.mrb[6].mxu1 }
 0x17f   :  { %v386_v44 = vadd.f32 %v2578_v43, %v2420_v13  ;;  %v377_v45 = vpop.f32.mrb[7].mxu1  ;;  %v944_v12 = vsel %vm485_vm9, %v3175_v38, 0 }
 0x180   :  { %v378_v46 = vadd.f32 %v2420_v13, %v377_v45 }
 0x181   :  { %2584 = vmatmul.mubr.msk.bf16.vlgmr.msra.gmra.mrb[4].mxu0 %vm75_vm0, %v3116_v31  ;;  %v389_v31 = vpack.c.bf16 %v362_v37, %v359_v32  ;;  %v3193_v47 = vpack.c.bf16 %v386_v44, %v383_v40 }
 0x182   :  { %2587 = vmatprep.mubr.msk.bf16.mxu0 %vm75_vm0, %v3131_v34  ;;  %v2976_v34 = vmov 0.0   ;;  %v3195_v48 = vpack.c.bf16 %v378_v46, %v375_v42 }
 0x183   :  { %595 = vrot.lane.b32.xlu0 %v389_v31, %s2973_s17  ;;  %2591 = vmatprep.subr.bf16.mxu1 %v2976_v34  ;;  %v1850_v39 = vsel %vm485_vm9, %v3193_v47, 0 }
 0x184   :  { %2597 = vmatprep.subr.bf16.mxu0 %v2976_v34  ;;  %2593 = vmatprep.mubr.msk.bf16.mxu1 %vm2977_vm10, %v2976_v34  ;;  %v1401_v28 = vsel %vm485_vm9, %v3195_v48, 0 }
 0x187   :  { %826 = vrot.lane.b32.xlu0 %v389_v31, %s2974_s8 }
 0x189   :  { %2588 = vmatmul.mubr.msk.bf16.gmra.mrb[8].mxu0 %vm75_vm0, %v3136_v35  ;;  %v490_v35 = vsel %vm485_vm9, %v389_v31, 0 }
 0x18a   :  { %2592 = vmatpush3.bf16.xpose.msra.mxu1 %v490_v35  ;;  %2599 = vmatprep.mubr.msk.bf16.mxu0 %vm2977_vm10, %v2976_v34 }
 0x18b   :  { %1050 = vrot.lane.b32.xlu0 %v3175_v38, %s2973_s17  ;;  %2603 = vmatprep.subr.bf16.mxu1 %v2976_v34 }
 0x18f   :  { %1167 = vrot.lane.b32.xlu0 %v3175_v38, %s2975_s5 }
 0x193   :  { %1283 = vrot.lane.b32.xlu0 %v3175_v38, %s2974_s8 }
 0x197   :  { %1504 = vrot.lane.b32.xlu0 %v3195_v48, %s2973_s17 }
 0x19b   :  { %1619 = vrot.lane.b32.xlu0 %v3195_v48, %s2975_s5 }
 0x19f   :  { %1733 = vrot.lane.b32.xlu0 %v3195_v48, %s2974_s8 }
 0x1a3   :  { %1955 = vrot.lane.b32.xlu0 %v3193_v47, %s2973_s17 }
 0x1a7   :  { %2071 = vrot.lane.b32.xlu0 %v3193_v47, %s2975_s5 }
 0x1ab   :  { %2186 = vrot.lane.b32.xlu0 %v3193_v47, %s2974_s8 }
 0x1f5   :  { %v596_v59 = vpop.permute.xlu0 %595 }
 0x1f6   :  { %v601_v61 = vsel %vm485_vm9, %v596_v59, 0 }
 0x1f9   :  { %v827_v16 = vpop.permute.xlu0 %826 }
 0x1fa   :  { %v832_v18 = vsel %vm485_vm9, %v827_v16, 0 }
 0x1fd   :  { %v1051_v22 = vpop.permute.xlu0 %1050 }
 0x1fe   :  { %v1056_v23 = vsel %vm485_vm9, %v1051_v22, 0 }
 0x201   :  { %v1168_v24 = vpop.permute.xlu0 %1167 }
 0x202   :  { %v1173_v20 = vsel %vm485_vm9, %v1168_v24, 0 }
 0x205   :  { %v1284_v26 = vpop.permute.xlu0 %1283 }
 0x206   :  { %v1289_v13 = vsel %vm485_vm9, %v1284_v26, 0 }
 0x209   :  { %v1505_v29 = vpop.permute.xlu0 %1504 }
 0x20a   :  { %v1510_v32 = vsel %vm485_vm9, %v1505_v29, 0 }
 0x20d   :  { %v1620_v30 = vpop.permute.xlu0 %1619 }
 0x20e   :  { %v1625_v33 = vsel %vm485_vm9, %v1620_v30, 0 }
 0x211   :  { %v1734_v37 = vpop.permute.xlu0 %1733 }
 0x212   :  { %v1739_v38 = vsel %vm485_vm9, %v1734_v37, 0 }
 0x215   :  { %v1956_v40 = vpop.permute.xlu0 %1955 }
 0x216   :  { %v1961_v41 = vsel %vm485_vm9, %v1956_v40, 0 }
 0x219   :  { %v2072_v42 = vpop.permute.xlu0 %2071 }
 0x21a   :  { %v2077_v47 = vsel %vm485_vm9, %v2072_v42, 0 }
 0x24c   :  { %v2565_v49 = vpop.f32.mrb[0].mxu0 }
 0x24d   :  { %v244_v51 = vpop.f32.mrb[1].mxu0  ;;  %v253_v53 = vadd.f32 %v2565_v49, %v2415_v50 }
 0x24e   :  { %v2566_v52 = vpop.f32.mrb[2].mxu0  ;;  %v245_v56 = vadd.f32 %v2415_v50, %v244_v51 }
 0x24f   :  { %v256_v54 = vadd.f32 %v2566_v52, %v2415_v50  ;;  %v247_v55 = vpop.f32.mrb[3].mxu0 }
 0x250   :  { %v248_v57 = vadd.f32 %v2415_v50, %v247_v55  ;;  %v2187_v50 = vpop.permute.xlu0 %2186 }
 0x251   :  { %v3212_v58 = vpack.c.bf16 %v256_v54, %v253_v53  ;;  %v2192_v51 = vsel %vm485_vm9, %v2187_v50, 0 }
 0x252   :  { %v259_v60 = vpack.c.bf16 %v248_v57, %v245_v56 }
 0x253   :  { %v3233_v63 = vrot.slane %v3212_v58, 4 }
 0x254   :  { %592 = vrot.lane.b32.xlu1 %v259_v60, %s2973_s17  ;;  %2594 = vmatmul.mubr.msk.bf16.vlgmr.msra.gmra.mrb[8].mxu1 %vm485_vm9, %v259_v60  ;;  %v939_v62 = vrot.slane %v259_v60, 4  ;;  %v2585_v0 = vpop.f32.mrb[4].mxu0 }
 0x255   :  { %2604 = vmatpush3.bf16.xpose.msra.mxu1 %v601_v61  ;;  %2605 = vmatprep.mubr.msk.bf16.mxu1 %vm2977_vm10, %v2976_v34  ;;  %v459_v2 = vadd.f32 %v2585_v0, %v3240_v1  ;;  %v450_v3 = vpop.f32.mrb[5].mxu0 }
 0x256   :  { %2615 = vmatprep.subr.bf16.mxu1 %v2976_v34  ;;  %v451_v4 = vadd.f32 %v3240_v1, %v450_v3  ;;  %v2586_v5 = vpop.f32.mrb[6].mxu0 }
 0x257   :  { %v462_v6 = vadd.f32 %v2586_v5, %v3240_v1  ;;  %v453_v7 = vpop.f32.mrb[7].mxu0 }
 0x258   :  { %711 = vrot.lane.b32.xlu1 %v389_v31, %s2975_s5  ;;  %v454_v8 = vadd.f32 %v3240_v1, %v453_v7 }
 0x259   :  { %v3248_v9 = vpack.c.bf16 %v462_v6, %v459_v2 }
 0x25a   :  { %v481_v10 = vpack.c.bf16 %v454_v8, %v451_v4 }
 0x25c   :  { %709 = vrot.lane.b32.xlu1 %v259_v60, %s2975_s5  ;;  %771 = vrot.lane.b32.xlu0 %v481_v10, %s2975_s5 }
 0x25d   :  { %2598 = vmatpush3.bf16.msra.mxu0 %v481_v10 }
 0x25e   :  { %2609 = vmatprep.subr.bf16.mxu0 %v2976_v34 }
 0x260   :  { %824 = vrot.lane.b32.xlu1 %v259_v60, %s2974_s8  ;;  %886 = vrot.lane.b32.xlu0 %v481_v10, %s2974_s8 }
 0x264   :  { %1047 = vrot.lane.b32.xlu1 %v939_v62, %s2973_s17 }
 0x268   :  { %1165 = vrot.lane.b32.xlu1 %v939_v62, %s2975_s5 }
 0x26c   :  { %1281 = vrot.lane.b32.xlu1 %v939_v62, %s2974_s8 }
 0x270   :  { %1501 = vrot.lane.b32.xlu1 %v3212_v58, %s2973_s17 }
 0x274   :  { %1617 = vrot.lane.b32.xlu1 %v3212_v58, %s2975_s5 }
 0x278   :  { %1731 = vrot.lane.b32.xlu1 %v3212_v58, %s2974_s8 }
 0x27c   :  { %1952 = vrot.lane.b32.xlu1 %v3233_v63, %s2973_s17 }
 0x280   :  { %2069 = vrot.lane.b32.xlu1 %v3233_v63, %s2975_s5 }
 0x284   :  { %2184 = vrot.lane.b32.xlu1 %v3233_v63, %s2974_s8 }
 0x288   :  { %656 = vrot.lane.b32.xlu1 %v481_v10, %s2973_s17 }
 0x2c6   :  { %v593_v11 = vpop.permute.xlu1 %592 }
 0x2c7   :  { %2606 = vmatmul.mubr.msk.bf16.vlgmr.msra.gmra.mrb[12].mxu1 %vm485_vm9, %v593_v11 }
 0x2c8   :  { %2617 = vmatprep.mubr.msk.bf16.mxu1 %vm2977_vm10, %v2976_v34 }
 0x2ca   :  { %v712_v14 = vpop.permute.xlu1 %711 }
 0x2cb   :  { %v717_v15 = vsel %vm485_vm9, %v712_v14, 0 }
 0x2cc   :  { %2616 = vmatpush3.bf16.xpose.msra.mxu1 %v717_v15 }
 0x2cd   :  { %2627 = vmatprep.subr.bf16.mxu1 %v2976_v34 }
 0x2ce   :  { %v710_v17 = vpop.permute.xlu1 %709 }
 0x2d2   :  { %v825_v19 = vpop.permute.xlu1 %824 }
 0x2d3   :  { %2618 = vmatmul.mubr.msk.bf16.vlgmr.msra.gmra.mrb[16].mxu1 %vm485_vm9, %v710_v17 }
 0x2d4   :  { %2628 = vmatpush3.bf16.xpose.msra.mxu1 %v832_v18  ;;  %2629 = vmatprep.mubr.msk.bf16.mxu1 %vm2977_vm10, %v2976_v34 }
 0x2d5   :  { %2639 = vmatprep.subr.bf16.mxu1 %v2976_v34 }
 0x2d6   :  { %v1048_v25 = vpop.permute.xlu1 %1047 }
 0x2da   :  { %v1166_v27 = vpop.permute.xlu1 %1165 }
 0x2db   :  { %2630 = vmatmul.mubr.msk.bf16.vlgmr.msra.gmra.mrb[20].mxu1 %vm485_vm9, %v825_v19 }
 0x2dc   :  { %2640 = vmatpush3.bf16.xpose.msra.mxu1 %v944_v12  ;;  %2641 = vmatprep.mubr.msk.bf16.mxu1 %vm2977_vm10, %v2976_v34 }
 0x2dd   :  { %2651 = vmatprep.subr.bf16.mxu1 %v2976_v34 }
 0x2de   :  { %v1282_v21 = vpop.permute.xlu1 %1281 }
 0x2e2   :  { %v1502_v36 = vpop.permute.xlu1 %1501 }
 0x2e3   :  { %2642 = vmatmul.mubr.msk.bf16.vlgmr.msra.gmra.mrb[24].mxu1 %vm485_vm9, %v939_v62 }
 0x2e4   :  { %2652 = vmatpush3.bf16.xpose.msra.mxu1 %v1056_v23  ;;  %2653 = vmatprep.mubr.msk.bf16.mxu1 %vm2977_vm10, %v2976_v34 }
 0x2e5   :  { %2663 = vmatprep.subr.bf16.mxu1 %v2976_v34 }
 0x2e6   :  { %v1618_v31 = vpop.permute.xlu1 %1617 }
 0x2ea   :  { %v1732_v35 = vpop.permute.xlu1 %1731 }
 0x2eb   :  { %2654 = vmatmul.mubr.msk.bf16.vlgmr.msra.gmra.mrb[28].mxu1 %vm485_vm9, %v1048_v25 }
 0x2ec   :  { %2664 = vmatpush3.bf16.xpose.msra.mxu1 %v1173_v20  ;;  %2665 = vmatprep.mubr.msk.bf16.mxu1 %vm2977_vm10, %v2976_v34  ;;  %v3361_v20 = vpop.permute.xlu0 %771 }
 0x2ed   :  { %2675 = vmatprep.subr.bf16.mxu1 %v2976_v34 }
 0x2ee   :  { %v1953_v48 = vpop.permute.xlu1 %1952 }
 0x2f2   :  { %v2070_v52 = vpop.permute.xlu1 %2069 }
 0x2f3   :  { %2666 = vmatmul.mubr.msk.bf16.vlgmr.msra.gmra.mrb[32].mxu1 %vm485_vm9, %v1166_v27 }
 0x2f4   :  { %2676 = vmatpush3.bf16.xpose.msra.mxu1 %v1289_v13  ;;  %2677 = vmatprep.mubr.msk.bf16.mxu1 %vm2977_vm10, %v2976_v34  ;;  %v3365_v13 = vpop.permute.xlu0 %886 }
 0x2f5   :  { %2687 = vmatprep.subr.bf16.mxu1 %v2976_v34 }
 0x2f6   :  { %v2185_v53 = vpop.permute.xlu1 %2184 }
 0x2fb   :  { %2678 = vmatmul.mubr.msk.bf16.vlgmr.msra.gmra.mrb[36].mxu1 %vm485_vm9, %v1282_v21 }
 0x2fc   :  { %2688 = vmatpush3.bf16.xpose.msra.mxu1 %v1401_v28  ;;  %2689 = vmatprep.mubr.msk.bf16.mxu1 %vm2977_vm10, %v2976_v34 }
 0x2fd   :  { %2699 = vmatprep.subr.bf16.mxu1 %v2976_v34 }
 0x303   :  { %2690 = vmatmul.mubr.msk.bf16.vlgmr.msra.gmra.mrb[40].mxu1 %vm485_vm9, %v3212_v58 }
 0x304   :  { %2700 = vmatpush3.bf16.xpose.msra.mxu1 %v1510_v32  ;;  %2701 = vmatprep.mubr.msk.bf16.mxu1 %vm2977_vm10, %v2976_v34 }
 0x305   :  { %2711 = vmatprep.subr.bf16.mxu1 %v2976_v34 }
 0x30b   :  { %2702 = vmatmul.mubr.msk.bf16.vlgmr.msra.gmra.mrb[44].mxu1 %vm485_vm9, %v1502_v36  ;;  %v2589_v36 = vpop.f32.mrb[8].mxu0 }
 0x30c   :  { %2712 = vmatpush3.bf16.xpose.msra.mxu1 %v1625_v33  ;;  %2713 = vmatprep.mubr.msk.bf16.mxu1 %vm2977_vm10, %v2976_v34 }
 0x30d   :  { %2723 = vmatprep.subr.bf16.mxu1 %v2976_v34 }
 0x313   :  { %2714 = vmatmul.mubr.msk.bf16.vlgmr.msra.gmra.mrb[48].mxu1 %vm485_vm9, %v1618_v31  ;;  %v475_v31 = vadd.f32 %v2589_v36, %v3240_v1 }
 0x314   :  { %2724 = vmatpush3.bf16.xpose.msra.mxu1 %v1739_v38  ;;  %2725 = vmatprep.mubr.msk.bf16.mxu1 %vm2977_vm10, %v2976_v34 }
 0x315   :  { %2735 = vmatprep.subr.bf16.mxu1 %v2976_v34 }
 0x31b   :  { %2726 = vmatmul.mubr.msk.bf16.vlgmr.msra.gmra.mrb[52].mxu1 %vm485_vm9, %v1732_v35  ;;  %v466_v35 = vpop.f32.mrb[9].mxu0 }
 0x31c   :  { %2736 = vmatpush3.bf16.xpose.msra.mxu1 %v1850_v39  ;;  %2737 = vmatprep.mubr.msk.bf16.mxu1 %vm2977_vm10, %v2976_v34  ;;  %v467_v40 = vadd.f32 %v3240_v1, %v466_v35 }
 0x31d   :  { %2747 = vmatprep.subr.bf16.mxu1 %v2976_v34 }
 0x323   :  { %2738 = vmatmul.mubr.msk.bf16.vlgmr.msra.gmra.mrb[56].mxu1 %vm485_vm9, %v3233_v63 }
 0x324   :  { %2748 = vmatpush3.bf16.xpose.msra.mxu1 %v1961_v41  ;;  %2749 = vmatprep.mubr.msk.bf16.mxu1 %vm2977_vm10, %v2976_v34  ;;  %v2590_v41 = vpop.f32.mrb[10].mxu0 }
 0x325   :  { %2759 = vmatprep.subr.bf16.mxu1 %v2976_v34 }
 0x327   :  { %v3321_v43 = vpop.f32.mrb[8].mxu1 }
 0x328   :  { %v2595_v44 = vpop.f32.mrb[9].mxu1  ;;  %v533_v45 = vsel %vm532_vm11, %v3321_v43, -inf }
 0x329   :  { %534 = vmax.xlane.f32.xlu0 %v533_v45  ;;  %v529_v46 = vpop.f32.mrb[10].mxu1  ;;  %v478_v44 = vadd.f32 %v2590_v41, %v3240_v1  ;;  %v469_v45 = vpop.f32.mrb[11].mxu0 }
 0x32a   :  { %v2596_v49 = vpop.f32.mrb[11].mxu1  ;;  %v470_v46 = vadd.f32 %v3240_v1, %v469_v45 }
 0x32b   :  { %2750 = vmatmul.mubr.msk.bf16.vlgmr.msra.gmra.mrb[60].mxu1 %vm485_vm9, %v1953_v48  ;;  %v3376_v48 = vpack.c.bf16 %v478_v44, %v475_v31 }
 0x32c   :  { %2760 = vmatpush3.bf16.xpose.msra.mxu1 %v2077_v47  ;;  %2761 = vmatprep.mubr.msk.bf16.mxu1 %vm2977_vm10, %v2976_v34  ;;  %v3378_v49 = vpack.c.bf16 %v470_v46, %v467_v40 }
 0x32d   :  { %2771 = vmatprep.subr.bf16.mxu1 %v2976_v34 }
 0x333   :  { %2762 = vmatmul.mubr.msk.bf16.vlgmr.msra.gmra.mrb[64].mxu1 %vm485_vm9, %v2070_v52 }
 0x334   :  { %2772 = vmatpush3.bf16.xpose.msra.mxu1 %v2192_v51  ;;  %2773 = vmatprep.mubr.msk.bf16.mxu1 %vm2977_vm10, %v2976_v34 }
 0x33b   :  { %2774 = vmatmul.mubr.msk.bf16.vlgmr.msra.gmra.mrb[68].mxu1 %vm485_vm9, %v2185_v53 }
 0x39a   :  { %v3335_v54 = vpop.f32.mrb[12].mxu1 }
 0x39b   :  { %v2607_v55 = vpop.f32.mrb[13].mxu1  ;;  %v643_v56 = vsel %vm532_vm11, %v3335_v54, -inf }
 0x39c   :  { %644 = vmax.xlane.f32.xlu1 %v643_v56  ;;  %v640_v57 = vpop.f32.mrb[14].mxu1 }
 0x39d   :  { %v2608_v58 = vpop.f32.mrb[15].mxu1 }
 0x3a6   :  { %v3339_v59 = vpop.f32.mrb[16].mxu1 }
 0x3a7   :  { %v2619_v60 = vpop.f32.mrb[17].mxu1  ;;  %v759_v61 = vsel %vm532_vm11, %v3339_v59, -inf }
 0x3a8   :  { %760 = vmax.xlane.f32.xlu0 %v759_v61  ;;  %v756_v62 = vpop.f32.mrb[18].mxu1 }
 0x3a9   :  { %v2620_v63 = vpop.f32.mrb[19].mxu1 }
 0x3ae   :  { %v3343_v0 = vpop.f32.mrb[20].mxu1 }
 0x3af   :  { %v2631_v2 = vpop.f32.mrb[21].mxu1  ;;  %v874_v3 = vsel %vm532_vm11, %v3343_v0, -inf }
 0x3b0   :  { %875 = vmax.xlane.f32.xlu0 %v874_v3  ;;  %v871_v4 = vpop.f32.mrb[22].mxu1 }
 0x3b1   :  { %v2632_v5 = vpop.f32.mrb[23].mxu1 }
 0x3b6   :  { %v3347_v6 = vpop.f32.mrb[24].mxu1  ;;  %v535_v30 = vpop.xlane.xlu0 %534 }
 0x3b7   :  { %v2643_v7 = vpop.f32.mrb[25].mxu1  ;;  %v986_v8 = vsel %vm532_vm11, %v3347_v6, -inf  ;;  %v536_v37 = vsub.f32 %v3321_v43, %v535_v30 }
 0x3b8   :  { %987 = vmax.xlane.f32.xlu0 %v986_v8  ;;  %v983_v10 = vpop.f32.mrb[26].mxu1 }
 0x3b9   :  { %v2644_v11 = vpop.f32.mrb[27].mxu1  ;;  %v537_v47 = vmul.f32 1.442695, %v536_v37 }
 0x3bb   :  { %2833 = vpow2.f32 %v537_v47 }
 0x3be   :  { %v3351_v14 = vpop.f32.mrb[28].mxu1 }
 0x3bf   :  { %v2655_v15 = vpop.f32.mrb[29].mxu1  ;;  %v1098_v16 = vsel %vm532_vm11, %v3351_v14, -inf }
 0x3c0   :  { %1099 = vmax.xlane.f32.xlu1 %v1098_v16  ;;  %v1095_v17 = vpop.f32.mrb[30].mxu1 }
 0x3c1   :  { %v2656_v18 = vpop.f32.mrb[31].mxu1 }
 0x3c5   :  { %v3386_v1 = vpop.eup %2833 }
 0x3c6   :  { %v3355_v19 = vpop.f32.mrb[32].mxu1  ;;  %v539_v60 = vsel %vm532_vm11, %v3386_v1, 0.0 }
 0x3c7   :  { %v2667_v12 = vpop.f32.mrb[33].mxu1  ;;  %v1215_v53 = vsel %vm532_vm11, %v3355_v19, -inf }
 0x3c8   :  { %v1212_v22 = vpop.f32.mrb[34].mxu1 }
 0x3c9   :  { %v2668_v23 = vpop.f32.mrb[35].mxu1 }
 0x3ce   :  { %1227 = vrot.lane.b32.xlu0 %v3248_v9, %s2975_s5  ;;  %v3359_v24 = vpop.f32.mrb[36].mxu1 }
 0x3cf   :  { %v2679_v25 = vpop.f32.mrb[37].mxu1  ;;  %v1331_v2 = vsel %vm532_vm11, %v3359_v24, -inf }
 0x3d0   :  { %v1328_v26 = vpop.f32.mrb[38].mxu1 }
 0x3d1   :  { %1111 = vrot.lane.b32.xlu1 %v3248_v9, %s2973_s17  ;;  %v2680_v27 = vpop.f32.mrb[39].mxu1  ;;  %v3406_v26 = vpop.permute.xlu1 %656 }
 0x3d6   :  { %v3367_v21 = vpop.f32.mrb[40].mxu1 }
 0x3d7   :  { %v2691_v28 = vpop.f32.mrb[41].mxu1  ;;  %v1443_v25 = vsel %vm532_vm11, %v3367_v21, -inf }
 0x3d8   :  { %v1440_v29 = vpop.f32.mrb[42].mxu1 }
 0x3d9   :  { %v2692_v32 = vpop.f32.mrb[43].mxu1 }
 0x3de   :  { %v3369_v33 = vpop.f32.mrb[44].mxu1 }
 0x3df   :  { %v2703_v38 = vpop.f32.mrb[45].mxu1  ;;  %v1552_v4 = vsel %vm532_vm11, %v3369_v33, -inf }
 0x3e0   :  { %v1549_v39 = vpop.f32.mrb[46].mxu1 }
 0x3e1   :  { %v2704_v42 = vpop.f32.mrb[47].mxu1 }
 0x3e6   :  { %v3380_v43 = vpop.f32.mrb[48].mxu1 }
 0x3e7   :  { %v2715_v50 = vpop.f32.mrb[49].mxu1  ;;  %v1667_v27 = vsel %vm532_vm11, %v3380_v43, -inf }
 0x3e8   :  { %v1664_v51 = vpop.f32.mrb[50].mxu1 }
 0x3e9   :  { %v2716_v52 = vpop.f32.mrb[51].mxu1 }
 0x3ed   :  { %1216 = vmax.xlane.f32.xlu0 %v1215_v53 }
 0x3ee   :  { %v3384_v55 = vpop.f32.mrb[52].mxu1 }
 0x3ef   :  { %v2727_v56 = vpop.f32.mrb[53].mxu1  ;;  %v1781_v29 = vsel %vm532_vm11, %v3384_v55, -inf }
 0x3f0   :  { %v1778_v57 = vpop.f32.mrb[54].mxu1 }
 0x3f1   :  { %v2728_v58 = vpop.f32.mrb[55].mxu1 }
 0x3f5   :  { %540 = vadd.xlane.f32.xlu1 %v539_v60 }
 0x3f6   :  { %v3390_v61 = vpop.f32.mrb[56].mxu1 }
 0x3f7   :  { %v2739_v62 = vpop.f32.mrb[57].mxu1  ;;  %v1892_v36 = vsel %vm532_vm11, %v3390_v61, -inf }
 0x3f8   :  { %v1889_v63 = vpop.f32.mrb[58].mxu1 }
 0x3f9   :  { %v2740_v3 = vpop.f32.mrb[59].mxu1  ;;  %1332 = vmax.xlane.f32.xlu1 %v1331_v2 }
 0x3fd   :  { %1553 = vmax.xlane.f32.xlu1 %v1552_v4 }
 0x3fe   :  { %v3396_v5 = vpop.f32.mrb[60].mxu1 }
 0x3ff   :  { %v2751_v7 = vpop.f32.mrb[61].mxu1  ;;  %v2003_v37 = vsel %vm532_vm11, %v3396_v5, -inf }
 0x400   :  { %v2000_v8 = vpop.f32.mrb[62].mxu1 }
 0x401   :  { %v2752_v10 = vpop.f32.mrb[63].mxu1 }
 0x403   :  { %1343 = vrot.lane.b32.xlu0 %v3248_v9, %s2974_s8 }
 0x406   :  { %v3400_v11 = vpop.f32.mrb[64].mxu1 }
 0x407   :  { %v2763_v15 = vpop.f32.mrb[65].mxu1  ;;  %v2119_v31 = vsel %vm532_vm11, %v3400_v11, -inf }
 0x408   :  { %v2116_v16 = vpop.f32.mrb[66].mxu1 }
 0x409   :  { %v2764_v17 = vpop.f32.mrb[67].mxu1 }
 0x40e   :  { %v3402_v18 = vpop.f32.mrb[68].mxu1 }
 0x40f   :  { %v2775_v12 = vpop.f32.mrb[69].mxu1  ;;  %v2234_v40 = vsel %vm532_vm11, %v3402_v18, -inf }
 0x410   :  { %v2231_v22 = vpop.f32.mrb[70].mxu1 }
 0x411   :  { %v2776_v23 = vpop.f32.mrb[71].mxu1 }
 0x422   :  { %1444 = vmax.xlane.f32.xlu0 %v1443_v25 }
 0x426   :  { %1668 = vmax.xlane.f32.xlu0 %v1667_v27 }
 0x429   :  { %v645_v28 = vpop.xlane.xlu1 %644 }
 0x42a   :  { %v646_v32 = vsub.f32 %v3335_v54, %v645_v28  ;;  %1782 = vmax.xlane.f32.xlu0 %v1781_v29 }
 0x42c   :  { %v647_v30 = vmul.f32 1.442695, %v646_v32 }
 0x42e   :  { %2835 = vpow2.f32 %v647_v30  ;;  %1893 = vmax.xlane.f32.xlu0 %v1892_v36 }
 0x432   :  { %2004 = vmax.xlane.f32.xlu0 %v2003_v37 }
 0x435   :  { %v761_v38 = vpop.xlane.xlu0 %760 }
 0x436   :  { %v762_v35 = vsub.f32 %v3339_v59, %v761_v38  ;;  %2120 = vmax.xlane.f32.xlu0 %v2119_v31 }
 0x438   :  { %v3420_v39 = vpop.eup %2835  ;;  %v763_v54 = vmul.f32 1.442695, %v762_v35 }
 0x439   :  { %v649_v41 = vsel %vm532_vm11, %v3420_v39, 0.0 }
 0x43a   :  { %2837 = vpow2.f32 %v763_v54  ;;  %2235 = vmax.xlane.f32.xlu0 %v2234_v40  ;;  %650 = vadd.xlane.f32.xlu1 %v649_v41 }
 0x43d   :  { %v876_v42 = vpop.xlane.xlu0 %875 }
 0x43e   :  { %v877_v44 = vsub.f32 %v3343_v0, %v876_v42 }
 0x440   :  { %v878_v45 = vmul.f32 1.442695, %v877_v44 }
 0x442   :  { %2839 = vpow2.f32 %v878_v45 }
 0x444   :  { %v3427_v46 = vpop.eup %2837 }
 0x445   :  { %v988_v59 = vpop.xlane.xlu0 %987  ;;  %v765_v47 = vsel %vm532_vm11, %v3427_v46, 0.0 }
 0x446   :  { %v989_v50 = vsub.f32 %v3347_v6, %v988_v59  ;;  %766 = vadd.xlane.f32.xlu1 %v765_v47 }
 0x448   :  { %v990_v51 = vmul.f32 1.442695, %v989_v50 }
 0x44a   :  { %2841 = vpow2.f32 %v990_v51 }
 0x44c   :  { %v3432_v52 = vpop.eup %2839 }
 0x44d   :  { %v1100_v53 = vpop.xlane.xlu1 %1099  ;;  %v880_v56 = vsel %vm532_vm11, %v3432_v52, 0.0 }
 0x44e   :  { %v1101_v0 = vsub.f32 %v3351_v14, %v1100_v53  ;;  %881 = vadd.xlane.f32.xlu1 %v880_v56  ;;  %v3449_v14 = vpop.permute.xlu0 %1227 }
 0x450   :  { %v1102_v57 = vmul.f32 1.442695, %v1101_v0 }
 0x451   :  { %v3452_v4 = vpop.permute.xlu1 %1111 }
 0x452   :  { %2843 = vpow2.f32 %v1102_v57 }
 0x454   :  { %v3437_v58 = vpop.eup %2841 }
 0x455   :  { %v992_v60 = vsel %vm532_vm11, %v3437_v58, 0.0 }
 0x456   :  { %993 = vadd.xlane.f32.xlu1 %v992_v60 }
 0x45c   :  { %v3441_v6 = vpop.eup %2843 }
 0x45d   :  { %v1104_v62 = vsel %vm532_vm11, %v3441_v6, 0.0 }
 0x45e   :  { %1105 = vadd.xlane.f32.xlu0 %v1104_v62 }
 0x467   :  { %1565 = vrot.lane.b32.xlu1 %v3378_v49, %s2973_s17 }
 0x474   :  { %1679 = vrot.lane.b32.xlu0 %v3378_v49, %s2975_s5 }
 0x47a   :  { %v1217_v63 = vpop.xlane.xlu0 %1216 }
 0x47b   :  { %v1218_v2 = vsub.f32 %v3355_v19, %v1217_v63 }
 0x47d   :  { %v1219_v3 = vmul.f32 1.442695, %v1218_v2 }
 0x47e   :  { %v3474_v29 = vpop.permute.xlu0 %1343 }
 0x47f   :  { %2845 = vpow2.f32 %v1219_v3 }
 0x482   :  { %v541_v7 = vpop.xlane.xlu1 %540 }
 0x483   :  { %2847 = vrcp.f32 %v541_v7 }
 0x486   :  { %v1333_v8 = vpop.xlane.xlu1 %1332 }
 0x487   :  { %v1334_v10 = vsub.f32 %v3359_v24, %v1333_v8 }
 0x489   :  { %v3455_v15 = vpop.eup %2845  ;;  %v1335_v16 = vmul.f32 1.442695, %v1334_v10 }
 0x48a   :  { %v1554_v17 = vpop.xlane.xlu1 %1553  ;;  %v1221_v12 = vsel %vm532_vm11, %v3455_v15, 0.0 }
 0x48b   :  { %2849 = vpow2.f32 %v1335_v16  ;;  %v1555_v22 = vsub.f32 %v3369_v33, %v1554_v17  ;;  %1222 = vadd.xlane.f32.xlu1 %v1221_v12 }
 0x48d   :  { %v2848_v19 = vpop.eup %2847  ;;  %v1556_v23 = vmul.f32 1.442695, %v1555_v22 }
 0x48e   :  { %v543_v25 = vmul.f32 %v2848_v19, %v3386_v1 }
 0x48f   :  { %2851 = vpow2.f32 %v1556_v23 }
 0x490   :  { %v544_v27 = vpack.c.bf16 %v543_v25, %v543_v25 }
 0x492   :  { %2600 = vmatmul.mubr.msk.bf16.vlgmr.msra.gmra.mrb[12].mxu0 %vm532_vm11, %v544_v27 }
 0x493   :  { %2610 = vmatpush3.bf16.msra.mxu0 %v3406_v26  ;;  %2611 = vmatprep.mubr.msk.bf16.mxu0 %vm2977_vm10, %v2976_v34 }
 0x494   :  { %2621 = vmatprep.subr.bf16.mxu0 %v2976_v34 }
 0x495   :  { %v3466_v24 = vpop.eup %2849 }
 0x496   :  { %v1337_v33 = vsel %vm532_vm11, %v3466_v24, 0.0 }
 0x497   :  { %1338 = vadd.xlane.f32.xlu0 %v1337_v33 }
 0x499   :  { %v3470_v28 = vpop.eup %2851 }
 0x49a   :  { %v1558_v1 = vsel %vm532_vm11, %v3470_v28, 0.0 }
 0x49b   :  { %1559 = vadd.xlane.f32.xlu0 %v1558_v1 }
 0x4af   :  { %v1445_v26 = vpop.xlane.xlu0 %1444 }
 0x4b0   :  { %v1446_v32 = vsub.f32 %v3367_v21, %v1445_v26 }
 0x4b2   :  { %v1447_v30 = vmul.f32 1.442695, %v1446_v32 }
 0x4b3   :  { %v1669_v36 = vpop.xlane.xlu0 %1668 }
 0x4b4   :  { %2853 = vpow2.f32 %v1447_v30  ;;  %v1670_v37 = vsub.f32 %v3380_v43, %v1669_v36 }
 0x4b6   :  { %v1671_v38 = vmul.f32 1.442695, %v1670_v37 }
 0x4b7   :  { %v1783_v31 = vpop.xlane.xlu0 %1782 }
 0x4b8   :  { %2855 = vpow2.f32 %v1671_v38  ;;  %v1784_v35 = vsub.f32 %v3384_v55, %v1783_v31 }
 0x4ba   :  { %v1785_v54 = vmul.f32 1.442695, %v1784_v35 }
 0x4bb   :  { %v1894_v40 = vpop.xlane.xlu0 %1893 }
 0x4bc   :  { %2857 = vpow2.f32 %v1785_v54  ;;  %v1895_v41 = vsub.f32 %v3390_v61, %v1894_v40 }
 0x4be   :  { %v3480_v42 = vpop.eup %2853  ;;  %v1896_v44 = vmul.f32 1.442695, %v1895_v41 }
 0x4bf   :  { %v2005_v45 = vpop.xlane.xlu0 %2004  ;;  %v1449_v21 = vsel %vm532_vm11, %v3480_v42, 0.0 }
 0x4c0   :  { %2859 = vpow2.f32 %v1896_v44  ;;  %v2006_v43 = vsub.f32 %v3396_v5, %v2005_v45  ;;  %1450 = vadd.xlane.f32.xlu1 %v1449_v21 }
 0x4c2   :  { %v3485_v59 = vpop.eup %2855  ;;  %v2007_v47 = vmul.f32 1.442695, %v2006_v43 }
 0x4c3   :  { %v1673_v55 = vsel %vm532_vm11, %v3485_v59, 0.0 }
 0x4c4   :  { %2861 = vpow2.f32 %v2007_v47  ;;  %1674 = vadd.xlane.f32.xlu1 %v1673_v55 }
 0x4c6   :  { %v3489_v61 = vpop.eup %2857 }
 0x4c7   :  { %v651_v50 = vpop.xlane.xlu1 %650  ;;  %v1787_v51 = vsel %vm532_vm11, %v3489_v61, 0.0 }
 0x4c8   :  { %1788 = vadd.xlane.f32.xlu0 %v1787_v51  ;;  %2863 = vrcp.f32 %v651_v50 }
 0x4ca   :  { %v3493_v53 = vpop.eup %2859 }
 0x4cb   :  { %v1898_v5 = vsel %vm532_vm11, %v3493_v53, 0.0 }
 0x4cc   :  { %1899 = vadd.xlane.f32.xlu1 %v1898_v5 }
 0x4ce   :  { %v3497_v56 = vpop.eup %2861 }
 0x4cf   :  { %v2009_v0 = vsel %vm532_vm11, %v3497_v56, 0.0 }
 0x4d0   :  { %2010 = vadd.xlane.f32.xlu0 %v2009_v0 }
 0x4d2   :  { %v2864_v57 = vpop.eup %2863 }
 0x4d3   :  { %v767_v60 = vpop.xlane.xlu1 %766  ;;  %v653_v62 = vmul.f32 %v2864_v57, %v3420_v39  ;;  %v2121_v39 = vpop.xlane.xlu0 %2120 }
 0x4d4   :  { %2865 = vrcp.f32 %v767_v60  ;;  %v2122_v12 = vsub.f32 %v3400_v11, %v2121_v39 }
 0x4d5   :  { %v654_v63 = vpack.c.bf16 %v653_v62, %v653_v62 }
 0x4d6   :  { %v2123_v19 = vmul.f32 1.442695, %v2122_v12 }
 0x4d7   :  { %2612 = vmatmul.mubr.msk.bf16.vlgmr.msra.gmra.mrb[16].mxu0 %vm532_vm11, %v654_v63  ;;  %v2236_v16 = vpop.xlane.xlu0 %2235 }
 0x4d8   :  { %2622 = vmatpush3.bf16.msra.mxu0 %v3361_v20  ;;  %2623 = vmatprep.mubr.msk.bf16.mxu0 %vm2977_vm10, %v2976_v34  ;;  %v2237_v23 = vsub.f32 %v3402_v18, %v2236_v16 }
 0x4d9   :  { %2633 = vmatprep.subr.bf16.mxu0 %v2976_v34 }
 0x4da   :  { %v2238_v11 = vmul.f32 1.442695, %v2237_v23 }
 0x4db   :  { %v882_v2 = vpop.xlane.xlu1 %881 }
 0x4dc   :  { %2867 = vrcp.f32 %v882_v2 }
 0x4dd   :  { %2016 = vrot.lane.b32.xlu1 %v3376_v48, %s2973_s17 }
 0x4de   :  { %v2866_v3 = vpop.eup %2865 }
 0x4df   :  { %v769_v7 = vmul.f32 %v2866_v3, %v3427_v46 }
 0x4e1   :  { %v770_v8 = vpack.c.bf16 %v769_v7, %v769_v7 }
 0x4e3   :  { %2624 = vmatmul.mubr.msk.bf16.vlgmr.msra.gmra.mrb[20].mxu0 %vm532_vm11, %v770_v8  ;;  %v994_v10 = vpop.xlane.xlu1 %993 }
 0x4e4   :  { %2634 = vmatpush3.bf16.msra.mxu0 %v3365_v13  ;;  %2869 = vrcp.f32 %v994_v10  ;;  %2635 = vmatprep.mubr.msk.bf16.mxu0 %vm2977_vm10, %v2976_v34 }
 0x4e5   :  { %2645 = vmatprep.subr.bf16.mxu0 %v2976_v34 }
 0x4e6   :  { %v2868_v20 = vpop.eup %2867  ;;  %1793 = vrot.lane.b32.xlu0 %v3378_v49, %s2974_s8 }
 0x4e7   :  { %v884_v46 = vmul.f32 %v2868_v20, %v3432_v52 }
 0x4e9   :  { %v885_v17 = vpack.c.bf16 %v884_v46, %v884_v46 }
 0x4eb   :  { %2636 = vmatmul.mubr.msk.bf16.vlgmr.msra.gmra.mrb[24].mxu0 %vm532_vm11, %v885_v17  ;;  %v1106_v22 = vpop.xlane.xlu0 %1105 }
 0x4ec   :  { %2646 = vmatpush3.bf16.msra.mxu0 %v3248_v9  ;;  %2871 = vrcp.f32 %v1106_v22  ;;  %2647 = vmatprep.mubr.msk.bf16.mxu0 %vm2977_vm10, %v2976_v34 }
 0x4ed   :  { %2657 = vmatprep.subr.bf16.mxu0 %v2976_v34  ;;  %2873 = vpow2.f32 %v2123_v19 }
 0x4ee   :  { %v2870_v13 = vpop.eup %2869  ;;  %2875 = vpow2.f32 %v2238_v11 }
 0x4ef   :  { %v996_v52 = vmul.f32 %v2870_v13, %v3437_v58  ;;  %v1680_v26 = vpop.permute.xlu0 %1679 }
 0x4f1   :  { %v997_v25 = vpack.c.bf16 %v996_v52, %v996_v52 }
 0x4f3   :  { %2648 = vmatmul.mubr.msk.bf16.vlgmr.msra.gmra.mrb[28].mxu0 %vm532_vm11, %v997_v25 }
 0x4f4   :  { %2658 = vmatpush3.bf16.msra.mxu0 %v3452_v4  ;;  %2659 = vmatprep.mubr.msk.bf16.mxu0 %vm2977_vm10, %v2976_v34 }
 0x4f5   :  { %2669 = vmatprep.subr.bf16.mxu0 %v2976_v34 }
 0x4f6   :  { %v2872_v9 = vpop.eup %2871 }
 0x4f7   :  { %v1108_v27 = vmul.f32 %v2872_v9, %v3441_v6  ;;  %v3536_v18 = vpop.eup %2873 }
 0x4f8   :  { %v2125_v58 = vsel %vm532_vm11, %v3536_v18, 0.0  ;;  %v3541_v4 = vpop.eup %2875 }
 0x4f9   :  { %v1109_v33 = vpack.c.bf16 %v1108_v27, %v1108_v27  ;;  %v2240_v6 = vsel %vm532_vm11, %v3541_v4, 0.0 }
 0x4fb   :  { %2660 = vmatmul.mubr.msk.bf16.vlgmr.msra.gmra.mrb[32].mxu0 %vm532_vm11, %v1109_v33 }
 0x4fc   :  { %2670 = vmatpush3.bf16.msra.mxu0 %v3449_v14  ;;  %2671 = vmatprep.mubr.msk.bf16.mxu0 %vm2977_vm10, %v2976_v34  ;;  %v1566_v14 = vpop.permute.xlu1 %1565 }
 0x4fd   :  { %2681 = vmatprep.subr.bf16.mxu0 %v2976_v34 }
 0x501   :  { %2126 = vadd.xlane.f32.xlu1 %v2125_v58 }
 0x505   :  { %2241 = vadd.xlane.f32.xlu0 %v2240_v6 }
 0x512   :  { %2131 = vrot.lane.b32.xlu1 %v3376_v48, %s2975_s5 }
 0x518   :  { %v1223_v1 = vpop.xlane.xlu1 %1222 }
 0x519   :  { %2877 = vrcp.f32 %v1223_v1 }
 0x51b   :  { %2246 = vrot.lane.b32.xlu0 %v3376_v48, %s2974_s8 }
 0x523   :  { %v2878_v32 = vpop.eup %2877 }
 0x524   :  { %v1225_v30 = vmul.f32 %v2878_v32, %v3455_v15  ;;  %v1339_v36 = vpop.xlane.xlu0 %1338 }
 0x525   :  { %2879 = vrcp.f32 %v1339_v36 }
 0x526   :  { %v1226_v37 = vpack.c.bf16 %v1225_v30, %v1225_v30 }
 0x528   :  { %2672 = vmatmul.mubr.msk.bf16.vlgmr.msra.gmra.mrb[36].mxu0 %vm532_vm11, %v1226_v37 }
 0x529   :  { %2682 = vmatpush3.bf16.msra.mxu0 %v3474_v29  ;;  %2683 = vmatprep.mubr.msk.bf16.mxu0 %vm2977_vm10, %v2976_v34  ;;  %v1560_v29 = vpop.xlane.xlu0 %1559 }
 0x52a   :  { %2693 = vmatprep.subr.bf16.mxu0 %v2976_v34 }
 0x52f   :  { %v2880_v38 = vpop.eup %2879 }
 0x530   :  { %v1341_v31 = vmul.f32 %v2880_v38, %v3466_v24 }
 0x532   :  { %v1342_v35 = vpack.c.bf16 %v1341_v31, %v1341_v31 }
 0x534   :  { %2684 = vmatmul.mubr.msk.bf16.vlgmr.msra.gmra.mrb[40].mxu0 %vm532_vm11, %v1342_v35 }
 0x535   :  { %2694 = vmatpush3.bf16.msra.mxu0 %v3378_v49  ;;  %2695 = vmatprep.mubr.msk.bf16.mxu0 %vm2977_vm10, %v2976_v34 }
 0x536   :  { %2705 = vmatprep.subr.bf16.mxu0 %v2976_v34 }
 0x54d   :  { %v1451_v15 = vpop.xlane.xlu1 %1450 }
 0x54e   :  { %2881 = vrcp.f32 %v1451_v15 }
 0x54f   :  { %2883 = vrcp.f32 %v1560_v29 }
 0x551   :  { %v1675_v54 = vpop.xlane.xlu1 %1674 }
 0x552   :  { %2885 = vrcp.f32 %v1675_v54 }
 0x555   :  { %v1789_v45 = vpop.xlane.xlu0 %1788 }
 0x556   :  { %2887 = vrcp.f32 %v1789_v45 }
 0x558   :  { %v2882_v40 = vpop.eup %2881 }
 0x559   :  { %v1453_v41 = vmul.f32 %v2882_v40, %v3480_v42  ;;  %v2884_v44 = vpop.eup %2883  ;;  %v1900_v42 = vpop.xlane.xlu1 %1899 }
 0x55a   :  { %v1562_v49 = vmul.f32 %v2884_v44, %v3470_v28  ;;  %2889 = vrcp.f32 %v1900_v42 }
 0x55b   :  { %v1454_v24 = vpack.c.bf16 %v1453_v41, %v1453_v41 }
 0x55c   :  { %v1563_v21 = vpack.c.bf16 %v1562_v49, %v1562_v49  ;;  %v2886_v43 = vpop.eup %2885 }
 0x55d   :  { %2696 = vmatmul.mubr.msk.bf16.vlgmr.msra.gmra.mrb[44].mxu0 %vm532_vm11, %v1454_v24  ;;  %v1677_v51 = vmul.f32 %v2886_v43, %v3485_v59  ;;  %v2011_v28 = vpop.xlane.xlu0 %2010  ;;  %v2017_v8 = vpop.permute.xlu1 %2016 }
 0x55e   :  { %2706 = vmatpush3.bf16.msra.mxu0 %v1566_v14  ;;  %2707 = vmatprep.mubr.msk.bf16.mxu0 %vm2977_vm10, %v2976_v34  ;;  %2891 = vrcp.f32 %v2011_v28 }
 0x55f   :  { %2717 = vmatprep.subr.bf16.mxu0 %v2976_v34  ;;  %v1678_v57 = vpack.c.bf16 %v1677_v51, %v1677_v51 }
 0x560   :  { %v2888_v60 = vpop.eup %2887 }
 0x561   :  { %v1794_v62 = vpop.permute.xlu0 %1793  ;;  %v1791_v63 = vmul.f32 %v2888_v60, %v3489_v61 }
 0x563   :  { %v1792_v59 = vpack.c.bf16 %v1791_v63, %v1791_v63 }
 0x564   :  { %v2890_v2 = vpop.eup %2889 }
 0x565   :  { %v582_v47 = vpop.f32.mrb[12].mxu0  ;;  %2708 = vmatmul.mubr.msk.bf16.vlgmr.msra.gmra.mrb[48].mxu0 %vm532_vm11, %v1563_v21  ;;  %v1902_v3 = vmul.f32 %v2890_v2, %v3493_v53 }
 0x566   :  { %v588_v55 = vpack.c.bf16 %v582_v47, %v582_v47  ;;  %2718 = vmatpush3.bf16.msra.mxu0 %v1680_v26  ;;  %v2601_v50 = vpop.f32.mrb[13].mxu0  ;;  %2719 = vmatprep.mubr.msk.bf16.mxu0 %vm2977_vm10, %v2976_v34 }
 0x567   :  { %v585_v5 = vpop.f32.mrb[14].mxu0  ;;  %2729 = vmatprep.subr.bf16.mxu0 %v2976_v34  ;;  %v1903_v7 = vpack.c.bf16 %v1902_v3, %v1902_v3 }
 0x568   :  { %590 = vst.msk [vmem:[#allocation2] sm:$0xf] %vm589_vm12, %v588_v55  ;;  %v2602_v0 = vpop.f32.mrb[15].mxu0  ;;  %v2892_v39 = vpop.eup %2891 }
 0x569   :  { %v2013_v61 = vmul.f32 %v2892_v39, %v3497_v56 }
 0x56d   :  { %2720 = vmatmul.mubr.msk.bf16.vlgmr.msra.gmra.mrb[52].mxu0 %vm532_vm11, %v1678_v57 }
 0x56e   :  { %2730 = vmatpush3.bf16.msra.mxu0 %v1794_v62  ;;  %2731 = vmatprep.mubr.msk.bf16.mxu0 %vm2977_vm10, %v2976_v34 }
 0x56f   :  { %2741 = vmatprep.subr.bf16.mxu0 %v2976_v34 }
 0x575   :  { %2732 = vmatmul.mubr.msk.bf16.vlgmr.msra.gmra.mrb[56].mxu0 %vm532_vm11, %v1792_v59 }
 0x576   :  { %2742 = vmatpush3.bf16.msra.mxu0 %v3376_v48  ;;  %2743 = vmatprep.mubr.msk.bf16.mxu0 %vm2977_vm10, %v2976_v34  ;;  %v2014_v48 = vpack.c.bf16 %v2013_v61, %v2013_v61 }
 0x577   :  { %2753 = vmatprep.subr.bf16.mxu0 %v2976_v34 }
 0x57d   :  { %2744 = vmatmul.mubr.msk.bf16.vlgmr.msra.gmra.mrb[60].mxu0 %vm532_vm11, %v1903_v7 }
 0x57e   :  { %2754 = vmatpush3.bf16.msra.mxu0 %v2017_v8  ;;  %2755 = vmatprep.mubr.msk.bf16.mxu0 %vm2977_vm10, %v2976_v34 }
 0x57f   :  { %2765 = vmatprep.subr.bf16.mxu0 %v2976_v34 }
 0x585   :  { %2756 = vmatmul.mubr.msk.bf16.vlgmr.msra.gmra.mrb[64].mxu0 %vm532_vm11, %v2014_v48 }
 0x586   :  { %2767 = vmatprep.mubr.msk.bf16.mxu0 %vm2977_vm10, %v2976_v34 }
 0x58e   :  { %v2127_v53 = vpop.xlane.xlu1 %2126 }
 0x58f   :  { %2893 = vrcp.f32 %v2127_v53 }
 0x592   :  { %v2132_v10 = vpop.permute.xlu1 %2131  ;;  %v2242_v20 = vpop.xlane.xlu0 %2241 }
 0x593   :  { %2895 = vrcp.f32 %v2242_v20  ;;  %2766 = vmatpush3.bf16.msra.mxu0 %v2132_v10 }
 0x594   :  { %2777 = vmatprep.subr.bf16.mxu0 %v2976_v34 }
 0x596   :  { %v2247_v12 = vpop.permute.xlu0 %2246 }
 0x599   :  { %v2894_v16 = vpop.eup %2893 }
 0x59a   :  { %v2129_v46 = vmul.f32 %v2894_v16, %v3536_v18 }
 0x59c   :  { %v2130_v56 = vpack.c.bf16 %v2129_v46, %v2129_v46 }
 0x59d   :  { %v2896_v17 = vpop.eup %2895 }
 0x59e   :  { %2768 = vmatmul.mubr.msk.bf16.vlgmr.msra.gmra.mrb[68].mxu0 %vm532_vm11, %v2130_v56  ;;  %v2244_v22 = vmul.f32 %v2896_v17, %v3541_v4 }
 0x59f   :  { %2778 = vmatpush3.bf16.msra.mxu0 %v2247_v12  ;;  %2779 = vmatprep.mubr.msk.bf16.mxu0 %vm2977_vm10, %v2976_v34 }
 0x5a0   :  { %v2245_v13 = vpack.c.bf16 %v2244_v22, %v2244_v22 }
 0x5a6   :  { %2780 = vmatmul.mubr.msk.bf16.vlgmr.msra.gmra.mrb[72].mxu0 %vm532_vm11, %v2245_v13 }
 0x5aa   :  { %v696_v19 = vpop.f32.mrb[16].mxu0 }
 0x5ab   :  { %v702_v23 = vpack.c.bf16 %v696_v19, %v696_v19  ;;  %v2613_v52 = vpop.f32.mrb[17].mxu0 }
 0x5ac   :  { %v699_v25 = vpop.f32.mrb[18].mxu0 }
 0x5ad   :  { %v2614_v11 = vpop.f32.mrb[19].mxu0  ;;  %704 = vrot.lane.b32.xlu1 %v702_v23, %s2978_s7 }
 0x5b6   :  { %v811_v9 = vpop.f32.mrb[20].mxu0 }
 0x5b7   :  { %v817_v27 = vpack.c.bf16 %v811_v9, %v811_v9  ;;  %v2625_v33 = vpop.f32.mrb[21].mxu0 }
 0x5b8   :  { %v814_v18 = vpop.f32.mrb[22].mxu0 }
 0x5b9   :  { %v2626_v58 = vpop.f32.mrb[23].mxu0  ;;  %819 = vrot.lane.b32.xlu1 %v817_v27, %s2979_s19 }
 0x5be   :  { %v926_v34 = vpop.f32.mrb[24].mxu0 }
 0x5bf   :  { %v932_v4 = vpack.c.bf16 %v926_v34, %v926_v34  ;;  %v2637_v6 = vpop.f32.mrb[25].mxu0 }
 0x5c0   :  { %v929_v14 = vpop.f32.mrb[26].mxu0  ;;  %v2815_v6 = vld [vmem:[#allocation6] sm:$0xff]  }
 0x5c1   :  { %v2638_v1 = vpop.f32.mrb[27].mxu0  ;;  %934 = vrot.lane.b32.xlu0 %v932_v4, %s2980_s20  ;;  %v2816_v14 = vld [vmem:[#allocation6 + $0x8] sm:$0xff]   ;;  %2783 = vmatprep.subr.bf16.mxu1 %v2815_v6 }
 0x5c2   :  { %2784 = vmatpush3.bf16.msra.mxu1 %v2815_v6 }
 0x5c3   :  { %2785 = vmatprep.subr.bf16.mxu1 %v2816_v14 }
 0x5c6   :  { %v1035_v26 = vpop.f32.mrb[28].mxu0  ;;  %2786 = vmatpush3.bf16.msra.mxu1 %v2816_v14 }
 0x5c7   :  { %v1041_v32 = vpack.c.bf16 %v1035_v26, %v1035_v26  ;;  %v2649_v30 = vpop.f32.mrb[29].mxu0 }
 0x5c8   :  { %v1038_v36 = vpop.f32.mrb[30].mxu0 }
 0x5c9   :  { %v1043_v37 = vrot.slane %v1041_v32, 4  ;;  %v2650_v38 = vpop.f32.mrb[31].mxu0 }
 0x5cb   :  { %1046 = vst.msk [vmem:[#allocation2] sm:$0xf0] %vm1045_vm13, %v1043_v37 }
 0x5ce   :  { %v1151_v31 = vpop.f32.mrb[32].mxu0 }
 0x5cf   :  { %v1157_v35 = vpack.c.bf16 %v1151_v31, %v1151_v31  ;;  %v2661_v15 = vpop.f32.mrb[33].mxu0 }
 0x5d0   :  { %v1154_v29 = vpop.f32.mrb[34].mxu0 }
 0x5d1   :  { %v1159_v54 = vrot.slane %v1157_v35, 4  ;;  %v2662_v40 = vpop.f32.mrb[35].mxu0 }
 0x5d3   :  { %1160 = vrot.lane.b32.xlu1 %v1159_v54, %s2978_s7 }
 0x5fb   :  { %v1267_v41 = vpop.f32.mrb[36].mxu0 }
 0x5fc   :  { %v1273_v24 = vpack.c.bf16 %v1267_v41, %v1267_v41  ;;  %v2673_v44 = vpop.f32.mrb[37].mxu0 }
 0x5fd   :  { %v1270_v49 = vpop.f32.mrb[38].mxu0 }
 0x5fe   :  { %v1275_v45 = vrot.slane %v1273_v24, 4  ;;  %v2674_v21 = vpop.f32.mrb[39].mxu0 }
 0x600   :  { %1276 = vrot.lane.b32.xlu1 %v1275_v45, %s2979_s19 }
 0x607   :  { %v1383_v43 = vpop.f32.mrb[40].mxu0 }
 0x608   :  { %v1389_v47 = vpack.c.bf16 %v1383_v43, %v1383_v43  ;;  %v2685_v42 = vpop.f32.mrb[41].mxu0 }
 0x609   :  { %v1386_v55 = vpop.f32.mrb[42].mxu0  ;;  %v2374_v42 = vld [vmem:[%s3660_s0 + $0x10] sm:$0xff] }
 0x60a   :  { %v1391_v50 = vrot.slane %v1389_v47, 4  ;;  %v2686_v51 = vpop.f32.mrb[43].mxu0  ;;  %v2372_v55 = vld [vmem:[%s3660_s0] sm:$0xff] }
 0x60b   :  { %v2474_v51 = vld [vmem:[%s3669_s9] ss:$0 sm:$0xff] }
 0x60c   :  { %1392 = vrot.lane.b32.xlu1 %v1391_v50, %s2980_s20 }
 0x61f   :  { %v705_v28 = vpop.permute.xlu1 %704 }
 0x620   :  { %708 = vst.msk [vmem:[#allocation2] sm:$0xf] %vm707_vm14, %v705_v28  ;;  %v2375_v28 = vld [vmem:[%s3660_s0 + $0x18] sm:$0xff] }
 0x62b   :  { %v820_v5 = vpop.permute.xlu1 %819 }
 0x62c   :  { %823 = vst.msk [vmem:[#allocation2] sm:$0xf] %vm822_vm15, %v820_v5 }
 0x630   :  { %v1492_v0 = vpop.f32.mrb[44].mxu0 }
 0x631   :  { %v1498_v57 = vpack.c.bf16 %v1492_v0, %v1492_v0  ;;  %v2697_v60 = vpop.f32.mrb[45].mxu0 }
 0x632   :  { %v1495_v62 = vpop.f32.mrb[46].mxu0 }
 0x633   :  { %1499 = vst.msk [vmem:[#allocation2 + $0x8] sm:$0xf] %vm589_vm12, %v1498_v57  ;;  %v2698_v63 = vpop.f32.mrb[47].mxu0  ;;  %v935_v59 = vpop.permute.xlu0 %934  ;;  %v2373_v57 = vld [vmem:[%s3660_s0 + $0x8] sm:$0xff]  ;;  %s2941_s0 = scalar_lea.vmem %s2401_s2, 512 }
 0x634   :  { %938 = vst.msk [vmem:[#allocation2] sm:$0xf] %vm937_vm1, %v935_v59  ;;  %p2942_p2 = scmp.ne.s32.totalorder %s2401_s2, %s2941_s0  ;;  %p2947_p4 = scmp.lt.s32.totalorder %s2941_s0, %s2941_s0 }
 0x636   :  { %p2948_p5 = por %p2947_p4, %p2946_p3 }
 0x638   :  { %v1605_v2 = vpop.f32.mrb[48].mxu0  ;;  %p2949_p6 = pnand %p2948_p5, %p2942_p2 }
 0x639   :  { %v1611_v3 = vpack.c.bf16 %v1605_v2, %v1605_v2  ;;  %v2709_v7 = vpop.f32.mrb[49].mxu0 }
 0x63a   :  { %v1608_v39 = vpop.f32.mrb[50].mxu0 }
 0x63b   :  { %1613 = vrot.lane.b32.xlu1 %v1611_v3, %s2978_s7  ;;  %v2710_v8 = vpop.f32.mrb[51].mxu0 }
 0x640   :  { %v1719_v61 = vpop.f32.mrb[52].mxu0 }
 0x641   :  { %v1725_v48 = vpack.c.bf16 %v1719_v61, %v1719_v61  ;;  %v2721_v53 = vpop.f32.mrb[53].mxu0 }
 0x642   :  { %v1722_v10 = vpop.f32.mrb[54].mxu0 }
 0x643   :  { %1727 = vrot.lane.b32.xlu0 %v1725_v48, %s2979_s19  ;;  %v2722_v20 = vpop.f32.mrb[55].mxu0 }
 0x645   :  { %v1161_v16 = vpop.permute.xlu1 %1160 }
 0x646   :  { %1164 = vst.msk [vmem:[#allocation2] sm:$0xf0] %vm1163_vm2, %v1161_v16 }
 0x648   :  { %v1833_v46 = vpop.f32.mrb[56].mxu0 }
 0x649   :  { %v1839_v56 = vpack.c.bf16 %v1833_v46, %v1833_v46  ;;  %v2733_v17 = vpop.f32.mrb[57].mxu0 }
 0x64a   :  { %v1836_v12 = vpop.f32.mrb[58].mxu0 }
 0x64b   :  { %1841 = vrot.lane.b32.xlu0 %v1839_v56, %s2980_s20  ;;  %v2734_v22 = vpop.f32.mrb[59].mxu0 }
 0x650   :  { %v1941_v13 = vpop.f32.mrb[60].mxu0 }
 0x651   :  { %v1947_v19 = vpack.c.bf16 %v1941_v13, %v1941_v13  ;;  %v2745_v23 = vpop.f32.mrb[61].mxu0 }
 0x652   :  { %v1944_v52 = vpop.f32.mrb[62].mxu0 }
 0x653   :  { %v1949_v25 = vrot.slane %v1947_v19, 4  ;;  %v2746_v11 = vpop.f32.mrb[63].mxu0 }
 0x655   :  { %1951 = vst.msk [vmem:[#allocation2 + $0x8] sm:$0xf0] %vm1045_vm13, %v1949_v25 }
 0x658   :  { %v2056_v9 = vpop.f32.mrb[64].mxu0 }
 0x659   :  { %v2062_v27 = vpack.c.bf16 %v2056_v9, %v2056_v9  ;;  %v2757_v33 = vpop.f32.mrb[65].mxu0 }
 0x65a   :  { %v2059_v18 = vpop.f32.mrb[66].mxu0 }
 0x65b   :  { %v2064_v58 = vrot.slane %v2062_v27, 4  ;;  %v2758_v34 = vpop.f32.mrb[67].mxu0 }
 0x65d   :  { %2065 = vrot.lane.b32.xlu1 %v2064_v58, %s2978_s7 }
 0x671   :  { %v2171_v4 = vpop.f32.mrb[68].mxu0 }
 0x672   :  { %v2177_v1 = vpack.c.bf16 %v2171_v4, %v2171_v4  ;;  %v1277_v26 = vpop.permute.xlu1 %1276  ;;  %v2769_v32 = vpop.f32.mrb[69].mxu0 }
 0x673   :  { %1280 = vst.msk [vmem:[#allocation2] sm:$0xf0] %vm1279_vm3, %v1277_v26  ;;  %v2174_v30 = vpop.f32.mrb[70].mxu0 }
 0x674   :  { %v2179_v36 = vrot.slane %v2177_v1, 4  ;;  %v2770_v37 = vpop.f32.mrb[71].mxu0 }
 0x676   :  { %2180 = vrot.lane.b32.xlu1 %v2179_v36, %s2979_s19 }
 0x679   :  { %v2286_v38 = vpop.f32.mrb[72].mxu0 }
 0x67a   :  { %v2292_v31 = vpack.c.bf16 %v2286_v38, %v2286_v38  ;;  %v2781_v35 = vpop.f32.mrb[73].mxu0 }
 0x67b   :  { %v2289_v15 = vpop.f32.mrb[74].mxu0 }
 0x67c   :  { %v2294_v29 = vrot.slane %v2292_v31, 4  ;;  %v2782_v54 = vpop.f32.mrb[75].mxu0 }
 0x67e   :  { %v1393_v40 = vpop.permute.xlu1 %1392  ;;  %2295 = vrot.lane.b32.xlu1 %v2294_v29, %s2980_s20 }
 0x67f   :  { %1396 = vst.msk [vmem:[#allocation2] sm:$0xf0] %vm1395_vm4, %v1393_v40 }
 0x686   :  { %v2299_v41 = vld [vmem:[#allocation2] sm:$0xff] }
 0x687   :  { %2787 = vmatprep.mubr.msk.bf16.mxu1 %vm75_vm0, %v2299_v41 }
 0x6ad   :  { %v1614_v24 = vpop.permute.xlu1 %1613 }
 0x6ae   :  { %1616 = vst.msk [vmem:[#allocation2 + $0x8] sm:$0xf] %vm707_vm14, %v1614_v24 }
 0x6b5   :  { %v1728_v44 = vpop.permute.xlu0 %1727 }
 0x6b6   :  { %1730 = vst.msk [vmem:[#allocation2 + $0x8] sm:$0xf] %vm822_vm15, %v1728_v44 }
 0x6bd   :  { %v1842_v49 = vpop.permute.xlu0 %1841 }
 0x6be   :  { %1844 = vst.msk [vmem:[#allocation2 + $0x8] sm:$0xf] %vm937_vm1, %v1842_v49 }
 0x6cf   :  { %v2066_v45 = vpop.permute.xlu1 %2065 }
 0x6d0   :  { %2068 = vst.msk [vmem:[#allocation2 + $0x8] sm:$0xf0] %vm1163_vm2, %v2066_v45 }
 0x6e8   :  { %v2181_v21 = vpop.permute.xlu1 %2180 }
 0x6e9   :  { %2183 = vst.msk [vmem:[#allocation2 + $0x8] sm:$0xf0] %vm1279_vm3, %v2181_v21 }
 0x6f0   :  { %v2296_v43 = vpop.permute.xlu1 %2295 }
 0x6f1   :  { %2298 = vst.msk [vmem:[#allocation2 + $0x8] sm:$0xf0] %vm1395_vm4, %v2296_v43 }
 0x6f8   :  { %v2300_v47 = vld [vmem:[#allocation2 + $0x8] sm:$0xff] }
 0x6f9   :  { %2788 = vmatmul.mubr.msk.bf16.vlgmr.msra.gmra.mrb[72].mxu1 %vm75_vm0, %v2300_v47 }
 0x7cc   :  { %v2789_v50 = vpop.f32.mrb[72].mxu1 }
 0x7cd   :  { %v2378_v5 = vadd.f32 %v2789_v50, %v2374_v42  ;;  %v2357_v0 = vpop.f32.mrb[73].mxu1 }
 0x7ce   :  { %v2376_v60 = vadd.f32 %v2372_v55, %v2357_v0  ;;  %v2790_v62 = vpop.f32.mrb[74].mxu1 }
 0x7cf   :  { %v2389_v63 = vadd.f32 %v2474_v51, %v2378_v5  ;;  %v2379_v59 = vadd.f32 %v2790_v62, %v2375_v28  ;;  %v2360_v2 = vpop.f32.mrb[75].mxu1 }
 0x7d0   :  { %v2387_v3 = vadd.f32 %v2474_v51, %v2376_v60  ;;  %v2377_v7 = vadd.f32 %v2373_v57, %v2360_v2 }
 0x7d1   :  { %2393 = vst.msk [vmem:[#allocation8 + $0x10] sm:$0xff] %vm75_vm0, %v2389_v63  ;;  %v2390_v39 = vadd.f32 %v2474_v51, %v2379_v59 }
 0x7d2   :  { %2391 = vst.msk [vmem:[#allocation8] sm:$0xff] %vm75_vm0, %v2387_v3  ;;  %v2388_v8 = vadd.f32 %v2474_v51, %v2377_v7 }
 0x7d3   :  { %2394 = vst.msk [vmem:[#allocation8 + $0x18] sm:$0xff] %vm75_vm0, %v2390_v39 }
 0x7d4   :  { %2392 = vst.msk [vmem:[#allocation8 + $0x8] sm:$0xff] %vm75_vm0, %v2388_v8 }
 0x7d5   :  { %2952 = shalt.err (!%p2949_p6)
}
 0x7d6   :  { %s2953_s15 = scalar_lea.hbm %s3672_s12, 512 }
 0x7d7   :  { %p2954_p7 = scmp.ne.s32.totalorder %s3672_s12, %s2953_s15  ;;  %p2957_p8 = scmp.lt.u32.totalorder %s2953_s15, %s3672_s12 }
 0x7d9   :  { %p2959_p9 = pnand %p2957_p8, %p2954_p7 }
 0x7db   :  { %2962 = shalt.err (!%p2959_p9)
}
 0x7dc   :  { %s2982_s17 = smov 128  }
 0x7dd   :  { %2406 = dma.vmem_to_hbm [thread:$0]  %s2401_s2, 512, %s3672_s12, [#allocation5], %s2982_s17, %s2982_s17, %s2978_s7  }
 0x7de   :  { %2967 = dma.done.wait [#allocation5], 512  }
 0x7df   :  { %2968 = vsyncadd [#allocation5], 4294966784 }
 0x7e0   :  { %2410 = vsyncpa [#allocation4], 1 }
 0x7e1   :  { %2411 = vsyncpa [#allocation7], 1 }
 0x7e2   :  { %2412 = vsyncpa [#allocation5], 1 }

</bundles_post_ra>
